<compile_context>
chip_gen: v7x
topology: tpu7x:2x2x1
jax: 0.10.0
libtpu: 0.0.40
codegen_flags: <defaults>
</compile_context>

<pallas_src>
import jax
import jax.numpy as jnp
from jax.experimental import pallas as pl
from jax.experimental.pallas import tpu as pltpu

EPS = 1e-5
_BF16 = jnp.bfloat16

_COMPILER_PARAMS = pltpu.CompilerParams(
    dimension_semantics=("parallel",),
    vmem_limit_bytes=32 * 1024 * 1024,
)


def _row_tile(rows, target=256):
    """Pick a row tile: prefer `target`, else the largest multiple-of-8 divisor
    of `rows` (<=1024), else the whole row range as a single block."""
    if rows % target == 0:
        return target
    best = None
    for t in range(8, min(rows, 1024) + 1, 8):
        if rows % t == 0:
            best = t
    return best if best is not None else rows


def _bn_affine(partial_stats, count, gamma, beta):
    """Fold per-tile partial (sum, sum_sq) + (gamma, beta) into scale/shift."""
    total = jnp.sum(partial_stats, axis=0)            # (2, C): [sum, sum_sq]
    mean = total[0] / count
    # one-pass (biased) variance; clamp guards fp cancellation for large means
    var = jnp.maximum(total[1] / count - mean * mean, 0.0)
    rstd = jax.lax.rsqrt(var + EPS)
    scale = gamma.reshape(-1) * rstd
    shift = beta.reshape(-1) - mean * scale
    return scale.reshape(1, -1).astype(jnp.float32), \
        shift.reshape(1, -1).astype(jnp.float32)


def bottleneck_forward(x_nchw, p):
    # Public interface is PyTorch NCHW; compute in NHWC (channels -> lanes).
    # TODO(synk): keep NHWC end-to-end in the surrounding model to avoid these
    # boundary transposes (an extra HBM round-trip per block).
    x = jnp.transpose(x_nchw, (0, 2, 3, 1)).astype(jnp.float32)
    N, H, W, Cin = x.shape
    Cm = p["w1"].shape[1]
    Cout = p["w3"].shape[1]
    has_proj = ("w4" in p) and (p["w4"] is not None)

    rows = N * H * W
    HW = H * W
    TR = _row_tile(rows)
    nb = rows // TR
    cnt = jnp.float32(rows)

    x2d = x.reshape(rows, Cin)

    # bf16 weights for the MXU (f32 accumulation inside the kernels)
    w1 = p["w1"].astype(_BF16)                         # (Cin, Cm)
    w2 = p["w2"].reshape(9, Cm, Cm).astype(_BF16)      # HWIO -> (tap, Cin, Cout)
    w3 = p["w3"].astype(_BF16)                         # (Cm, Cout)

    def full(shape):
        shape = tuple(shape)
        return pl.BlockSpec(shape, lambda i: (0,) * len(shape))

    def row2d(c):
        return pl.BlockSpec((TR, c), lambda i: (i, 0))

    def img3d(c):
        return pl.BlockSpec((1, HW, c), lambda i: (i, 0, 0))

    def st_spec(c):
        return pl.BlockSpec((1, 2, c), lambda i: (i, 0, 0))

    # ---- pass 1: conv1 (+ fused conv4 projection) + bn1 partial stats --------
    # conv biases b1/b4 are omitted: they are cancelled by the following BN.
    if has_proj:
        w14 = jnp.concatenate([w1, p["w4"].astype(_BF16)], axis=1)  # (Cin, Cm+Cout)

        def conv1_kernel(x_ref, w_ref, h1_ref, res_ref, st_ref):
            z = jnp.dot(x_ref[...].astype(_BF16), w_ref[...],
                        preferred_element_type=jnp.float32)
            h1 = z[:, :Cm]
            h1_ref[...] = h1
            res_ref[...] = z[:, Cm:]
            st_ref[0:1, 0:1, :] = jnp.sum(h1, axis=0, keepdims=True).reshape(1, 1, Cm)
            st_ref[0:1, 1:2, :] = jnp.sum(h1 * h1, axis=0, keepdims=True).reshape(1, 1, Cm)

        h1pre, res2d, st1 = pl.pallas_call(
            conv1_kernel,
            out_shape=(
                jax.ShapeDtypeStruct((rows, Cm), jnp.float32),
                jax.ShapeDtypeStruct((rows, Cout), jnp.float32),
                jax.ShapeDtypeStruct((nb, 2, Cm), jnp.float32),
            ),
            grid_spec=pltpu.PrefetchScalarGridSpec(
                num_scalar_prefetch=0,
                grid=(nb,),
                in_specs=[row2d(Cin), full(w14.shape)],
                out_specs=(row2d(Cm), row2d(Cout), st_spec(Cm)),
            ),
            compiler_params=_COMPILER_PARAMS,
        )(x2d, w14)
    else:
        def conv1_kernel(x_ref, w_ref, h1_ref, st_ref):
            h1 = jnp.dot(x_ref[...].astype(_BF16), w_ref[...],
                         preferred_element_type=jnp.float32)
            h1_ref[...] = h1
            st_ref[0:1, 0:1, :] = jnp.sum(h1, axis=0, keepdims=True).reshape(1, 1, Cm)
            st_ref[0:1, 1:2, :] = jnp.sum(h1 * h1, axis=0, keepdims=True).reshape(1, 1, Cm)

        h1pre, st1 = pl.pallas_call(
            conv1_kernel,
            out_shape=(
                jax.ShapeDtypeStruct((rows, Cm), jnp.float32),
                jax.ShapeDtypeStruct((nb, 2, Cm), jnp.float32),
            ),
            grid_spec=pltpu.PrefetchScalarGridSpec(
                num_scalar_prefetch=0,
                grid=(nb,),
                in_specs=[row2d(Cin), full(w1.shape)],
                out_specs=(row2d(Cm), st_spec(Cm)),
            ),
            compiler_params=_COMPILER_PARAMS,
        )(x2d, w1)
        res2d = x2d  # identity residual: conv4 skipped entirely

    sc1, sh1 = _bn_affine(st1, cnt, p["g1"], p["be1"])

    # ---- pass 2: bn1+relu -> conv2 3x3 (roll + mask taps) + bn2 partial stats -
    # Precompute one (HW, 1) f32 boundary mask per tap (built outside the kernel
    # so no iota / integer div-mod is needed inside).
    yy, xx = jnp.meshgrid(jnp.arange(H), jnp.arange(W), indexing="ij")
    mask_list = []
    for dy in (-1, 0, 1):
        for dx in (-1, 0, 1):
            ok = ((yy + dy >= 0) & (yy + dy < H) &
                  (xx + dx >= 0) & (xx + dx < W))
            mask_list.append(ok.astype(jnp.float32).reshape(HW, 1))
    tap_masks = jnp.stack(mask_list, axis=0)           # (9, HW, 1)

    h1pre3 = h1pre.reshape(N, HW, Cm)

    def conv2_kernel(h1_ref, w2_ref, m_ref, sc_ref, sh_ref, h2_ref, st_ref):
        a = h1_ref[...].reshape(HW, Cm)
        a = jnp.maximum(a * sc_ref[...] + sh_ref[...], 0.0)    # bn1 + relu (f32)
        w2v = w2_ref[...]                                      # (9, Cm, Cm) bf16
        mv = m_ref[...]                                        # (9, HW, 1) f32
        acc = jnp.zeros((HW, Cm), jnp.float32)
        for k in range(9):
            dy, dx = k // 3 - 1, k % 3 - 1
            d = dy * W + dx
            if d == 0:
                tap = a
            else:
                # shifted[r] == a[r + d] inside the mask-valid region
                tap = pltpu.roll(a, (-d) % HW, axis=0) * mv[k]
            acc = acc + jnp.dot(tap.astype(_BF16), w2v[k],
                                preferred_element_type=jnp.float32)
        h2_ref[...] = acc.reshape(1, HW, Cm)
        st_ref[0:1, 0:1, :] = jnp.sum(acc, axis=0, keepdims=True).reshape(1, 1, Cm)
        st_ref[0:1, 1:2, :] = jnp.sum(acc * acc, axis=0, keepdims=True).reshape(1, 1, Cm)

    h2pre3, st2 = pl.pallas_call(
        conv2_kernel,
        out_shape=(
            jax.ShapeDtypeStruct((N, HW, Cm), jnp.float32),
            jax.ShapeDtypeStruct((N, 2, Cm), jnp.float32),
        ),
        grid_spec=pltpu.PrefetchScalarGridSpec(
            num_scalar_prefetch=0,
            grid=(N,),
            in_specs=[img3d(Cm), full(w2.shape), full(tap_masks.shape),
                      full((1, Cm)), full((1, Cm))],
            out_specs=(img3d(Cm), st_spec(Cm)),
        ),
        compiler_params=_COMPILER_PARAMS,
    )(h1pre3, w2, tap_masks, sc1, sh1)

    sc2, sh2 = _bn_affine(st2, cnt, p["g2"], p["be2"])

    # ---- pass 3: bn2+relu -> conv3 + residual add + bn3 partial stats ---------
    h2pre = h2pre3.reshape(rows, Cm)

    def conv3_kernel(h2_ref, r_ref, w3_ref, sc_ref, sh_ref, o_ref, st_ref):
        a = jnp.maximum(h2_ref[...] * sc_ref[...] + sh_ref[...], 0.0)  # bn2+relu
        z = jnp.dot(a.astype(_BF16), w3_ref[...],
                    preferred_element_type=jnp.float32)
        pre = z + r_ref[...]
        o_ref[...] = pre
        st_ref[0:1, 0:1, :] = jnp.sum(pre, axis=0, keepdims=True).reshape(1, 1, Cout)
        st_ref[0:1, 1:2, :] = jnp.sum(pre * pre, axis=0, keepdims=True).reshape(1, 1, Cout)

    pre3, st3 = pl.pallas_call(
        conv3_kernel,
        out_shape=(
            jax.ShapeDtypeStruct((rows, Cout), jnp.float32),
            jax.ShapeDtypeStruct((nb, 2, Cout), jnp.float32),
        ),
        grid_spec=pltpu.PrefetchScalarGridSpec(
            num_scalar_prefetch=0,
            grid=(nb,),
            in_specs=[row2d(Cm), row2d(Cout), full(w3.shape),
                      full((1, Cm)), full((1, Cm))],
            out_specs=(row2d(Cout), st_spec(Cout)),
        ),
        compiler_params=_COMPILER_PARAMS,
    )(h2pre, res2d, w3, sc2, sh2)

    sc3, sh3 = _bn_affine(st3, cnt, p["g3"], p["be3"])

    # ---- pass 4: bn3 + relu ----------------------------------------------------
    def bn3_kernel(pre_ref, sc_ref, sh_ref, o_ref):
        o_ref[...] = jnp.maximum(pre_ref[...] * sc_ref[...] + sh_ref[...], 0.0)

    out2d = pl.pallas_call(
        bn3_kernel,
        out_shape=jax.ShapeDtypeStruct((rows, Cout), jnp.float32),
        grid_spec=pltpu.PrefetchScalarGridSpec(
            num_scalar_prefetch=0,
            grid=(nb,),
            in_specs=[row2d(Cout), full((1, Cout)), full((1, Cout))],
            out_specs=row2d(Cout),
        ),
        compiler_params=_COMPILER_PARAMS,
    )(pre3, sc3, sh3)

    out = out2d.reshape(N, H, W, Cout)
    return jnp.transpose(out, (0, 3, 1, 2))            # NHWC -> NCHW


def init_params(key, in_planes, out_planes):
    mid = out_planes // 2 if out_planes >= in_planes else in_planes // 2
    ks = jax.random.split(key, 8)

    def w(k, shape, fan_in):
        return jax.random.normal(k, shape, jnp.float32) / jnp.sqrt(float(fan_in))

    p = {
        "w1": w(ks[0], (in_planes, mid), in_planes),       # conv1 (Cin, Cm)
        "b1": w(ks[1], (1, mid), in_planes),
        "g1": jnp.ones((1, mid), jnp.float32),             # bn1 gamma / beta
        "be1": jnp.zeros((1, mid), jnp.float32),
        "w2": w(ks[2], (3, 3, mid, mid), 9 * mid),         # conv2 HWIO
        "b2": w(ks[3], (1, mid), 9 * mid),
        "g2": jnp.ones((1, mid), jnp.float32),
        "be2": jnp.zeros((1, mid), jnp.float32),
        "w3": w(ks[4], (mid, out_planes), mid),            # conv3 (Cm, Cout)
        "b3": w(ks[5], (1, out_planes), mid),
        "g3": jnp.ones((1, out_planes), jnp.float32),
        "be3": jnp.zeros((1, out_planes), jnp.float32),
    }
    if in_planes != out_planes:
        p["w4"] = w(ks[6], (in_planes, out_planes), in_planes)  # conv4 projection
        p["b4"] = w(ks[7], (1, out_planes), in_planes)
    return p


def reference_forward(x_nchw, p):
    """Pure-JAX reference with PyTorch semantics (conv biases + training-mode
    BN), using the same bf16-operand / f32-accumulate matmul precision as the
    kernels so the comparison stays tight."""
    x = jnp.transpose(x_nchw, (0, 2, 3, 1)).astype(jnp.float32)

    def conv1x1(h, w, b):
        y = jnp.einsum("nhwc,cd->nhwd", h.astype(_BF16), w.astype(_BF16),
                       preferred_element_type=jnp.float32)
        return y + b.reshape(1, 1, 1, -1)

    def bn_relu(h, g, be):
        m = jnp.mean(h, axis=(0, 1, 2), keepdims=True)
        v = jnp.mean((h - m) ** 2, axis=(0, 1, 2), keepdims=True)
        return jax.nn.relu((h - m) * (g.reshape(1, 1, 1, -1) * jax.lax.rsqrt(v + EPS))
                           + be.reshape(1, 1, 1, -1))

    h = bn_relu(conv1x1(x, p["w1"], p["b1"]), p["g1"], p["be1"])
    h = jax.lax.conv_general_dilated(
        h.astype(_BF16), p["w2"].astype(_BF16), (1, 1), "SAME",
        dimension_numbers=("NHWC", "HWIO", "NHWC"),
        preferred_element_type=jnp.float32)
    h = bn_relu(h + p["b2"].reshape(1, 1, 1, -1), p["g2"], p["be2"])
    out3 = conv1x1(h, p["w3"], p["b3"])
    if ("w4" in p) and (p["w4"] is not None):
        res = conv1x1(x, p["w4"], p["b4"])
    else:
        res = x
    out = bn_relu(out3 + res, p["g3"], p["be3"])
    return jnp.transpose(out, (0, 3, 1, 2))


if __name__ == "__main__":
    key = jax.random.PRNGKey(0)
    kx, kp = jax.random.split(key)
    in_planes, out_planes = 4, 8
    N, H, W = 2, 16, 16

    x = jax.random.normal(kx, (N, in_planes, H, W), jnp.float32)  # NCHW, like PyTorch
    params = init_params(kp, in_planes, out_planes)

    fwd = jax.jit(bottleneck_forward)
    out = jax.block_until_ready(fwd(x, params))
    ref = jax.block_until_ready(reference_forward(x, params))

    assert out.shape == (N, out_planes, H, W), out.shape
    err = float(jnp.max(jnp.abs(out - ref)))
    assert err < 1e-2, err
    print("KERNEL_OK")
</pallas_src>

<mosaic_0001>
module attributes {stable_mosaic.version = 11 : i64} {
  func.func @conv1_kernel(%arg0: i32, %arg1: memref<256x4xf32, #tpu.memory_space<vmem>>, %arg2: memref<4x12xbf16, #tpu.memory_space<vmem>>, %arg3: memref<256x4xf32, #tpu.memory_space<vmem>>, %arg4: memref<256x8xf32, #tpu.memory_space<vmem>>, %arg5: memref<1x2x4xf32, #tpu.memory_space<vmem>>) attributes {dimension_semantics = [#tpu.dimension_semantics<parallel>], iteration_bounds = array<i64: 2>, scalar_prefetch = 0 : i64, scratch_operands = 0 : i64, tpu.core_type = #tpu.core_type<tc>, window_params = [{transform_indices = @transform_0, window_bounds = array<i64: 256, 4>}, {pipeline_mode = #tpu.pipeline_mode<synchronous>, transform_indices = @transform_1, window_bounds = array<i64: 4, 12>}, {transform_indices = @transform_2, window_bounds = array<i64: 256, 4>}, {transform_indices = @transform_3, window_bounds = array<i64: 256, 8>}, {transform_indices = @transform_4, window_bounds = array<i64: 1, 2, 4>}]} {
    %c0 = arith.constant 0 : index
    %c0_0 = arith.constant 0 : index
    %0 = vector.load %arg1[%c0, %c0_0] : memref<256x4xf32, #tpu.memory_space<vmem>>, vector<256x4xf32>
    %1 = arith.truncf %0 : vector<256x4xf32> to vector<256x4xbf16>
    %c0_1 = arith.constant 0 : index
    %c0_2 = arith.constant 0 : index
    %2 = vector.load %arg2[%c0_1, %c0_2] : memref<4x12xbf16, #tpu.memory_space<vmem>>, vector<4x12xbf16>
    %cst = arith.constant dense<0.000000e+00> : vector<256x12xf32>
    %3 = tpu.matmul %1, %2, %cst {dimension_numbers = #tpu.dot_dimension_numbers<[1], [0], [0], [1], [0, 0, 1, 1], [], []>} : vector<256x4xbf16>, vector<4x12xbf16>, vector<256x12xf32> -> vector<256x12xf32>
    %4 = vector.extract_strided_slice %3 {offsets = [0, 0], sizes = [256, 4], strides = [1, 1]} : vector<256x12xf32> to vector<256x4xf32>
    %c0_3 = arith.constant 0 : index
    %c0_4 = arith.constant 0 : index
    %5 = vector.load %arg3[%c0_3, %c0_4] : memref<256x4xf32, #tpu.memory_space<vmem>>, vector<256x4xf32>
    tpu.vector_store %arg3[%c0_3, %c0_4], %4 {strides = array<i32>} : memref<256x4xf32, #tpu.memory_space<vmem>>, vector<256x4xf32>,
    %6 = vector.extract_strided_slice %3 {offsets = [0, 4], sizes = [256, 8], strides = [1, 1]} : vector<256x12xf32> to vector<256x8xf32>
    %c0_5 = arith.constant 0 : index
    %c0_6 = arith.constant 0 : index
    %7 = vector.load %arg4[%c0_5, %c0_6] : memref<256x8xf32, #tpu.memory_space<vmem>>, vector<256x8xf32>
    tpu.vector_store %arg4[%c0_5, %c0_6], %6 {strides = array<i32>} : memref<256x8xf32, #tpu.memory_space<vmem>>, vector<256x8xf32>,
    %cst_7 = arith.constant dense<0.000000e+00> : vector<4xf32>
    %8 = vector.multi_reduction <add>, %4, %cst_7 [0] : vector<256x4xf32> to vector<4xf32>
    %9 = vector.shape_cast %8 : vector<4xf32> to vector<1x4xf32>
    %10 = vector.shape_cast %9 : vector<1x4xf32> to vector<1x1x4xf32>
    %c0_8 = arith.constant 0 : index
    %c0_9 = arith.constant 0 : index
    %c0_10 = arith.constant 0 : index
    %11 = vector.load %arg5[%c0_8, %c0_9, %c0_10] : memref<1x2x4xf32, #tpu.memory_space<vmem>>, vector<1x1x4xf32>
    tpu.vector_store %arg5[%c0_8, %c0_9, %c0_10], %10 {strides = array<i32>} : memref<1x2x4xf32, #tpu.memory_space<vmem>>, vector<1x1x4xf32>,
    %12 = arith.mulf %4, %4 : vector<256x4xf32>
    %cst_11 = arith.constant dense<0.000000e+00> : vector<4xf32>
    %13 = vector.multi_reduction <add>, %12, %cst_11 [0] : vector<256x4xf32> to vector<4xf32>
    %14 = vector.shape_cast %13 : vector<4xf32> to vector<1x4xf32>
    %15 = vector.shape_cast %14 : vector<1x4xf32> to vector<1x1x4xf32>
    %c0_12 = arith.constant 0 : index
    %c1 = arith.constant 1 : index
    %c0_13 = arith.constant 0 : index
    %16 = vector.load %arg5[%c0_12, %c1, %c0_13] : memref<1x2x4xf32, #tpu.memory_space<vmem>>, vector<1x1x4xf32>
    tpu.vector_store %arg5[%c0_12, %c1, %c0_13], %15 {strides = array<i32>} : memref<1x2x4xf32, #tpu.memory_space<vmem>>, vector<1x1x4xf32>,
    return
  }
  func.func @transform_0(%arg0: i32) -> (i32, i32) {
    %c0_i32 = arith.constant 0 : i32
    %c0_i32_0 = arith.constant 0 : i32
    return %arg0, %c0_i32 : i32, i32
  }
  func.func @transform_1(%arg0: i32) -> (i32, i32) {
    %c0_i32 = arith.constant 0 : i32
    %c0_i32_0 = arith.constant 0 : i32
    %c0_i32_1 = arith.constant 0 : i32
    return %c0_i32, %c0_i32_0 : i32, i32
  }
  func.func @transform_2(%arg0: i32) -> (i32, i32) {
    %c0_i32 = arith.constant 0 : i32
    %c0_i32_0 = arith.constant 0 : i32
    return %arg0, %c0_i32 : i32, i32
  }
  func.func @transform_3(%arg0: i32) -> (i32, i32) {
    %c0_i32 = arith.constant 0 : i32
    %c0_i32_0 = arith.constant 0 : i32
    return %arg0, %c0_i32 : i32, i32
  }
  func.func @transform_4(%arg0: i32) -> (i32, i32, i32) {
    %c0_i32 = arith.constant 0 : i32
    %c0_i32_0 = arith.constant 0 : i32
    %c0_i32_1 = arith.constant 0 : i32
    return %arg0, %c0_i32, %c0_i32_0 : i32, i32, i32
  }
}

module attributes {stable_mosaic.version = 11 : i64} {
  func.func @conv3_kernel(%arg0: i32, %arg1: memref<256x4xf32, #tpu.memory_space<vmem>>, %arg2: memref<256x8xf32, #tpu.memory_space<vmem>>, %arg3: memref<4x8xbf16, #tpu.memory_space<vmem>>, %arg4: memref<1x4xf32, #tpu.memory_space<vmem>>, %arg5: memref<1x4xf32, #tpu.memory_space<vmem>>, %arg6: memref<256x8xf32, #tpu.memory_space<vmem>>, %arg7: memref<1x2x8xf32, #tpu.memory_space<vmem>>) attributes {dimension_semantics = [#tpu.dimension_semantics<parallel>], iteration_bounds = array<i64: 2>, scalar_prefetch = 0 : i64, scratch_operands = 0 : i64, tpu.core_type = #tpu.core_type<tc>, window_params = [{transform_indices = @transform_0, window_bounds = array<i64: 256, 4>}, {transform_indices = @transform_1, window_bounds = array<i64: 256, 8>}, {pipeline_mode = #tpu.pipeline_mode<synchronous>, transform_indices = @transform_2, window_bounds = array<i64: 4, 8>}, {pipeline_mode = #tpu.pipeline_mode<synchronous>, transform_indices = @transform_3, window_bounds = array<i64: 1, 4>}, {pipeline_mode = #tpu.pipeline_mode<synchronous>, transform_indices = @transform_4, window_bounds = array<i64: 1, 4>}, {transform_indices = @transform_5, window_bounds = array<i64: 256, 8>}, {transform_indices = @transform_6, window_bounds = array<i64: 1, 2, 8>}]} {
    %c0 = arith.constant 0 : index
    %c0_0 = arith.constant 0 : index
    %0 = vector.load %arg1[%c0, %c0_0] : memref<256x4xf32, #tpu.memory_space<vmem>>, vector<256x4xf32>
    %c0_1 = arith.constant 0 : index
    %c0_2 = arith.constant 0 : index
    %1 = vector.load %arg4[%c0_1, %c0_2] : memref<1x4xf32, #tpu.memory_space<vmem>>, vector<1x4xf32>
    %2 = vector.broadcast %1 : vector<1x4xf32> to vector<256x4xf32>
    %3 = arith.mulf %0, %2 : vector<256x4xf32>
    %c0_3 = arith.constant 0 : index
    %c0_4 = arith.constant 0 : index
    %4 = vector.load %arg5[%c0_3, %c0_4] : memref<1x4xf32, #tpu.memory_space<vmem>>, vector<1x4xf32>
    %5 = vector.broadcast %4 : vector<1x4xf32> to vector<256x4xf32>
    %6 = arith.addf %3, %5 : vector<256x4xf32>
    %cst = arith.constant 0.000000e+00 : f32
    %7 = vector.broadcast %cst : f32 to vector<256x4xf32>
    %8 = arith.maximumf %6, %7 : vector<256x4xf32>
    %9 = arith.truncf %8 : vector<256x4xf32> to vector<256x4xbf16>
    %c0_5 = arith.constant 0 : index
    %c0_6 = arith.constant 0 : index
    %10 = vector.load %arg3[%c0_5, %c0_6] : memref<4x8xbf16, #tpu.memory_space<vmem>>, vector<4x8xbf16>
    %cst_7 = arith.constant dense<0.000000e+00> : vector<256x8xf32>
    %11 = tpu.matmul %9, %10, %cst_7 {dimension_numbers = #tpu.dot_dimension_numbers<[1], [0], [0], [1], [0, 0, 1, 1], [], []>} : vector<256x4xbf16>, vector<4x8xbf16>, vector<256x8xf32> -> vector<256x8xf32>
    %c0_8 = arith.constant 0 : index
    %c0_9 = arith.constant 0 : index
    %12 = vector.load %arg2[%c0_8, %c0_9] : memref<256x8xf32, #tpu.memory_space<vmem>>, vector<256x8xf32>
    %13 = arith.addf %11, %12 : vector<256x8xf32>
    %c0_10 = arith.constant 0 : index
    %c0_11 = arith.constant 0 : index
    %14 = vector.load %arg6[%c0_10, %c0_11] : memref<256x8xf32, #tpu.memory_space<vmem>>, vector<256x8xf32>
    tpu.vector_store %arg6[%c0_10, %c0_11], %13 {strides = array<i32>} : memref<256x8xf32, #tpu.memory_space<vmem>>, vector<256x8xf32>,
    %cst_12 = arith.constant dense<0.000000e+00> : vector<8xf32>
    %15 = vector.multi_reduction <add>, %13, %cst_12 [0] : vector<256x8xf32> to vector<8xf32>
    %16 = vector.shape_cast %15 : vector<8xf32> to vector<1x8xf32>
    %17 = vector.shape_cast %16 : vector<1x8xf32> to vector<1x1x8xf32>
    %c0_13 = arith.constant 0 : index
    %c0_14 = arith.constant 0 : index
    %c0_15 = arith.constant 0 : index
    %18 = vector.load %arg7[%c0_13, %c0_14, %c0_15] : memref<1x2x8xf32, #tpu.memory_space<vmem>>, vector<1x1x8xf32>
    tpu.vector_store %arg7[%c0_13, %c0_14, %c0_15], %17 {strides = array<i32>} : memref<1x2x8xf32, #tpu.memory_space<vmem>>, vector<1x1x8xf32>,
    %19 = arith.mulf %13, %13 : vector<256x8xf32>
    %cst_16 = arith.constant dense<0.000000e+00> : vector<8xf32>
    %20 = vector.multi_reduction <add>, %19, %cst_16 [0] : vector<256x8xf32> to vector<8xf32>
    %21 = vector.shape_cast %20 : vector<8xf32> to vector<1x8xf32>
    %22 = vector.shape_cast %21 : vector<1x8xf32> to vector<1x1x8xf32>
    %c0_17 = arith.constant 0 : index
    %c1 = arith.constant 1 : index
    %c0_18 = arith.constant 0 : index
    %23 = vector.load %arg7[%c0_17, %c1, %c0_18] : memref<1x2x8xf32, #tpu.memory_space<vmem>>, vector<1x1x8xf32>
    tpu.vector_store %arg7[%c0_17, %c1, %c0_18], %22 {strides = array<i32>} : memref<1x2x8xf32, #tpu.memory_space<vmem>>, vector<1x1x8xf32>,
    return
  }
  func.func @transform_0(%arg0: i32) -> (i32, i32) {
    %c0_i32 = arith.constant 0 : i32
    %c0_i32_0 = arith.constant 0 : i32
    return %arg0, %c0_i32 : i32, i32
  }
  func.func @transform_1(%arg0: i32) -> (i32, i32) {
    %c0_i32 = arith.constant 0 : i32
    %c0_i32_0 = arith.constant 0 : i32
    return %arg0, %c0_i32 : i32, i32
  }
  func.func @transform_2(%arg0: i32) -> (i32, i32) {
    %c0_i32 = arith.constant 0 : i32
    %c0_i32_0 = arith.constant 0 : i32
    %c0_i32_1 = arith.constant 0 : i32
    return %c0_i32, %c0_i32_0 : i32, i32
  }
  func.func @transform_3(%arg0: i32) -> (i32, i32) {
    %c0_i32 = arith.constant 0 : i32
    %c0_i32_0 = arith.constant 0 : i32
    %c0_i32_1 = arith.constant 0 : i32
    return %c0_i32, %c0_i32_0 : i32, i32
  }
  func.func @transform_4(%arg0: i32) -> (i32, i32) {
    %c0_i32 = arith.constant 0 : i32
    %c0_i32_0 = arith.constant 0 : i32
    %c0_i32_1 = arith.constant 0 : i32
    return %c0_i32, %c0_i32_0 : i32, i32
  }
  func.func @transform_5(%arg0: i32) -> (i32, i32) {
    %c0_i32 = arith.constant 0 : i32
    %c0_i32_0 = arith.constant 0 : i32
    return %arg0, %c0_i32 : i32, i32
  }
  func.func @transform_6(%arg0: i32) -> (i32, i32, i32) {
    %c0_i32 = arith.constant 0 : i32
    %c0_i32_0 = arith.constant 0 : i32
    %c0_i32_1 = arith.constant 0 : i32
    return %arg0, %c0_i32, %c0_i32_0 : i32, i32, i32
  }
}

module attributes {stable_mosaic.version = 11 : i64} {
  func.func @conv2_kernel(%arg0: i32, %arg1: memref<1x256x4xf32, #tpu.memory_space<vmem>>, %arg2: memref<9x4x4xbf16, #tpu.memory_space<vmem>>, %arg3: memref<9x256x1xf32, #tpu.memory_space<vmem>>, %arg4: memref<1x4xf32, #tpu.memory_space<vmem>>, %arg5: memref<1x4xf32, #tpu.memory_space<vmem>>, %arg6: memref<1x256x4xf32, #tpu.memory_space<vmem>>, %arg7: memref<1x2x4xf32, #tpu.memory_space<vmem>>) attributes {dimension_semantics = [#tpu.dimension_semantics<parallel>], iteration_bounds = array<i64: 2>, scalar_prefetch = 0 : i64, scratch_operands = 0 : i64, tpu.core_type = #tpu.core_type<tc>, window_params = [{transform_indices = @transform_0, window_bounds = array<i64: 1, 256, 4>}, {pipeline_mode = #tpu.pipeline_mode<synchronous>, transform_indices = @transform_1, window_bounds = array<i64: 9, 4, 4>}, {pipeline_mode = #tpu.pipeline_mode<synchronous>, transform_indices = @transform_2, window_bounds = array<i64: 9, 256, 1>}, {pipeline_mode = #tpu.pipeline_mode<synchronous>, transform_indices = @transform_3, window_bounds = array<i64: 1, 4>}, {pipeline_mode = #tpu.pipeline_mode<synchronous>, transform_indices = @transform_4, window_bounds = array<i64: 1, 4>}, {transform_indices = @transform_5, window_bounds = array<i64: 1, 256, 4>}, {transform_indices = @transform_6, window_bounds = array<i64: 1, 2, 4>}]} {
    %c0 = arith.constant 0 : index
    %c0_0 = arith.constant 0 : index
    %c0_1 = arith.constant 0 : index
    %0 = vector.load %arg1[%c0, %c0_0, %c0_1] : memref<1x256x4xf32, #tpu.memory_space<vmem>>, vector<1x256x4xf32>
    %1 = vector.shape_cast %0 : vector<1x256x4xf32> to vector<256x4xf32>
    %c0_2 = arith.constant 0 : index
    %c0_3 = arith.constant 0 : index
    %2 = vector.load %arg4[%c0_2, %c0_3] : memref<1x4xf32, #tpu.memory_space<vmem>>, vector<1x4xf32>
    %3 = vector.broadcast %2 : vector<1x4xf32> to vector<256x4xf32>
    %4 = arith.mulf %1, %3 : vector<256x4xf32>
    %c0_4 = arith.constant 0 : index
    %c0_5 = arith.constant 0 : index
    %5 = vector.load %arg5[%c0_4, %c0_5] : memref<1x4xf32, #tpu.memory_space<vmem>>, vector<1x4xf32>
    %6 = vector.broadcast %5 : vector<1x4xf32> to vector<256x4xf32>
    %7 = arith.addf %4, %6 : vector<256x4xf32>
    %cst = arith.constant 0.000000e+00 : f32
    %8 = vector.broadcast %cst : f32 to vector<256x4xf32>
    %9 = arith.maximumf %7, %8 : vector<256x4xf32>
    %c0_6 = arith.constant 0 : index
    %c0_7 = arith.constant 0 : index
    %c0_8 = arith.constant 0 : index
    %10 = vector.load %arg2[%c0_6, %c0_7, %c0_8] : memref<9x4x4xbf16, #tpu.memory_space<vmem>>, vector<9x4x4xbf16>
    %c0_9 = arith.constant 0 : index
    %c0_10 = arith.constant 0 : index
    %c0_11 = arith.constant 0 : index
    %11 = vector.load %arg3[%c0_9, %c0_10, %c0_11] : memref<9x256x1xf32, #tpu.memory_space<vmem>>, vector<9x256x1xf32>
    %cst_12 = arith.constant 0.000000e+00 : f32
    %12 = vector.broadcast %cst_12 : f32 to vector<256x4xf32>
    %c17_i32 = arith.constant 17 : i32
    %13 = tpu.dynamic_rotate %9 by %c17_i32 dim 0 : vector<256x4xf32>, i32 -> vector<256x4xf32>
    %14 = vector.extract_strided_slice %11 {offsets = [0, 0, 0], sizes = [1, 256, 1], strides = [1, 1, 1]} : vector<9x256x1xf32> to vector<1x256x1xf32>
    %15 = vector.shape_cast %14 : vector<1x256x1xf32> to vector<256x1xf32>
    %16 = vector.broadcast %15 : vector<256x1xf32> to vector<256x4xf32>
    %17 = arith.mulf %13, %16 : vector<256x4xf32>
    %18 = arith.truncf %17 : vector<256x4xf32> to vector<256x4xbf16>
    %19 = vector.extract_strided_slice %10 {offsets = [0, 0, 0], sizes = [1, 4, 4], strides = [1, 1, 1]} : vector<9x4x4xbf16> to vector<1x4x4xbf16>
    %20 = vector.shape_cast %19 : vector<1x4x4xbf16> to vector<4x4xbf16>
    %cst_13 = arith.constant dense<0.000000e+00> : vector<256x4xf32>
    %21 = tpu.matmul %18, %20, %cst_13 {dimension_numbers = #tpu.dot_dimension_numbers<[1], [0], [0], [1], [0, 0, 1, 1], [], []>} : vector<256x4xbf16>, vector<4x4xbf16>, vector<256x4xf32> -> vector<256x4xf32>
    %22 = arith.addf %12, %21 : vector<256x4xf32>
    %c16_i32 = arith.constant 16 : i32
    %23 = tpu.dynamic_rotate %9 by %c16_i32 dim 0 : vector<256x4xf32>, i32 -> vector<256x4xf32>
    %24 = vector.extract_strided_slice %11 {offsets = [1, 0, 0], sizes = [1, 256, 1], strides = [1, 1, 1]} : vector<9x256x1xf32> to vector<1x256x1xf32>
    %25 = vector.shape_cast %24 : vector<1x256x1xf32> to vector<256x1xf32>
    %26 = vector.broadcast %25 : vector<256x1xf32> to vector<256x4xf32>
    %27 = arith.mulf %23, %26 : vector<256x4xf32>
    %28 = arith.truncf %27 : vector<256x4xf32> to vector<256x4xbf16>
    %29 = vector.extract_strided_slice %10 {offsets = [1, 0, 0], sizes = [1, 4, 4], strides = [1, 1, 1]} : vector<9x4x4xbf16> to vector<1x4x4xbf16>
    %30 = vector.shape_cast %29 : vector<1x4x4xbf16> to vector<4x4xbf16>
    %cst_14 = arith.constant dense<0.000000e+00> : vector<256x4xf32>
    %31 = tpu.matmul %28, %30, %cst_14 {dimension_numbers = #tpu.dot_dimension_numbers<[1], [0], [0], [1], [0, 0, 1, 1], [], []>} : vector<256x4xbf16>, vector<4x4xbf16>, vector<256x4xf32> -> vector<256x4xf32>
    %32 = arith.addf %22, %31 : vector<256x4xf32>
    %c15_i32 = arith.constant 15 : i32
    %33 = tpu.dynamic_rotate %9 by %c15_i32 dim 0 : vector<256x4xf32>, i32 -> vector<256x4xf32>
    %34 = vector.extract_strided_slice %11 {offsets = [2, 0, 0], sizes = [1, 256, 1], strides = [1, 1, 1]} : vector<9x256x1xf32> to vector<1x256x1xf32>
    %35 = vector.shape_cast %34 : vector<1x256x1xf32> to vector<256x1xf32>
    %36 = vector.broadcast %35 : vector<256x1xf32> to vector<256x4xf32>
    %37 = arith.mulf %33, %36 : vector<256x4xf32>
    %38 = arith.truncf %37 : vector<256x4xf32> to vector<256x4xbf16>
    %39 = vector.extract_strided_slice %10 {offsets = [2, 0, 0], sizes = [1, 4, 4], strides = [1, 1, 1]} : vector<9x4x4xbf16> to vector<1x4x4xbf16>
    %40 = vector.shape_cast %39 : vector<1x4x4xbf16> to vector<4x4xbf16>
    %cst_15 = arith.constant dense<0.000000e+00> : vector<256x4xf32>
    %41 = tpu.matmul %38, %40, %cst_15 {dimension_numbers = #tpu.dot_dimension_numbers<[1], [0], [0], [1], [0, 0, 1, 1], [], []>} : vector<256x4xbf16>, vector<4x4xbf16>, vector<256x4xf32> -> vector<256x4xf32>
    %42 = arith.addf %32, %41 : vector<256x4xf32>
    %c1_i32 = arith.constant 1 : i32
    %43 = tpu.dynamic_rotate %9 by %c1_i32 dim 0 : vector<256x4xf32>, i32 -> vector<256x4xf32>
    %44 = vector.extract_strided_slice %11 {offsets = [3, 0, 0], sizes = [1, 256, 1], strides = [1, 1, 1]} : vector<9x256x1xf32> to vector<1x256x1xf32>
    %45 = vector.shape_cast %44 : vector<1x256x1xf32> to vector<256x1xf32>
    %46 = vector.broadcast %45 : vector<256x1xf32> to vector<256x4xf32>
    %47 = arith.mulf %43, %46 : vector<256x4xf32>
    %48 = arith.truncf %47 : vector<256x4xf32> to vector<256x4xbf16>
    %49 = vector.extract_strided_slice %10 {offsets = [3, 0, 0], sizes = [1, 4, 4], strides = [1, 1, 1]} : vector<9x4x4xbf16> to vector<1x4x4xbf16>
    %50 = vector.shape_cast %49 : vector<1x4x4xbf16> to vector<4x4xbf16>
    %cst_16 = arith.constant dense<0.000000e+00> : vector<256x4xf32>
    %51 = tpu.matmul %48, %50, %cst_16 {dimension_numbers = #tpu.dot_dimension_numbers<[1], [0], [0], [1], [0, 0, 1, 1], [], []>} : vector<256x4xbf16>, vector<4x4xbf16>, vector<256x4xf32> -> vector<256x4xf32>
    %52 = arith.addf %42, %51 : vector<256x4xf32>
    %53 = arith.truncf %9 : vector<256x4xf32> to vector<256x4xbf16>
    %54 = vector.extract_strided_slice %10 {offsets = [4, 0, 0], sizes = [1, 4, 4], strides = [1, 1, 1]} : vector<9x4x4xbf16> to vector<1x4x4xbf16>
    %55 = vector.shape_cast %54 : vector<1x4x4xbf16> to vector<4x4xbf16>
    %cst_17 = arith.constant dense<0.000000e+00> : vector<256x4xf32>
    %56 = tpu.matmul %53, %55, %cst_17 {dimension_numbers = #tpu.dot_dimension_numbers<[1], [0], [0], [1], [0, 0, 1, 1], [], []>} : vector<256x4xbf16>, vector<4x4xbf16>, vector<256x4xf32> -> vector<256x4xf32>
    %57 = arith.addf %52, %56 : vector<256x4xf32>
    %c255_i32 = arith.constant 255 : i32
    %58 = tpu.dynamic_rotate %9 by %c255_i32 dim 0 : vector<256x4xf32>, i32 -> vector<256x4xf32>
    %59 = vector.extract_strided_slice %11 {offsets = [5, 0, 0], sizes = [1, 256, 1], strides = [1, 1, 1]} : vector<9x256x1xf32> to vector<1x256x1xf32>
    %60 = vector.shape_cast %59 : vector<1x256x1xf32> to vector<256x1xf32>
    %61 = vector.broadcast %60 : vector<256x1xf32> to vector<256x4xf32>
    %62 = arith.mulf %58, %61 : vector<256x4xf32>
    %63 = arith.truncf %62 : vector<256x4xf32> to vector<256x4xbf16>
    %64 = vector.extract_strided_slice %10 {offsets = [5, 0, 0], sizes = [1, 4, 4], strides = [1, 1, 1]} : vector<9x4x4xbf16> to vector<1x4x4xbf16>
    %65 = vector.shape_cast %64 : vector<1x4x4xbf16> to vector<4x4xbf16>
    %cst_18 = arith.constant dense<0.000000e+00> : vector<256x4xf32>
    %66 = tpu.matmul %63, %65, %cst_18 {dimension_numbers = #tpu.dot_dimension_numbers<[1], [0], [0], [1], [0, 0, 1, 1], [], []>} : vector<256x4xbf16>, vector<4x4xbf16>, vector<256x4xf32> -> vector<256x4xf32>
    %67 = arith.addf %57, %66 : vector<256x4xf32>
    %c241_i32 = arith.constant 241 : i32
    %68 = tpu.dynamic_rotate %9 by %c241_i32 dim 0 : vector<256x4xf32>, i32 -> vector<256x4xf32>
    %69 = vector.extract_strided_slice %11 {offsets = [6, 0, 0], sizes = [1, 256, 1], strides = [1, 1, 1]} : vector<9x256x1xf32> to vector<1x256x1xf32>
    %70 = vector.shape_cast %69 : vector<1x256x1xf32> to vector<256x1xf32>
    %71 = vector.broadcast %70 : vector<256x1xf32> to vector<256x4xf32>
    %72 = arith.mulf %68, %71 : vector<256x4xf32>
    %73 = arith.truncf %72 : vector<256x4xf32> to vector<256x4xbf16>
    %74 = vector.extract_strided_slice %10 {offsets = [6, 0, 0], sizes = [1, 4, 4], strides = [1, 1, 1]} : vector<9x4x4xbf16> to vector<1x4x4xbf16>
    %75 = vector.shape_cast %74 : vector<1x4x4xbf16> to vector<4x4xbf16>
    %cst_19 = arith.constant dense<0.000000e+00> : vector<256x4xf32>
    %76 = tpu.matmul %73, %75, %cst_19 {dimension_numbers = #tpu.dot_dimension_numbers<[1], [0], [0], [1], [0, 0, 1, 1], [], []>} : vector<256x4xbf16>, vector<4x4xbf16>, vector<256x4xf32> -> vector<256x4xf32>
    %77 = arith.addf %67, %76 : vector<256x4xf32>
    %c240_i32 = arith.constant 240 : i32
    %78 = tpu.dynamic_rotate %9 by %c240_i32 dim 0 : vector<256x4xf32>, i32 -> vector<256x4xf32>
    %79 = vector.extract_strided_slice %11 {offsets = [7, 0, 0], sizes = [1, 256, 1], strides = [1, 1, 1]} : vector<9x256x1xf32> to vector<1x256x1xf32>
    %80 = vector.shape_cast %79 : vector<1x256x1xf32> to vector<256x1xf32>
    %81 = vector.broadcast %80 : vector<256x1xf32> to vector<256x4xf32>
    %82 = arith.mulf %78, %81 : vector<256x4xf32>
    %83 = arith.truncf %82 : vector<256x4xf32> to vector<256x4xbf16>
    %84 = vector.extract_strided_slice %10 {offsets = [7, 0, 0], sizes = [1, 4, 4], strides = [1, 1, 1]} : vector<9x4x4xbf16> to vector<1x4x4xbf16>
    %85 = vector.shape_cast %84 : vector<1x4x4xbf16> to vector<4x4xbf16>
    %cst_20 = arith.constant dense<0.000000e+00> : vector<256x4xf32>
    %86 = tpu.matmul %83, %85, %cst_20 {dimension_numbers = #tpu.dot_dimension_numbers<[1], [0], [0], [1], [0, 0, 1, 1], [], []>} : vector<256x4xbf16>, vector<4x4xbf16>, vector<256x4xf32> -> vector<256x4xf32>
    %87 = arith.addf %77, %86 : vector<256x4xf32>
    %c239_i32 = arith.constant 239 : i32
    %88 = tpu.dynamic_rotate %9 by %c239_i32 dim 0 : vector<256x4xf32>, i32 -> vector<256x4xf32>
    %89 = vector.extract_strided_slice %11 {offsets = [8, 0, 0], sizes = [1, 256, 1], strides = [1, 1, 1]} : vector<9x256x1xf32> to vector<1x256x1xf32>
    %90 = vector.shape_cast %89 : vector<1x256x1xf32> to vector<256x1xf32>
    %91 = vector.broadcast %90 : vector<256x1xf32> to vector<256x4xf32>
    %92 = arith.mulf %88, %91 : vector<256x4xf32>
    %93 = arith.truncf %92 : vector<256x4xf32> to vector<256x4xbf16>
    %94 = vector.extract_strided_slice %10 {offsets = [8, 0, 0], sizes = [1, 4, 4], strides = [1, 1, 1]} : vector<9x4x4xbf16> to vector<1x4x4xbf16>
    %95 = vector.shape_cast %94 : vector<1x4x4xbf16> to vector<4x4xbf16>
    %cst_21 = arith.constant dense<0.000000e+00> : vector<256x4xf32>
    %96 = tpu.matmul %93, %95, %cst_21 {dimension_numbers = #tpu.dot_dimension_numbers<[1], [0], [0], [1], [0, 0, 1, 1], [], []>} : vector<256x4xbf16>, vector<4x4xbf16>, vector<256x4xf32> -> vector<256x4xf32>
    %97 = arith.addf %87, %96 : vector<256x4xf32>
    %98 = vector.shape_cast %97 : vector<256x4xf32> to vector<1x256x4xf32>
    %c0_22 = arith.constant 0 : index
    %c0_23 = arith.constant 0 : index
    %c0_24 = arith.constant 0 : index
    %99 = vector.load %arg6[%c0_22, %c0_23, %c0_24] : memref<1x256x4xf32, #tpu.memory_space<vmem>>, vector<1x256x4xf32>
    tpu.vector_store %arg6[%c0_22, %c0_23, %c0_24], %98 {strides = array<i32>} : memref<1x256x4xf32, #tpu.memory_space<vmem>>, vector<1x256x4xf32>,
    %cst_25 = arith.constant dense<0.000000e+00> : vector<4xf32>
    %100 = vector.multi_reduction <add>, %97, %cst_25 [0] : vector<256x4xf32> to vector<4xf32>
    %101 = vector.shape_cast %100 : vector<4xf32> to vector<1x4xf32>
    %102 = vector.shape_cast %101 : vector<1x4xf32> to vector<1x1x4xf32>
    %c0_26 = arith.constant 0 : index
    %c0_27 = arith.constant 0 : index
    %c0_28 = arith.constant 0 : index
    %103 = vector.load %arg7[%c0_26, %c0_27, %c0_28] : memref<1x2x4xf32, #tpu.memory_space<vmem>>, vector<1x1x4xf32>
    tpu.vector_store %arg7[%c0_26, %c0_27, %c0_28], %102 {strides = array<i32>} : memref<1x2x4xf32, #tpu.memory_space<vmem>>, vector<1x1x4xf32>,
    %104 = arith.mulf %97, %97 : vector<256x4xf32>
    %cst_29 = arith.constant dense<0.000000e+00> : vector<4xf32>
    %105 = vector.multi_reduction <add>, %104, %cst_29 [0] : vector<256x4xf32> to vector<4xf32>
    %106 = vector.shape_cast %105 : vector<4xf32> to vector<1x4xf32>
    %107 = vector.shape_cast %106 : vector<1x4xf32> to vector<1x1x4xf32>
    %c0_30 = arith.constant 0 : index
    %c1 = arith.constant 1 : index
    %c0_31 = arith.constant 0 : index
    %108 = vector.load %arg7[%c0_30, %c1, %c0_31] : memref<1x2x4xf32, #tpu.memory_space<vmem>>, vector<1x1x4xf32>
    tpu.vector_store %arg7[%c0_30, %c1, %c0_31], %107 {strides = array<i32>} : memref<1x2x4xf32, #tpu.memory_space<vmem>>, vector<1x1x4xf32>,
    return
  }
  func.func @transform_0(%arg0: i32) -> (i32, i32, i32) {
    %c0_i32 = arith.constant 0 : i32
    %c0_i32_0 = arith.constant 0 : i32
    %c0_i32_1 = arith.constant 0 : i32
    return %arg0, %c0_i32, %c0_i32_0 : i32, i32, i32
  }
  func.func @transform_1(%arg0: i32) -> (i32, i32, i32) {
    %c0_i32 = arith.constant 0 : i32
    %c0_i32_0 = arith.constant 0 : i32
    %c0_i32_1 = arith.constant 0 : i32
    %c0_i32_2 = arith.constant 0 : i32
    return %c0_i32, %c0_i32_0, %c0_i32_1 : i32, i32, i32
  }
  func.func @transform_2(%arg0: i32) -> (i32, i32, i32) {
    %c0_i32 = arith.constant 0 : i32
    %c0_i32_0 = arith.constant 0 : i32
    %c0_i32_1 = arith.constant 0 : i32
    %c0_i32_2 = arith.constant 0 : i32
    return %c0_i32, %c0_i32_0, %c0_i32_1 : i32, i32, i32
  }
  func.func @transform_3(%arg0: i32) -> (i32, i32) {
    %c0_i32 = arith.constant 0 : i32
    %c0_i32_0 = arith.constant 0 : i32
    %c0_i32_1 = arith.constant 0 : i32
    return %c0_i32, %c0_i32_0 : i32, i32
  }
  func.func @transform_4(%arg0: i32) -> (i32, i32) {
    %c0_i32 = arith.constant 0 : i32
    %c0_i32_0 = arith.constant 0 : i32
    %c0_i32_1 = arith.constant 0 : i32
    return %c0_i32, %c0_i32_0 : i32, i32
  }
  func.func @transform_5(%arg0: i32) -> (i32, i32, i32) {
    %c0_i32 = arith.constant 0 : i32
    %c0_i32_0 = arith.constant 0 : i32
    %c0_i32_1 = arith.constant 0 : i32
    return %arg0, %c0_i32, %c0_i32_0 : i32, i32, i32
  }
  func.func @transform_6(%arg0: i32) -> (i32, i32, i32) {
    %c0_i32 = arith.constant 0 : i32
    %c0_i32_0 = arith.constant 0 : i32
    %c0_i32_1 = arith.constant 0 : i32
    return %arg0, %c0_i32, %c0_i32_0 : i32, i32, i32
  }
}

module attributes {stable_mosaic.version = 11 : i64} {
  func.func @bn3_kernel(%arg0: i32, %arg1: memref<256x8xf32, #tpu.memory_space<vmem>>, %arg2: memref<1x8xf32, #tpu.memory_space<vmem>>, %arg3: memref<1x8xf32, #tpu.memory_space<vmem>>, %arg4: memref<256x8xf32, #tpu.memory_space<vmem>>) attributes {dimension_semantics = [#tpu.dimension_semantics<parallel>], iteration_bounds = array<i64: 2>, scalar_prefetch = 0 : i64, scratch_operands = 0 : i64, tpu.core_type = #tpu.core_type<tc>, window_params = [{transform_indices = @transform_0, window_bounds = array<i64: 256, 8>}, {pipeline_mode = #tpu.pipeline_mode<synchronous>, transform_indices = @transform_1, window_bounds = array<i64: 1, 8>}, {pipeline_mode = #tpu.pipeline_mode<synchronous>, transform_indices = @transform_2, window_bounds = array<i64: 1, 8>}, {transform_indices = @transform_3, window_bounds = array<i64: 256, 8>}]} {
    %c0 = arith.constant 0 : index
    %c0_0 = arith.constant 0 : index
    %0 = vector.load %arg1[%c0, %c0_0] : memref<256x8xf32, #tpu.memory_space<vmem>>, vector<256x8xf32>
    %c0_1 = arith.constant 0 : index
    %c0_2 = arith.constant 0 : index
    %1 = vector.load %arg2[%c0_1, %c0_2] : memref<1x8xf32, #tpu.memory_space<vmem>>, vector<1x8xf32>
    %2 = vector.broadcast %1 : vector<1x8xf32> to vector<256x8xf32>
    %3 = arith.mulf %0, %2 : vector<256x8xf32>
    %c0_3 = arith.constant 0 : index
    %c0_4 = arith.constant 0 : index
    %4 = vector.load %arg3[%c0_3, %c0_4] : memref<1x8xf32, #tpu.memory_space<vmem>>, vector<1x8xf32>
    %5 = vector.broadcast %4 : vector<1x8xf32> to vector<256x8xf32>
    %6 = arith.addf %3, %5 : vector<256x8xf32>
    %cst = arith.constant 0.000000e+00 : f32
    %7 = vector.broadcast %cst : f32 to vector<256x8xf32>
    %8 = arith.maximumf %6, %7 : vector<256x8xf32>
    %c0_5 = arith.constant 0 : index
    %c0_6 = arith.constant 0 : index
    %9 = vector.load %arg4[%c0_5, %c0_6] : memref<256x8xf32, #tpu.memory_space<vmem>>, vector<256x8xf32>
    tpu.vector_store %arg4[%c0_5, %c0_6], %8 {strides = array<i32>} : memref<256x8xf32, #tpu.memory_space<vmem>>, vector<256x8xf32>,
    return
  }
  func.func @transform_0(%arg0: i32) -> (i32, i32) {
    %c0_i32 = arith.constant 0 : i32
    %c0_i32_0 = arith.constant 0 : i32
    return %arg0, %c0_i32 : i32, i32
  }
  func.func @transform_1(%arg0: i32) -> (i32, i32) {
    %c0_i32 = arith.constant 0 : i32
    %c0_i32_0 = arith.constant 0 : i32
    %c0_i32_1 = arith.constant 0 : i32
    return %c0_i32, %c0_i32_0 : i32, i32
  }
  func.func @transform_2(%arg0: i32) -> (i32, i32) {
    %c0_i32 = arith.constant 0 : i32
    %c0_i32_0 = arith.constant 0 : i32
    %c0_i32_1 = arith.constant 0 : i32
    return %c0_i32, %c0_i32_0 : i32, i32
  }
  func.func @transform_3(%arg0: i32) -> (i32, i32) {
    %c0_i32 = arith.constant 0 : i32
    %c0_i32_0 = arith.constant 0 : i32
    return %arg0, %c0_i32 : i32, i32
  }
}

</mosaic_0001>

<bundles_post_ra>
// kernel: bottleneck_forward.4
= control target key start
LH: loop header
LB: loop body
LE: loop exit
PB: predicated region body
PF: predicated region fallthrough
CT: control target
= control target key end

     0   :  { %s1104_s15 = smov 0   ;;  %s1600_s0 = inlined_call_operand.vmem [shape: f32[512,4], index: 0, kind: input, shape index: {}]   ;;  %s1601_s1 = inlined_call_operand.vmem [shape: bf16[4,12], index: 1, kind: input, shape index: {}]   ;;  %s1602_s2 = inlined_call_operand.vmem [shape: f32[512,4], index: 2, kind: output, shape index: {0}]   ;;  %s1603_s3 = inlined_call_operand.vmem [shape: f32[512,8], index: 3, kind: output, shape index: {1}]   ;;  %s1604_s4 = inlined_call_operand.vmem [shape: f32[2,2,4], index: 4, kind: output, shape index: {2}]  }
   0x1 LB: > { %s1110_s16 = sadd.s32 4294967295, %s1076_s15   ;;  %p980_p0 = scmp.ge.s32.totalorder %s1076_s15, 1  ;;  %s1076_s15 = sphi %s1104_s15, %s15_s15  }
   0x2   : > { %p168_p1 = scmp.lt.s32.totalorder %s1076_s15, 3 }
   0x4   : > { %p169_p2 = pnand %p980_p0, %p168_p1 }
   0x5   : > { %v274_v0 = vld [vmem:[%s1601_s1] sm:$0x3] (!%p169_p2)  ;;  %vm324_vm0 = vcmask (!%p169_p2), 1041408   ;;  %s981_s19 = sshll.u32 (!%p169_p2), %s1110_s16, 5  ;;  %vm275_vm1 = vcmask (!%p169_p2), 31744   ;;  %s1078_s27 = smov (!%p169_p2), 124  }
   0x6   : > { %172 = sbr.rel (%p169_p2) target bundleno = 409 (0x199), region = 28  ;;  %1059 = vmatprep.subr.msk.bf16.mxu0 (!%p169_p2), %vm324_vm0, %v274_v0  ;;  %1060 = vmatprep.subr.msk.bf16.mxu1 (!%p169_p2), %vm324_vm0, %v274_v0  ;;  %v326_v1 = vsel (!%p169_p2), %vm324_vm0, %v274_v0, 0  ;;  %p204_p3 = scmp.lt.s32.totalorder (!%p169_p2), %s981_s19, 63  ;;  %vm751_vm2 = vcmask (!%p169_p2), 24576   ;;  %vm649_vm3 = vcmask (!%p169_p2), 64512  }
   0x7   : > { %1024 = vmatpush3.bf16.msra.mxu0 (!%p169_p2), %v326_v1  ;;  %1058 = vmatpush3.bf16.msra.mxu1 (!%p169_p2), %v326_v1  ;;  %p221_p4 = scmp.lt.s32.totalorder (!%p169_p2), %s1110_s16, 1 }
   0xd   : > { %s1606_s19 = smov (!%p204_p3, %s981_s19), 63  ;;  %s1608_s16 = smov (!%p221_p4, %s1110_s16), 1 }
   0xe   : > { %s1118_s20 = sshll.u32 %s1606_s19, 3  ;;  %s987_s28 = sshll.u32 %s1608_s16, 1 }
   0xf   : > { %s1124_s23 = scalar_lea.vmem %s1600_s0, %s1118_s20  ;;  %s1178_s26 = scalar_lea.vmem %s1602_s2, %s1118_s20 }
  0x10   : > { %v226_v2 = vld [vmem:[%s1124_s23] sm:$0xff]  ;;  %v227_v3 = vld [vmem:[%s1124_s23 + $0x8] sm:$0xff]  ;;  %v228_v7 = vld [vmem:[%s1124_s23 + $0x10] sm:$0xff]  ;;  %s224_s5 = scalar_lea.vmem %s1604_s4, %s987_s28  ;;  %s1531_s8 = scalar_lea.vmem %s1603_s3, %s1118_s20 }
  0x11   : > { %v242_v4 = vld [vmem:[%s1124_s23 + $0x80] sm:$0xff]  ;;  %v258_v5 = vpack.c.bf16 %v227_v3, %v226_v2  ;;  %v243_v6 = vld [vmem:[%s1124_s23 + $0x88] sm:$0xff]  ;;  %v229_v8 = vld [vmem:[%s1124_s23 + $0x18] sm:$0xff] }
  0x12   : > { %v266_v9 = vpack.c.bf16 %v243_v6, %v242_v4  ;;  %v259_v10 = vpack.c.bf16 %v229_v8, %v228_v7  ;;  %v244_v11 = vld [vmem:[%s1124_s23 + $0x90] sm:$0xff]  ;;  %v245_v12 = vld [vmem:[%s1124_s23 + $0x98] sm:$0xff]  ;;  %v230_v13 = vld [vmem:[%s1124_s23 + $0x20] sm:$0xff] }
  0x13   : > { %1025 = vmatprep.mubr.msk.bf16.mxu0 %vm275_vm1, %v258_v5  ;;  %v267_v14 = vpack.c.bf16 %v245_v12, %v244_v11  ;;  %v231_v15 = vld [vmem:[%s1124_s23 + $0x28] sm:$0xff]  ;;  %v246_v17 = vld [vmem:[%s1124_s23 + $0xa0] sm:$0xff]  ;;  %v232_v19 = vld [vmem:[%s1124_s23 + $0x30] sm:$0xff] }
  0x14   : > { %1041 = vmatprep.mubr.msk.bf16.mxu1 %vm275_vm1, %v266_v9  ;;  %1026 = vmatmul.mubr.msk.bf16.vlgmr.msra.gmra.mrb[0].mxu0 %vm275_vm1, %v259_v10  ;;  %v260_v16 = vpack.c.bf16 %v231_v15, %v230_v13  ;;  %v247_v18 = vld [vmem:[%s1124_s23 + $0xa8] sm:$0xff]  ;;  %v233_v20 = vld [vmem:[%s1124_s23 + $0x38] sm:$0xff]  ;;  %v234_v22 = vld [vmem:[%s1124_s23 + $0x40] sm:$0xff] }
  0x15   : > { %1042 = vmatmul.mubr.msk.bf16.vlgmr.msra.gmra.mrb[0].mxu1 %vm275_vm1, %v267_v14  ;;  %v268_v21 = vpack.c.bf16 %v247_v18, %v246_v17  ;;  %v235_v23 = vld [vmem:[%s1124_s23 + $0x48] sm:$0xff]  ;;  %v248_v24 = vld [vmem:[%s1124_s23 + $0xb0] sm:$0xff]  ;;  %v249_v25 = vld [vmem:[%s1124_s23 + $0xb8] sm:$0xff]  ;;  %v261_v26 = vpack.c.bf16 %v233_v20, %v232_v19 }
  0x16   : > { %1029 = vmatprep.mubr.msk.bf16.mxu0 %vm275_vm1, %v260_v16  ;;  %v250_v27 = vld [vmem:[%s1124_s23 + $0xc0] sm:$0xff]  ;;  %v251_v28 = vld [vmem:[%s1124_s23 + $0xc8] sm:$0xff]  ;;  %v262_v29 = vpack.c.bf16 %v235_v23, %v234_v22  ;;  %v269_v30 = vpack.c.bf16 %v249_v25, %v248_v24  ;;  %v236_v32 = vld [vmem:[%s1124_s23 + $0x50] sm:$0xff] }
  0x17   : > { %1045 = vmatprep.mubr.msk.bf16.mxu1 %vm275_vm1, %v268_v21  ;;  %v270_v31 = vpack.c.bf16 %v251_v28, %v250_v27  ;;  %v237_v33 = vld [vmem:[%s1124_s23 + $0x58] sm:$0xff]  ;;  %v238_v34 = vld [vmem:[%s1124_s23 + $0x60] sm:$0xff]  ;;  %v239_v35 = vld [vmem:[%s1124_s23 + $0x68] sm:$0xff] }
  0x18   : > { %v252_v36 = vld [vmem:[%s1124_s23 + $0xd0] sm:$0xff]  ;;  %v253_v37 = vld [vmem:[%s1124_s23 + $0xd8] sm:$0xff]  ;;  %v254_v38 = vld [vmem:[%s1124_s23 + $0xe0] sm:$0xff]  ;;  %v263_v40 = vpack.c.bf16 %v237_v33, %v236_v32  ;;  %v264_v41 = vpack.c.bf16 %v239_v35, %v238_v34 }
  0x19   : > { %v255_v39 = vld [vmem:[%s1124_s23 + $0xe8] sm:$0xff]  ;;  %v271_v42 = vpack.c.bf16 %v253_v37, %v252_v36  ;;  %v240_v44 = vld [vmem:[%s1124_s23 + $0x70] sm:$0xff]  ;;  %v241_v45 = vld [vmem:[%s1124_s23 + $0x78] sm:$0xff] }
  0x1a   : > { %v272_v43 = vpack.c.bf16 %v255_v39, %v254_v38  ;;  %v256_v46 = vld [vmem:[%s1124_s23 + $0xf0] sm:$0xff]  ;;  %v257_v47 = vld [vmem:[%s1124_s23 + $0xf8] sm:$0xff]  ;;  %v265_v48 = vpack.c.bf16 %v241_v45, %v240_v44 }
  0x1b   : > { %v273_v49 = vpack.c.bf16 %v257_v47, %v256_v46 }
  0x1c   : > { %1030 = vmatmul.mubr.msk.bf16.gmra.mrb[4].mxu0 %vm275_vm1, %v261_v26 }
  0x1d   : > { %1033 = vmatprep.mubr.msk.bf16.mxu0 %vm275_vm1, %v262_v29  ;;  %1046 = vmatmul.mubr.msk.bf16.gmra.mrb[4].mxu1 %vm275_vm1, %v269_v30 }
  0x1e   : > { %1049 = vmatprep.mubr.msk.bf16.mxu1 %vm275_vm1, %v270_v31 }
  0x24   : > { %1034 = vmatmul.mubr.msk.bf16.gmra.mrb[8].mxu0 %vm275_vm1, %v263_v40 }
  0x25   : > { %1037 = vmatprep.mubr.msk.bf16.mxu0 %vm275_vm1, %v264_v41  ;;  %1050 = vmatmul.mubr.msk.bf16.gmra.mrb[8].mxu1 %vm275_vm1, %v271_v42 }
  0x26   : > { %1053 = vmatprep.mubr.msk.bf16.mxu1 %vm275_vm1, %v272_v43 }
  0x2c   : > { %1038 = vmatmul.mubr.msk.bf16.gmra.mrb[12].mxu0 %vm275_vm1, %v265_v48 }
  0x2d   : > { %1054 = vmatmul.mubr.msk.bf16.gmra.mrb[12].mxu1 %vm275_vm1, %v273_v49 }
  0xe7   : > { %v1027_v50 = vpop.f32.mrb[0].mxu0 }
  0xe8   : > { %491 = vst.msk [vmem:[%s1178_s26 + $0x10] sm:$0xff] %vm275_vm1, %v1027_v50  ;;  %v1182_v51 = vpop.f32.mrb[0].mxu1  ;;  %557 = vrot.lane.b32.xlu1 %v1027_v50, %s1078_s27  ;;  %v362_v52 = vpop.f32.mrb[1].mxu0  ;;  %v755_v59 = vmul.f32 %v1027_v50, %v1027_v50  ;;  %v685_v0 = vsel %vm275_vm1, %v1027_v50, 0.0 }
  0xe9   : > { %507 = vst.msk [vmem:[%s1178_s26 + $0x90] sm:$0xff] %vm275_vm1, %v1182_v51  ;;  %589 = vrot.lane.b32.xlu0 %v1182_v51, %s1078_s27  ;;  %v1190_v53 = vpop.f32.mrb[1].mxu1  ;;  %489 = vst.msk [vmem:[%s1178_s26] sm:$0xff] %vm275_vm1, %v362_v52  ;;  %v1028_v54 = vpop.f32.mrb[2].mxu0  ;;  %v753_v55 = vmul.f32 %v362_v52, %v362_v52  ;;  %v682_v60 = vsel %vm275_vm1, %v362_v52, 0.0 }
  0xea   : > { %505 = vst.msk [vmem:[%s1178_s26 + $0x80] sm:$0xff] %vm275_vm1, %v1190_v53  ;;  %492 = vst.msk [vmem:[%s1178_s26 + $0x18] sm:$0xff] %vm275_vm1, %v1028_v54  ;;  %v1199_v56 = vpop.f32.mrb[2].mxu1  ;;  %v365_v57 = vpop.f32.mrb[3].mxu0  ;;  %v756_v2 = vmul.f32 %v1028_v54, %v1028_v54  ;;  %v788_v7 = vsel %vm275_vm1, %v755_v59, 0.0  ;;  %v687_v8 = vsel %vm275_vm1, %v1028_v54, 0.0 }
  0xeb   : > { %508 = vst.msk [vmem:[%s1178_s26 + $0x98] sm:$0xff] %vm275_vm1, %v1199_v56  ;;  %490 = vst.msk [vmem:[%s1178_s26 + $0x8] sm:$0xff] %vm275_vm1, %v365_v57  ;;  %v1206_v58 = vpop.f32.mrb[3].mxu1  ;;  %v683_v61 = vsel %vm275_vm1, %v365_v57, 0.0  ;;  %v754_v62 = vmul.f32 %v365_v57, %v365_v57  ;;  %v785_v1 = vsel %vm275_vm1, %v753_v55, 0.0 }
  0xec   : > { %506 = vst.msk [vmem:[%s1178_s26 + $0x88] sm:$0xff] %vm275_vm1, %v1206_v58  ;;  %559 = vrot.lane.b32.xlu1 %v1028_v54, %s1078_s27  ;;  %v684_v63 = vadd.f32 %v683_v61, %v682_v60  ;;  %v790_v17 = vsel %vm275_vm1, %v756_v2, 0.0 }
  0xed   : > { %553 = vrot.lane.b32.xlu0 %v362_v52, %s1078_s27  ;;  %v786_v3 = vsel %vm275_vm1, %v754_v62, 0.0 }
  0xee   : > { %v686_v4 = vadd.f32 %v685_v0, %v684_v63  ;;  %v787_v5 = vadd.f32 %v786_v3, %v785_v1 }
  0xef   : > { %v1031_v6 = vpop.f32.mrb[4].mxu0 }
  0xf0   : > { %495 = vst.msk [vmem:[%s1178_s26 + $0x30] sm:$0xff] %vm275_vm1, %v1031_v6  ;;  %591 = vrot.lane.b32.xlu1 %v1199_v56, %s1078_s27  ;;  %v1224_v9 = vpop.f32.mrb[5].mxu0  ;;  %v1226_v10 = vpop.f32.mrb[4].mxu1  ;;  %v789_v11 = vadd.f32 %v788_v7, %v787_v5  ;;  %v688_v12 = vadd.f32 %v687_v8, %v686_v4  ;;  %v759_v18 = vmul.f32 %v1031_v6, %v1031_v6  ;;  %v693_v26 = vsel %vm275_vm1, %v1031_v6, 0.0 }
  0xf1   : > { %585 = vrot.lane.b32.xlu0 %v1190_v53, %s1078_s27  ;;  %493 = vst.msk [vmem:[%s1178_s26 + $0x20] sm:$0xff] %vm275_vm1, %v1224_v9  ;;  %v689_v13 = vsel %vm275_vm1, %v1224_v9, 0.0  ;;  %v757_v14 = vmul.f32 %v1224_v9, %v1224_v9  ;;  %v1032_v15 = vpop.f32.mrb[6].mxu0  ;;  %511 = vst.msk [vmem:[%s1178_s26 + $0xb0] sm:$0xff] %vm275_vm1, %v1226_v10  ;;  %v1240_v16 = vpop.f32.mrb[5].mxu1 }
  0xf2   : > { %496 = vst.msk [vmem:[%s1178_s26 + $0x38] sm:$0xff] %vm275_vm1, %v1032_v15  ;;  %v1245_v19 = vpop.f32.mrb[7].mxu0  ;;  %509 = vst.msk [vmem:[%s1178_s26 + $0xa0] sm:$0xff] %vm275_vm1, %v1240_v16  ;;  %v1250_v20 = vpop.f32.mrb[6].mxu1  ;;  %v690_v21 = vadd.f32 %v689_v13, %v688_v12  ;;  %v791_v22 = vadd.f32 %v790_v17, %v789_v11  ;;  %v760_v27 = vmul.f32 %v1032_v15, %v1032_v15  ;;  %v796_v31 = vsel %vm275_vm1, %v759_v18, 0.0 }
  0xf3   : > { %v792_v23 = vsel %vm275_vm1, %v757_v14, 0.0  ;;  %494 = vst.msk [vmem:[%s1178_s26 + $0x28] sm:$0xff] %vm275_vm1, %v1245_v19  ;;  %v691_v24 = vsel %vm275_vm1, %v1245_v19, 0.0  ;;  %512 = vst.msk [vmem:[%s1178_s26 + $0xb8] sm:$0xff] %vm275_vm1, %v1250_v20  ;;  %v1261_v25 = vpop.f32.mrb[7].mxu1  ;;  %v758_v28 = vmul.f32 %v1245_v19, %v1245_v19  ;;  %v695_v32 = vsel %vm275_vm1, %v1032_v15, 0.0 }
  0xf4   : > { %587 = vrot.lane.b32.xlu1 %v1206_v58, %s1078_s27  ;;  %510 = vst.msk [vmem:[%s1178_s26 + $0xa8] sm:$0xff] %vm275_vm1, %v1261_v25  ;;  %v793_v29 = vadd.f32 %v792_v23, %v791_v22  ;;  %v692_v30 = vadd.f32 %v691_v24, %v690_v21  ;;  %v798_v37 = vsel %vm275_vm1, %v760_v27, 0.0 }
  0xf5   : > { %555 = vrot.lane.b32.xlu0 %v365_v57, %s1078_s27  ;;  %v794_v33 = vsel %vm275_vm1, %v758_v28, 0.0 }
  0xf6   : > { %v694_v34 = vadd.f32 %v693_v26, %v692_v30  ;;  %v795_v35 = vadd.f32 %v794_v33, %v793_v29 }
  0xf7   : > { %v1275_v36 = vpop.f32.mrb[8].mxu0 }
  0xf8   : > { %499 = vst.msk [vmem:[%s1178_s26 + $0x50] sm:$0xff] %vm275_vm1, %v1275_v36  ;;  %567 = vrot.lane.b32.xlu1 %v1032_v15, %s1078_s27  ;;  %v1282_v38 = vpop.f32.mrb[9].mxu0  ;;  %v1284_v39 = vpop.f32.mrb[8].mxu1  ;;  %v797_v40 = vadd.f32 %v796_v31, %v795_v35  ;;  %v696_v41 = vadd.f32 %v695_v32, %v694_v34  ;;  %v763_v46 = vmul.f32 %v1275_v36, %v1275_v36  ;;  %v701_v57 = vsel %vm275_vm1, %v1275_v36, 0.0 }
  0xf9   : > { %565 = vrot.lane.b32.xlu0 %v1031_v6, %s1078_s27  ;;  %497 = vst.msk [vmem:[%s1178_s26 + $0x40] sm:$0xff] %vm275_vm1, %v1282_v38  ;;  %v697_v42 = vsel %vm275_vm1, %v1282_v38, 0.0  ;;  %v761_v43 = vmul.f32 %v1282_v38, %v1282_v38  ;;  %v1294_v44 = vpop.f32.mrb[10].mxu0  ;;  %515 = vst.msk [vmem:[%s1178_s26 + $0xd0] sm:$0xff] %vm275_vm1, %v1284_v39  ;;  %v1299_v45 = vpop.f32.mrb[9].mxu1 }
  0xfa   : > { %500 = vst.msk [vmem:[%s1178_s26 + $0x58] sm:$0xff] %vm275_vm1, %v1294_v44  ;;  %v1306_v47 = vpop.f32.mrb[11].mxu0  ;;  %513 = vst.msk [vmem:[%s1178_s26 + $0xc0] sm:$0xff] %vm275_vm1, %v1299_v45  ;;  %v1311_v48 = vpop.f32.mrb[10].mxu1  ;;  %v698_v49 = vadd.f32 %v697_v42, %v696_v41  ;;  %v799_v50 = vadd.f32 %v798_v37, %v797_v40  ;;  %v764_v59 = vmul.f32 %v1294_v44, %v1294_v44  ;;  %v804_v63 = vsel %vm275_vm1, %v763_v46, 0.0 }
  0xfb   : > { %v800_v52 = vsel %vm275_vm1, %v761_v43, 0.0  ;;  %498 = vst.msk [vmem:[%s1178_s26 + $0x48] sm:$0xff] %vm275_vm1, %v1306_v47  ;;  %v699_v54 = vsel %vm275_vm1, %v1306_v47, 0.0  ;;  %516 = vst.msk [vmem:[%s1178_s26 + $0xd8] sm:$0xff] %vm275_vm1, %v1311_v48  ;;  %v1322_v55 = vpop.f32.mrb[11].mxu1  ;;  %v762_v60 = vmul.f32 %v1306_v47, %v1306_v47  ;;  %v703_v0 = vsel %vm275_vm1, %v1294_v44, 0.0 }
  0xfc   : > { %599 = vrot.lane.b32.xlu1 %v1250_v20, %s1078_s27  ;;  %514 = vst.msk [vmem:[%s1178_s26 + $0xc8] sm:$0xff] %vm275_vm1, %v1322_v55  ;;  %v801_v61 = vadd.f32 %v800_v52, %v799_v50  ;;  %v700_v62 = vadd.f32 %v699_v54, %v698_v49  ;;  %v806_v5 = vsel %vm275_vm1, %v764_v59, 0.0  ;;  %v769_v37 = vmul.f32 %v1190_v53, %v1190_v53 }
  0xfd   : > { %597 = vrot.lane.b32.xlu0 %v1226_v10, %s1078_s27  ;;  %v802_v1 = vsel %vm275_vm1, %v762_v60, 0.0  ;;  %v713_v42 = vsel %vm275_vm1, %v1190_v53, 0.0  ;;  %v770_v46 = vmul.f32 %v1206_v58, %v1206_v58  ;;  %v771_v52 = vmul.f32 %v1182_v51, %v1182_v51 }
  0xfe   : > { %v702_v2 = vadd.f32 %v701_v57, %v700_v62  ;;  %v803_v3 = vadd.f32 %v802_v1, %v801_v61  ;;  %v717_v53 = vsel %vm275_vm1, %v1182_v51, 0.0  ;;  %v719_v61 = vsel %vm275_vm1, %v1199_v56, 0.0 }
  0xff   : > { %v1341_v4 = vpop.f32.mrb[12].mxu0  ;;  %v818_v59 = vsel %vm275_vm1, %v770_v46, 0.0  ;;  %v721_v1 = vsel %vm275_vm1, %v1240_v16, 0.0 }
 0x100   : > { %503 = vst.msk [vmem:[%s1178_s26 + $0x70] sm:$0xff] %vm275_vm1, %v1341_v4  ;;  %563 = vrot.lane.b32.xlu1 %v1245_v19, %s1078_s27  ;;  %v1349_v6 = vpop.f32.mrb[13].mxu0  ;;  %v1351_v7 = vpop.f32.mrb[12].mxu1  ;;  %v805_v8 = vadd.f32 %v804_v63, %v803_v3  ;;  %v704_v14 = vadd.f32 %v703_v0, %v702_v2  ;;  %v709_v26 = vsel %vm275_vm1, %v1341_v4, 0.0  ;;  %v820_v63 = vsel %vm275_vm1, %v771_v52, 0.0 }
 0x101   : > { %561 = vrot.lane.b32.xlu0 %v1224_v9, %s1078_s27  ;;  %501 = vst.msk [vmem:[%s1178_s26 + $0x60] sm:$0xff] %vm275_vm1, %v1349_v6  ;;  %v705_v11 = vsel %vm275_vm1, %v1349_v6, 0.0  ;;  %v765_v12 = vmul.f32 %v1349_v6, %v1349_v6  ;;  %v1362_v13 = vpop.f32.mrb[14].mxu0  ;;  %519 = vst.msk [vmem:[%s1178_s26 + $0xf0] sm:$0xff] %vm275_vm1, %v1351_v7  ;;  %v1367_v15 = vpop.f32.mrb[13].mxu1  ;;  %v767_v9 = vmul.f32 %v1341_v4, %v1341_v4 }
 0x102   : > { %504 = vst.msk [vmem:[%s1178_s26 + $0x78] sm:$0xff] %vm275_vm1, %v1362_v13  ;;  %v1374_v17 = vpop.f32.mrb[15].mxu0  ;;  %517 = vst.msk [vmem:[%s1178_s26 + $0xe0] sm:$0xff] %vm275_vm1, %v1367_v15  ;;  %v1379_v18 = vpop.f32.mrb[14].mxu1  ;;  %v706_v21 = vadd.f32 %v705_v11, %v704_v14  ;;  %v807_v27 = vadd.f32 %v806_v5, %v805_v8  ;;  %v768_v28 = vmul.f32 %v1362_v13, %v1362_v13  ;;  %v711_v31 = vsel %vm275_vm1, %v1362_v13, 0.0 }
 0x103   : > { %v808_v19 = vsel %vm275_vm1, %v765_v12, 0.0  ;;  %502 = vst.msk [vmem:[%s1178_s26 + $0x68] sm:$0xff] %vm275_vm1, %v1374_v17  ;;  %v707_v22 = vsel %vm275_vm1, %v1374_v17, 0.0  ;;  %v766_v23 = vmul.f32 %v1374_v17, %v1374_v17  ;;  %520 = vst.msk [vmem:[%s1178_s26 + $0xf8] sm:$0xff] %vm275_vm1, %v1379_v18  ;;  %v1392_v24 = vpop.f32.mrb[15].mxu1  ;;  %v812_v33 = vsel %vm275_vm1, %v767_v9, 0.0 }
 0x104   : > { %595 = vrot.lane.b32.xlu1 %v1261_v25, %s1078_s27  ;;  %518 = vst.msk [vmem:[%s1178_s26 + $0xe8] sm:$0xff] %vm275_vm1, %v1392_v24  ;;  %v708_v29 = vadd.f32 %v707_v22, %v706_v21  ;;  %v809_v32 = vadd.f32 %v808_v19, %v807_v27  ;;  %v814_v40 = vsel %vm275_vm1, %v768_v28, 0.0  ;;  %v773_v0 = vmul.f32 %v1240_v16, %v1240_v16 }
 0x105   : > { %v810_v30 = vsel %vm275_vm1, %v766_v23, 0.0  ;;  %593 = vrot.lane.b32.xlu0 %v1240_v16, %s1078_s27  ;;  %v725_v12 = vsel %vm275_vm1, %v1226_v10, 0.0  ;;  %v727_v21 = vsel %vm275_vm1, %v1250_v20, 0.0  ;;  %v729_v27 = vsel %vm275_vm1, %v1299_v45, 0.0 }
 0x106   : > { %v710_v34 = vadd.f32 %v709_v26, %v708_v29  ;;  %v811_v35 = vadd.f32 %v810_v30, %v809_v32  ;;  %v824_v11 = vsel %vm275_vm1, %v773_v0, 0.0  ;;  %v778_v30 = vmul.f32 %v1322_v55, %v1322_v55 }
 0x107   : > { %v783_v52 = vmul.f32 %v1351_v7, %v1351_v7 }
 0x108   : > { %575 = vrot.lane.b32.xlu1 %v1294_v44, %s1078_s27  ;;  %v712_v41 = vadd.f32 %v711_v31, %v710_v34  ;;  %v813_v43 = vadd.f32 %v812_v33, %v811_v35  ;;  %v715_v44 = vsel %vm275_vm1, %v1206_v58, 0.0  ;;  %v772_v58 = vmul.f32 %v1199_v56, %v1199_v56 }
 0x109   : > { %573 = vrot.lane.b32.xlu0 %v1275_v36, %s1078_s27  ;;  %v816_v36 = vsel %vm275_vm1, %v769_v37, 0.0  ;;  %v774_v56 = vmul.f32 %v1261_v25, %v1261_v25  ;;  %v731_v31 = vsel %vm275_vm1, %v1322_v55, 0.0  ;;  %v733_v33 = vsel %vm275_vm1, %v1284_v39, 0.0 }
 0x10a   : > { %v714_v49 = vadd.f32 %v713_v42, %v712_v41  ;;  %v815_v50 = vadd.f32 %v814_v40, %v813_v43  ;;  %v822_v3 = vsel %vm275_vm1, %v772_v58, 0.0  ;;  %v780_v35 = vmul.f32 %v1311_v48, %v1311_v48 }
 0x10b   : > { %v826_v9 = vsel %vm275_vm1, %v774_v56, 0.0  ;;  %v834_v37 = vsel %vm275_vm1, %v778_v30, 0.0  ;;  %v737_v43 = vsel %vm275_vm1, %v1367_v15, 0.0 }
 0x10c   : > { %607 = vrot.lane.b32.xlu1 %v1311_v48, %s1078_s27  ;;  %v716_v54 = vadd.f32 %v715_v44, %v714_v49  ;;  %v817_v57 = vadd.f32 %v816_v36, %v815_v50  ;;  %v838_v46 = vsel %vm275_vm1, %v780_v35, 0.0  ;;  %v782_v49 = vmul.f32 %v1392_v24, %v1392_v24 }
 0x10d   : > { %605 = vrot.lane.b32.xlu0 %v1284_v39, %s1078_s27  ;;  %v739_v44 = vsel %vm275_vm1, %v1392_v24, 0.0 }
 0x10e   : > { %v718_v60 = vadd.f32 %v717_v53, %v716_v54  ;;  %v819_v62 = vadd.f32 %v818_v59, %v817_v57  ;;  %v741_v54 = vsel %vm275_vm1, %v1351_v7, 0.0  ;;  %v842_v58 = vsel %vm275_vm1, %v782_v49, 0.0 }
 0x10f   : > { %v743_v59 = vsel %vm275_vm1, %v1379_v18, 0.0 }
 0x110   : > { %571 = vrot.lane.b32.xlu1 %v1306_v47, %s1078_s27  ;;  %v720_v51 = vadd.f32 %v719_v61, %v718_v60  ;;  %v821_v2 = vadd.f32 %v820_v63, %v819_v62  ;;  %v723_v47 = vsel %vm275_vm1, %v1261_v25, 0.0  ;;  %v776_v25 = vmul.f32 %v1250_v20, %v1250_v20 }
 0x111   : > { %569 = vrot.lane.b32.xlu0 %v1282_v38, %s1078_s27  ;;  %v775_v38 = vmul.f32 %v1226_v10, %v1226_v10  ;;  %v777_v10 = vmul.f32 %v1299_v45, %v1299_v45  ;;  %v844_v61 = vsel %vm275_vm1, %v783_v52, 0.0 }
 0x112   : > { %v722_v5 = vadd.f32 %v721_v1, %v720_v51  ;;  %v823_v8 = vadd.f32 %v822_v3, %v821_v2  ;;  %v830_v29 = vsel %vm275_vm1, %v776_v25, 0.0 }
 0x113   : > { %v828_v23 = vsel %vm275_vm1, %v775_v38, 0.0  ;;  %v832_v32 = vsel %vm275_vm1, %v777_v10, 0.0 }
 0x114   : > { %603 = vrot.lane.b32.xlu1 %v1322_v55, %s1078_s27  ;;  %v724_v16 = vadd.f32 %v723_v47, %v722_v5  ;;  %v825_v14 = vadd.f32 %v824_v11, %v823_v8 }
 0x115   : > { %601 = vrot.lane.b32.xlu0 %v1299_v45, %s1078_s27 }
 0x116   : > { %v726_v19 = vadd.f32 %v725_v12, %v724_v16  ;;  %v827_v22 = vadd.f32 %v826_v9, %v825_v14 }
 0x118   : > { %583 = vrot.lane.b32.xlu1 %v1362_v13, %s1078_s27  ;;  %v728_v26 = vadd.f32 %v727_v21, %v726_v19  ;;  %v829_v28 = vadd.f32 %v828_v23, %v827_v22 }
 0x119   : > { %581 = vrot.lane.b32.xlu0 %v1341_v4, %s1078_s27  ;;  %v779_v4 = vmul.f32 %v1284_v39, %v1284_v39 }
 0x11a   : > { %v730_v20 = vadd.f32 %v729_v27, %v728_v26  ;;  %v831_v13 = vadd.f32 %v830_v29, %v829_v28 }
 0x11b   : > { %v836_v41 = vsel %vm275_vm1, %v779_v4, 0.0 }
 0x11c   : > { %579 = vrot.lane.b32.xlu1 %v1374_v17, %s1078_s27  ;;  %v732_v45 = vadd.f32 %v731_v31, %v730_v20  ;;  %v833_v34 = vadd.f32 %v832_v32, %v831_v13  ;;  %v735_v17 = vsel %vm275_vm1, %v1311_v48, 0.0 }
 0x11d   : > { %577 = vrot.lane.b32.xlu0 %v1349_v6, %s1078_s27  ;;  %v781_v6 = vmul.f32 %v1367_v15, %v1367_v15 }
 0x11e   : > { %v734_v55 = vadd.f32 %v733_v33, %v732_v45  ;;  %v835_v40 = vadd.f32 %v834_v37, %v833_v34 }
 0x11f   : > { %v840_v36 = vsel %vm275_vm1, %v781_v6, 0.0 }
 0x120   : > { %611 = vrot.lane.b32.xlu1 %v1392_v24, %s1078_s27  ;;  %v736_v39 = vadd.f32 %v735_v17, %v734_v55  ;;  %v837_v42 = vadd.f32 %v836_v41, %v835_v40  ;;  %v784_v24 = vmul.f32 %v1379_v18, %v1379_v18 }
 0x121   : > { %609 = vrot.lane.b32.xlu0 %v1367_v15, %s1078_s27 }
 0x122   : > { %v738_v48 = vadd.f32 %v737_v43, %v736_v39  ;;  %v839_v50 = vadd.f32 %v838_v46, %v837_v42  ;;  %v846_v0 = vsel %vm275_vm1, %v784_v24, 0.0 }
 0x124   : > { %615 = vrot.lane.b32.xlu1 %v1379_v18, %s1078_s27  ;;  %v740_v15 = vadd.f32 %v739_v44, %v738_v48  ;;  %v841_v53 = vadd.f32 %v840_v36, %v839_v50 }
 0x125   : > { %613 = vrot.lane.b32.xlu0 %v1351_v7, %s1078_s27 }
 0x126   : > { %v742_v57 = vadd.f32 %v741_v54, %v740_v15  ;;  %v843_v60 = vadd.f32 %v842_v58, %v841_v53 }
 0x128   : > { %v744_v62 = vadd.f32 %v743_v59, %v742_v57  ;;  %v845_v63 = vadd.f32 %v844_v61, %v843_v60 }
 0x12a   : > { %v745_v51 = vrot.slane %v744_v62, 4  ;;  %v847_v7 = vadd.f32 %v846_v0, %v845_v63 }
 0x12c   : > { %v746_v1 = vadd.f32 %v745_v51, %v744_v62  ;;  %v848_v2 = vrot.slane %v847_v7, 4 }
 0x12e   : > { %v747_v3 = vrot.slane %v746_v1, 2  ;;  %v849_v56 = vadd.f32 %v848_v2, %v847_v7 }
 0x130   : > { %v748_v5 = vadd.f32 %v747_v3, %v746_v1  ;;  %v850_v47 = vrot.slane %v849_v56, 2 }
 0x132   : > { %v749_v18 = vrot.slane %v748_v5, 1  ;;  %v851_v8 = vadd.f32 %v850_v47, %v849_v56 }
 0x134   : > { %v750_v38 = vadd.f32 %v749_v18, %v748_v5  ;;  %v852_v11 = vrot.slane %v851_v8, 1 }
 0x136   : > { %752 = vst.msk [vmem:[%s224_s5] sm:$0x1] %vm751_vm2, %v750_v38  ;;  %v853_v16 = vadd.f32 %v852_v11, %v851_v8 }
 0x138   : > { %854 = vst.msk [vmem:[%s224_s5 + $0x1] sm:$0x1] %vm751_vm2, %v853_v16 }
 0x15a   : > { %v558_v12 = vpop.permute.xlu1 %557 }
 0x15b   : > { %v590_v14 = vpop.permute.xlu0 %589  ;;  %652 = vst.msk [vmem:[%s1531_s8 + $0x10] sm:$0xff] %vm649_vm3, %v558_v12 }
 0x15c   : > { %668 = vst.msk [vmem:[%s1531_s8 + $0x90] sm:$0xff] %vm649_vm3, %v590_v14 }
 0x15e   : > { %v560_v25 = vpop.permute.xlu1 %559 }
 0x15f   : > { %v554_v9 = vpop.permute.xlu0 %553  ;;  %653 = vst.msk [vmem:[%s1531_s8 + $0x18] sm:$0xff] %vm649_vm3, %v560_v25 }
 0x160   : > { %650 = vst.msk [vmem:[%s1531_s8] sm:$0xff] %vm649_vm3, %v554_v9 }
 0x162   : > { %v592_v19 = vpop.permute.xlu1 %591 }
 0x163   : > { %v586_v21 = vpop.permute.xlu0 %585  ;;  %669 = vst.msk [vmem:[%s1531_s8 + $0x98] sm:$0xff] %vm649_vm3, %v592_v19 }
 0x164   : > { %666 = vst.msk [vmem:[%s1531_s8 + $0x80] sm:$0xff] %vm649_vm3, %v586_v21 }
 0x166   : > { %v588_v22 = vpop.permute.xlu1 %587 }
 0x167   : > { %667 = vst.msk [vmem:[%s1531_s8 + $0x88] sm:$0xff] %vm649_vm3, %v588_v22  ;;  %v556_v23 = vpop.permute.xlu0 %555 }
 0x168   : > { %651 = vst.msk [vmem:[%s1531_s8 + $0x8] sm:$0xff] %vm649_vm3, %v556_v23 }
 0x16a   : > { %v568_v26 = vpop.permute.xlu1 %567 }
 0x16b   : > { %v566_v10 = vpop.permute.xlu0 %565  ;;  %657 = vst.msk [vmem:[%s1531_s8 + $0x38] sm:$0xff] %vm649_vm3, %v568_v26 }
 0x16c   : > { %656 = vst.msk [vmem:[%s1531_s8 + $0x30] sm:$0xff] %vm649_vm3, %v566_v10 }
 0x16e   : > { %v600_v27 = vpop.permute.xlu1 %599 }
 0x16f   : > { %v598_v28 = vpop.permute.xlu0 %597  ;;  %673 = vst.msk [vmem:[%s1531_s8 + $0xb8] sm:$0xff] %vm649_vm3, %v600_v27 }
 0x170   : > { %672 = vst.msk [vmem:[%s1531_s8 + $0xb0] sm:$0xff] %vm649_vm3, %v598_v28 }
 0x172   : > { %v564_v29 = vpop.permute.xlu1 %563 }
 0x173   : > { %v562_v20 = vpop.permute.xlu0 %561  ;;  %655 = vst.msk [vmem:[%s1531_s8 + $0x28] sm:$0xff] %vm649_vm3, %v564_v29 }
 0x174   : > { %654 = vst.msk [vmem:[%s1531_s8 + $0x20] sm:$0xff] %vm649_vm3, %v562_v20 }
 0x176   : > { %v596_v30 = vpop.permute.xlu1 %595 }
 0x177   : > { %v594_v13 = vpop.permute.xlu0 %593  ;;  %671 = vst.msk [vmem:[%s1531_s8 + $0xa8] sm:$0xff] %vm649_vm3, %v596_v30 }
 0x178   : > { %670 = vst.msk [vmem:[%s1531_s8 + $0xa0] sm:$0xff] %vm649_vm3, %v594_v13 }
 0x17a   : > { %v576_v31 = vpop.permute.xlu1 %575 }
 0x17b   : > { %v574_v4 = vpop.permute.xlu0 %573  ;;  %661 = vst.msk [vmem:[%s1531_s8 + $0x58] sm:$0xff] %vm649_vm3, %v576_v31 }
 0x17c   : > { %660 = vst.msk [vmem:[%s1531_s8 + $0x50] sm:$0xff] %vm649_vm3, %v574_v4 }
 0x17e   : > { %v608_v32 = vpop.permute.xlu1 %607 }
 0x17f   : > { %v606_v45 = vpop.permute.xlu0 %605  ;;  %677 = vst.msk [vmem:[%s1531_s8 + $0xd8] sm:$0xff] %vm649_vm3, %v608_v32 }
 0x180   : > { %676 = vst.msk [vmem:[%s1531_s8 + $0xd0] sm:$0xff] %vm649_vm3, %v606_v45 }
 0x182   : > { %v572_v33 = vpop.permute.xlu1 %571 }
 0x183   : > { %v570_v34 = vpop.permute.xlu0 %569  ;;  %659 = vst.msk [vmem:[%s1531_s8 + $0x48] sm:$0xff] %vm649_vm3, %v572_v33 }
 0x184   : > { %658 = vst.msk [vmem:[%s1531_s8 + $0x40] sm:$0xff] %vm649_vm3, %v570_v34 }
 0x186   : > { %v604_v35 = vpop.permute.xlu1 %603 }
 0x187   : > { %v602_v55 = vpop.permute.xlu0 %601  ;;  %675 = vst.msk [vmem:[%s1531_s8 + $0xc8] sm:$0xff] %vm649_vm3, %v604_v35 }
 0x188   : > { %674 = vst.msk [vmem:[%s1531_s8 + $0xc0] sm:$0xff] %vm649_vm3, %v602_v55 }
 0x18a   : > { %v584_v37 = vpop.permute.xlu1 %583 }
 0x18b   : > { %v582_v17 = vpop.permute.xlu0 %581  ;;  %665 = vst.msk [vmem:[%s1531_s8 + $0x78] sm:$0xff] %vm649_vm3, %v584_v37 }
 0x18c   : > { %664 = vst.msk [vmem:[%s1531_s8 + $0x70] sm:$0xff] %vm649_vm3, %v582_v17 }
 0x18e   : > { %v580_v40 = vpop.permute.xlu1 %579 }
 0x18f   : > { %v578_v41 = vpop.permute.xlu0 %577  ;;  %663 = vst.msk [vmem:[%s1531_s8 + $0x68] sm:$0xff] %vm649_vm3, %v580_v40 }
 0x190   : > { %662 = vst.msk [vmem:[%s1531_s8 + $0x60] sm:$0xff] %vm649_vm3, %v578_v41 }
 0x192   : > { %v612_v6 = vpop.permute.xlu1 %611 }
 0x193   : > { %v610_v39 = vpop.permute.xlu0 %609  ;;  %679 = vst.msk [vmem:[%s1531_s8 + $0xe8] sm:$0xff] %vm649_vm3, %v612_v6 }
 0x194   : > { %678 = vst.msk [vmem:[%s1531_s8 + $0xe0] sm:$0xff] %vm649_vm3, %v610_v39 }
 0x196   : > { %v616_v42 = vpop.permute.xlu1 %615 }
 0x197   : > { %v614_v43 = vpop.permute.xlu0 %613  ;;  %681 = vst.msk [vmem:[%s1531_s8 + $0xf8] sm:$0xff] %vm649_vm3, %v616_v42 }
 0x198   : > { %680 = vst.msk [vmem:[%s1531_s8 + $0xf0] sm:$0xff] %vm649_vm3, %v614_v43 }
 0x199 PF: > { %s15_s15 = sadd.s32 1, %s1076_s15  }
 0x19a   : > { %p12_p5 = scmp.ge.s32.totalorder %s15_s15, 4  }
 0x19c   :  { %14 = sbr.rel (!%p12_p5) target bundleno = 1 (0x1), region = 82 }

// kernel: bottleneck_forward.6
= control target key start
LH: loop header
LB: loop body
LE: loop exit
PB: predicated region body
PF: predicated region fallthrough
CT: control target
= control target key end

     0   :  { %s1137_s21 = smov 0   ;;  %s1518_s0 = inlined_call_operand.vmem [shape: f32[512,4], index: 0, kind: input, shape index: {}]   ;;  %s1519_s1 = inlined_call_operand.vmem [shape: f32[512,8], index: 1, kind: input, shape index: {}]   ;;  %s1520_s2 = inlined_call_operand.vmem [shape: bf16[4,8], index: 2, kind: input, shape index: {}]   ;;  %s1521_s3 = inlined_call_operand.vmem [shape: f32[1,4], index: 3, kind: input, shape index: {}]   ;;  %s1522_s4 = inlined_call_operand.vmem [shape: f32[1,4], index: 4, kind: input, shape index: {}]   ;;  %s1523_s5 = inlined_call_operand.vmem [shape: f32[512,8], index: 5, kind: output, shape index: {0}]   ;;  %s1524_s6 = inlined_call_operand.vmem [shape: f32[2,2,8], index: 6, kind: output, shape index: {1}]  }
   0x1 LB: > { %s1143_s22 = sadd.s32 4294967295, %s1100_s21   ;;  %p1003_p0 = scmp.ge.s32.totalorder %s1100_s21, 1  ;;  %s1100_s21 = sphi %s1137_s21, %s17_s21  }
   0x2   : > { %p227_p1 = scmp.lt.s32.totalorder %s1100_s21, 3 }
   0x4   : > { %p228_p2 = pnand %p1003_p0, %p227_p1 }
   0x5   : > { %v447_v0 = vld [vmem:[%s1520_s2] sm:$0x3] (!%p228_p2)  ;;  %vm529_vm0 = vcmask (!%p228_p2), 1041408   ;;  %s1004_s25 = sshll.u32 (!%p228_p2), %s1143_s22, 5  ;;  %vm480_vm1 = vcmask (!%p228_p2), 31744   ;;  %vm694_vm2 = vcmask (!%p228_p2), 64512  }
   0x6   : > { %231 = sbr.rel (%p228_p2) target bundleno = 321 (0x141), region = 40  ;;  %1084 = vmatprep.subr.msk.bf16.mxu0 (!%p228_p2), %vm529_vm0, %v447_v0  ;;  %v531_v1 = vsel (!%p228_p2), %vm529_vm0, %v447_v0, 0  ;;  %p267_p3 = scmp.lt.s32.totalorder (!%p228_p2), %s1004_s25, 63  ;;  %1085 = vmatprep.subr.msk.bf16.mxu1 (!%p228_p2), %vm529_vm0, %v447_v0  ;;  %v1156_v2 = vld [vmem:[%s1521_s3] ss:$0 sm:$0xff] (!%p228_p2)  ;;  %vm796_vm3 = vcmask (!%p228_p2), 57344  }
   0x7   : > { %1049 = vmatpush3.bf16.msra.mxu0 (!%p228_p2), %v531_v1  ;;  %1083 = vmatpush3.bf16.msra.mxu1 (!%p228_p2), %v531_v1  ;;  %v1167_v3 = vld [vmem:[%s1522_s4] ss:$0 sm:$0xff] (!%p228_p2)  ;;  %p284_p4 = scmp.lt.s32.totalorder (!%p228_p2), %s1143_s22, 1 }
   0xd   : > { %s1526_s25 = smov (!%p267_p3, %s1004_s25), 63  ;;  %s1528_s22 = smov (!%p284_p4, %s1143_s22), 1 }
   0xe   : > { %s1151_s26 = sshll.u32 %s1526_s25, 3  ;;  %s1010_s16 = sshll.u32 %s1528_s22, 1 }
   0xf   : > { %s1162_s7 = scalar_lea.vmem %s1518_s0, %s1151_s26  ;;  %s1288_s12 = scalar_lea.vmem %s1519_s1, %s1151_s26 }
  0x10   : > { %v289_v4 = vld [vmem:[%s1162_s7] sm:$0xff]  ;;  %v290_v5 = vld [vmem:[%s1162_s7 + $0x8] sm:$0xff]  ;;  %v291_v6 = vld [vmem:[%s1162_s7 + $0x10] sm:$0xff]  ;;  %s1296_s15 = scalar_lea.vmem %s1523_s5, %s1151_s26  ;;  %s287_s19 = scalar_lea.vmem %s1524_s6, %s1010_s16 }
  0x11   : > { %v328_v7 = vmul.f32 %v1156_v2, %v289_v4  ;;  %v329_v8 = vmul.f32 %v1156_v2, %v290_v5  ;;  %v292_v9 = vld [vmem:[%s1162_s7 + $0x18] sm:$0xff]  ;;  %v330_v10 = vmul.f32 %v1156_v2, %v291_v6  ;;  %v293_v11 = vld [vmem:[%s1162_s7 + $0x20] sm:$0xff]  ;;  %v294_v12 = vld [vmem:[%s1162_s7 + $0x28] sm:$0xff] }
  0x12   : > { %v331_v13 = vmul.f32 %v1156_v2, %v292_v9  ;;  %v332_v14 = vmul.f32 %v1156_v2, %v293_v11  ;;  %v333_v15 = vmul.f32 %v1156_v2, %v294_v12  ;;  %v295_v16 = vld [vmem:[%s1162_s7 + $0x30] sm:$0xff]  ;;  %v296_v17 = vld [vmem:[%s1162_s7 + $0x38] sm:$0xff]  ;;  %v297_v26 = vld [vmem:[%s1162_s7 + $0x40] sm:$0xff] }
  0x13   : > { %v367_v18 = vadd.f32 %v1167_v3, %v328_v7  ;;  %v368_v19 = vadd.f32 %v1167_v3, %v329_v8  ;;  %v369_v20 = vadd.f32 %v1167_v3, %v330_v10  ;;  %v334_v21 = vmul.f32 %v1156_v2, %v295_v16  ;;  %v298_v27 = vld [vmem:[%s1162_s7 + $0x48] sm:$0xff]  ;;  %v299_v32 = vld [vmem:[%s1162_s7 + $0x50] sm:$0xff]  ;;  %v300_v37 = vld [vmem:[%s1162_s7 + $0x58] sm:$0xff] }
  0x14   : > { %v370_v22 = vadd.f32 %v1167_v3, %v331_v13  ;;  %v371_v23 = vadd.f32 %v1167_v3, %v332_v14  ;;  %v372_v24 = vadd.f32 %v1167_v3, %v333_v15  ;;  %v335_v25 = vmul.f32 %v1156_v2, %v296_v17  ;;  %v301_v38 = vld [vmem:[%s1162_s7 + $0x60] sm:$0xff]  ;;  %v302_v43 = vld [vmem:[%s1162_s7 + $0x68] sm:$0xff]  ;;  %v303_v44 = vld [vmem:[%s1162_s7 + $0x70] sm:$0xff] }
  0x15   : > { %v399_v28 = vmax.f32 %v367_v18, 0.0  ;;  %v400_v29 = vmax.f32 %v368_v19, 0.0  ;;  %v401_v30 = vmax.f32 %v369_v20, 0.0  ;;  %v373_v31 = vadd.f32 %v1167_v3, %v334_v21  ;;  %v304_v53 = vld [vmem:[%s1162_s7 + $0x78] sm:$0xff]  ;;  %v305_v57 = vld [vmem:[%s1162_s7 + $0x80] sm:$0xff]  ;;  %v306_v62 = vld [vmem:[%s1162_s7 + $0x88] sm:$0xff] }
  0x16   : > { %v402_v33 = vmax.f32 %v370_v22, 0.0  ;;  %v403_v34 = vmax.f32 %v371_v23, 0.0  ;;  %v404_v35 = vmax.f32 %v372_v24, 0.0  ;;  %v374_v36 = vadd.f32 %v1167_v3, %v335_v25  ;;  %v307_v1 = vld [vmem:[%s1162_s7 + $0x90] sm:$0xff]  ;;  %v308_v4 = vld [vmem:[%s1162_s7 + $0x98] sm:$0xff]  ;;  %v309_v8 = vld [vmem:[%s1162_s7 + $0xa0] sm:$0xff] }
  0x17   : > { %v431_v39 = vpack.c.bf16 %v400_v29, %v399_v28  ;;  %v405_v40 = vmax.f32 %v373_v31, 0.0  ;;  %v336_v41 = vmul.f32 %v1156_v2, %v297_v26  ;;  %v337_v42 = vmul.f32 %v1156_v2, %v298_v27  ;;  %v310_v13 = vld [vmem:[%s1162_s7 + $0xa8] sm:$0xff]  ;;  %v311_v18 = vld [vmem:[%s1162_s7 + $0xb0] sm:$0xff]  ;;  %v312_v23 = vld [vmem:[%s1162_s7 + $0xb8] sm:$0xff] }
  0x18   : > { %v432_v45 = vpack.c.bf16 %v402_v33, %v401_v30  ;;  %v433_v46 = vpack.c.bf16 %v404_v35, %v403_v34  ;;  %v406_v47 = vmax.f32 %v374_v36, 0.0  ;;  %v338_v48 = vmul.f32 %v1156_v2, %v299_v32  ;;  %v313_v28 = vld [vmem:[%s1162_s7 + $0xc0] sm:$0xff]  ;;  %v314_v33 = vld [vmem:[%s1162_s7 + $0xc8] sm:$0xff] }
  0x19   : > { %1050 = vmatprep.mubr.msk.bf16.mxu0 %vm480_vm1, %v431_v39  ;;  %v375_v49 = vadd.f32 %v1167_v3, %v336_v41  ;;  %v376_v50 = vadd.f32 %v1167_v3, %v337_v42  ;;  %v339_v51 = vmul.f32 %v1156_v2, %v300_v37  ;;  %v340_v52 = vmul.f32 %v1156_v2, %v301_v38  ;;  %v315_v38 = vld [vmem:[%s1162_s7 + $0xd0] sm:$0xff] }
  0x1a   : > { %1051 = vmatmul.mubr.msk.bf16.vlgmr.msra.gmra.mrb[0].mxu0 %vm480_vm1, %v432_v45  ;;  %v377_v54 = vadd.f32 %v1167_v3, %v338_v48  ;;  %v341_v55 = vmul.f32 %v1156_v2, %v302_v43  ;;  %v342_v56 = vmul.f32 %v1156_v2, %v303_v44  ;;  %v343_v0 = vmul.f32 %v1156_v2, %v304_v53  ;;  %v316_v43 = vld [vmem:[%s1162_s7 + $0xd8] sm:$0xff]  ;;  %v317_v48 = vld [vmem:[%s1162_s7 + $0xe0] sm:$0xff] }
  0x1b   : > { %1054 = vmatprep.mubr.msk.bf16.mxu0 %vm480_vm1, %v433_v46  ;;  %v407_v58 = vmax.f32 %v375_v49, 0.0  ;;  %v408_v59 = vmax.f32 %v376_v50, 0.0  ;;  %v378_v60 = vadd.f32 %v1167_v3, %v339_v51  ;;  %v379_v61 = vadd.f32 %v1167_v3, %v340_v52  ;;  %v318_v49 = vld [vmem:[%s1162_s7 + $0xe8] sm:$0xff] }
  0x1c   : > { %v380_v63 = vadd.f32 %v1167_v3, %v341_v55  ;;  %v434_v5 = vpack.c.bf16 %v406_v47, %v405_v40  ;;  %v409_v6 = vmax.f32 %v377_v54, 0.0  ;;  %v344_v7 = vmul.f32 %v1156_v2, %v305_v57 }
  0x1d   : > { %v435_v9 = vpack.c.bf16 %v408_v59, %v407_v58  ;;  %v410_v10 = vmax.f32 %v378_v60, 0.0  ;;  %v1225_v11 = vadd.f32 %v1167_v3, %v342_v56  ;;  %v345_v12 = vmul.f32 %v1156_v2, %v306_v62 }
  0x1e   : > { %v411_v14 = vmax.f32 %v379_v61, 0.0  ;;  %v383_v15 = vadd.f32 %v1167_v3, %v344_v7  ;;  %v346_v16 = vmul.f32 %v1156_v2, %v307_v1  ;;  %v347_v17 = vmul.f32 %v1156_v2, %v308_v4 }
  0x1f   : > { %v412_v19 = vmax.f32 %v380_v63, 0.0  ;;  %v382_v20 = vadd.f32 %v1167_v3, %v343_v0  ;;  %v384_v21 = vadd.f32 %v1167_v3, %v345_v12  ;;  %v348_v22 = vmul.f32 %v1156_v2, %v309_v8  ;;  %v319_v8 = vld [vmem:[%s1162_s7 + $0xf0] sm:$0xff] }
  0x20   : > { %v415_v24 = vmax.f32 %v383_v15, 0.0  ;;  %v385_v25 = vadd.f32 %v1167_v3, %v346_v16  ;;  %v386_v26 = vadd.f32 %v1167_v3, %v347_v17  ;;  %v349_v27 = vmul.f32 %v1156_v2, %v310_v13 }
  0x21   : > { %v436_v29 = vpack.c.bf16 %v410_v10, %v409_v6  ;;  %v416_v30 = vmax.f32 %v384_v21, 0.0  ;;  %v387_v31 = vadd.f32 %v1167_v3, %v348_v22  ;;  %v350_v32 = vmul.f32 %v1156_v2, %v311_v18 }
  0x22   : > { %1055 = vmatmul.mubr.msk.bf16.gmra.mrb[4].mxu0 %vm480_vm1, %v434_v5  ;;  %v417_v34 = vmax.f32 %v385_v25, 0.0  ;;  %v418_v35 = vmax.f32 %v386_v26, 0.0  ;;  %v388_v36 = vadd.f32 %v1167_v3, %v349_v27  ;;  %v351_v37 = vmul.f32 %v1156_v2, %v312_v23  ;;  %v448_v23 = vld [vmem:[%s1288_s12] sm:$0xff]  ;;  %v451_v25 = vld [vmem:[%s1288_s12 + $0x18] sm:$0xff] }
  0x23   : > { %1058 = vmatprep.mubr.msk.bf16.mxu0 %vm480_vm1, %v435_v9  ;;  %v439_v39 = vpack.c.bf16 %v416_v30, %v415_v24  ;;  %v419_v40 = vmax.f32 %v387_v31, 0.0  ;;  %v389_v41 = vadd.f32 %v1167_v3, %v350_v32  ;;  %v352_v42 = vmul.f32 %v1156_v2, %v313_v28  ;;  %v320_v9 = vld [vmem:[%s1162_s7 + $0xf8] sm:$0xff]  ;;  %v449_v28 = vld [vmem:[%s1288_s12 + $0x8] sm:$0xff] }
  0x24   : > { %v440_v44 = vpack.c.bf16 %v418_v35, %v417_v34  ;;  %v420_v45 = vmax.f32 %v388_v36, 0.0  ;;  %v390_v46 = vadd.f32 %v1167_v3, %v351_v37  ;;  %v353_v47 = vmul.f32 %v1156_v2, %v314_v33 }
  0x25   : > { %v437_v50 = vpack.c.bf16 %v412_v19, %v411_v14  ;;  %1066 = vmatprep.mubr.msk.bf16.mxu1 %vm480_vm1, %v439_v39  ;;  %v421_v51 = vmax.f32 %v389_v41, 0.0  ;;  %v391_v52 = vadd.f32 %v1167_v3, %v352_v42  ;;  %v354_v53 = vmul.f32 %v1156_v2, %v315_v38  ;;  %v454_v39 = vld [vmem:[%s1288_s12 + $0x30] sm:$0xff]  ;;  %v452_v42 = vld [vmem:[%s1288_s12 + $0x20] sm:$0xff] }
  0x26   : > { %1067 = vmatmul.mubr.msk.bf16.vlgmr.msra.gmra.mrb[0].mxu1 %vm480_vm1, %v440_v44  ;;  %v441_v54 = vpack.c.bf16 %v420_v45, %v419_v40  ;;  %v422_v55 = vmax.f32 %v390_v46, 0.0  ;;  %v392_v56 = vadd.f32 %v1167_v3, %v353_v47  ;;  %v355_v57 = vmul.f32 %v1156_v2, %v316_v43 }
  0x27   : > { %v423_v58 = vmax.f32 %v391_v52, 0.0  ;;  %v356_v59 = vmul.f32 %v1156_v2, %v317_v48  ;;  %v357_v60 = vmul.f32 %v1156_v2, %v318_v49  ;;  %v413_v62 = vmax.f32 %v1225_v11, 0.0  ;;  %v453_v52 = vld [vmem:[%s1288_s12 + $0x28] sm:$0xff] }
  0x28   : > { %1070 = vmatprep.mubr.msk.bf16.mxu1 %vm480_vm1, %v441_v54  ;;  %v424_v61 = vmax.f32 %v392_v56, 0.0  ;;  %v414_v63 = vmax.f32 %v382_v20, 0.0  ;;  %v442_v0 = vpack.c.bf16 %v422_v55, %v421_v51  ;;  %v393_v1 = vadd.f32 %v1167_v3, %v354_v53  ;;  %v455_v51 = vld [vmem:[%s1288_s12 + $0x38] sm:$0xff] }
  0x29   : > { %v394_v4 = vadd.f32 %v1167_v3, %v355_v57  ;;  %v395_v6 = vadd.f32 %v1167_v3, %v356_v59  ;;  %v396_v7 = vadd.f32 %v1167_v3, %v357_v60  ;;  %v358_v13 = vmul.f32 %v1156_v2, %v319_v8  ;;  %v467_v8 = vld [vmem:[%s1288_s12 + $0x98] sm:$0xff] }
  0x2a   : > { %1059 = vmatmul.mubr.msk.bf16.gmra.mrb[8].mxu0 %vm480_vm1, %v436_v29  ;;  %v443_v5 = vpack.c.bf16 %v424_v61, %v423_v58  ;;  %v438_v10 = vpack.c.bf16 %v414_v63, %v413_v62  ;;  %v425_v12 = vmax.f32 %v393_v1, 0.0  ;;  %v359_v14 = vmul.f32 %v1156_v2, %v320_v9  ;;  %v466_v1 = vld [vmem:[%s1288_s12 + $0x90] sm:$0xff] }
  0x2b   : > { %1062 = vmatprep.mubr.msk.bf16.mxu0 %vm480_vm1, %v437_v50  ;;  %v426_v11 = vmax.f32 %v394_v4, 0.0  ;;  %v427_v15 = vmax.f32 %v395_v6, 0.0  ;;  %v428_v16 = vmax.f32 %v396_v7, 0.0  ;;  %v397_v18 = vadd.f32 %v1167_v3, %v358_v13  ;;  %v464_v7 = vld [vmem:[%s1288_s12 + $0x80] sm:$0xff] }
  0x2c   : > { %v398_v19 = vadd.f32 %v1167_v3, %v359_v14  ;;  %v450_v3 = vld [vmem:[%s1288_s12 + $0x10] sm:$0xff] }
  0x2d   : > { %v444_v17 = vpack.c.bf16 %v426_v11, %v425_v12  ;;  %v445_v20 = vpack.c.bf16 %v428_v16, %v427_v15  ;;  %v429_v21 = vmax.f32 %v397_v18, 0.0  ;;  %v458_v11 = vld [vmem:[%s1288_s12 + $0x50] sm:$0xff] }
  0x2e   : > { %1071 = vmatmul.mubr.msk.bf16.gmra.mrb[4].mxu1 %vm480_vm1, %v442_v0  ;;  %v430_v22 = vmax.f32 %v398_v19, 0.0 }
  0x2f   : > { %1074 = vmatprep.mubr.msk.bf16.mxu1 %vm480_vm1, %v443_v5 }
  0x30   : > { %v446_v2 = vpack.c.bf16 %v430_v22, %v429_v21  ;;  %v459_v22 = vld [vmem:[%s1288_s12 + $0x58] sm:$0xff] }
  0x32   : > { %1063 = vmatmul.mubr.msk.bf16.gmra.mrb[12].mxu0 %vm480_vm1, %v438_v10 }
  0x36   : > { %1075 = vmatmul.mubr.msk.bf16.gmra.mrb[8].mxu1 %vm480_vm1, %v444_v17  ;;  %v456_v17 = vld [vmem:[%s1288_s12 + $0x40] sm:$0xff] }
  0x37   : > { %1078 = vmatprep.mubr.msk.bf16.mxu1 %vm480_vm1, %v445_v20 }
  0x3e   : > { %1079 = vmatmul.mubr.msk.bf16.gmra.mrb[12].mxu1 %vm480_vm1, %v446_v2 }
  0xed   : > { %v1052_v24 = vpop.f32.mrb[0].mxu0 }
  0xee   : > { %v576_v26 = vadd.f32 %v1052_v24, %v450_v3  ;;  %v567_v27 = vpop.f32.mrb[1].mxu0 }
  0xef   : > { %v568_v29 = vadd.f32 %v567_v27, %v448_v23  ;;  %v1053_v30 = vpop.f32.mrb[2].mxu0 }
  0xf0   : > { %697 = vst.msk [vmem:[%s1296_s15 + $0x10] sm:$0xff] %vm694_vm2, %v576_v26  ;;  %v579_v31 = vadd.f32 %v1053_v30, %v451_v25  ;;  %v570_v32 = vpop.f32.mrb[3].mxu0  ;;  %v800_v35 = vmul.f32 %v576_v26, %v576_v26  ;;  %v730_v43 = vsel %vm694_vm2, %v576_v26, 0.0 }
  0xf1   : > { %695 = vst.msk [vmem:[%s1296_s15] sm:$0xff] %vm694_vm2, %v568_v29  ;;  %v798_v33 = vmul.f32 %v568_v29, %v568_v29  ;;  %v571_v34 = vadd.f32 %v570_v32, %v449_v28  ;;  %v727_v36 = vsel %vm694_vm2, %v568_v29, 0.0  ;;  %v457_v29 = vld [vmem:[%s1288_s12 + $0x48] sm:$0xff] }
  0xf2   : > { %698 = vst.msk [vmem:[%s1296_s15 + $0x18] sm:$0xff] %vm694_vm2, %v579_v31  ;;  %v801_v40 = vmul.f32 %v579_v31, %v579_v31  ;;  %v833_v53 = vsel %vm694_vm2, %v800_v35, 0.0  ;;  %v732_v54 = vsel %vm694_vm2, %v579_v31, 0.0 }
  0xf3   : > { %696 = vst.msk [vmem:[%s1296_s15 + $0x8] sm:$0xff] %vm694_vm2, %v571_v34  ;;  %v728_v37 = vsel %vm694_vm2, %v571_v34, 0.0  ;;  %v799_v38 = vmul.f32 %v571_v34, %v571_v34  ;;  %v830_v44 = vsel %vm694_vm2, %v798_v33, 0.0 }
  0xf4   : > { %v729_v41 = vadd.f32 %v728_v37, %v727_v36  ;;  %v835_v57 = vsel %vm694_vm2, %v801_v40, 0.0 }
  0xf5   : > { %v831_v45 = vsel %vm694_vm2, %v799_v38, 0.0  ;;  %v1056_v46 = vpop.f32.mrb[4].mxu0 }
  0xf6   : > { %v731_v47 = vadd.f32 %v730_v43, %v729_v41  ;;  %v832_v48 = vadd.f32 %v831_v45, %v830_v44  ;;  %v592_v49 = vadd.f32 %v1056_v46, %v454_v39  ;;  %v583_v50 = vpop.f32.mrb[5].mxu0 }
  0xf7   : > { %v584_v55 = vadd.f32 %v583_v50, %v452_v42  ;;  %v1057_v56 = vpop.f32.mrb[6].mxu0  ;;  %v465_v50 = vld [vmem:[%s1288_s12 + $0x88] sm:$0xff] }
  0xf8   : > { %v834_v58 = vadd.f32 %v833_v53, %v832_v48  ;;  %701 = vst.msk [vmem:[%s1296_s15 + $0x30] sm:$0xff] %vm694_vm2, %v592_v49  ;;  %v733_v59 = vadd.f32 %v732_v54, %v731_v47  ;;  %v586_v60 = vpop.f32.mrb[7].mxu0  ;;  %v595_v63 = vadd.f32 %v1057_v56, %v455_v51  ;;  %v804_v9 = vmul.f32 %v592_v49, %v592_v49  ;;  %v460_v54 = vld [vmem:[%s1288_s12 + $0x60] sm:$0xff] }
  0xf9   : > { %699 = vst.msk [vmem:[%s1296_s15 + $0x20] sm:$0xff] %vm694_vm2, %v584_v55  ;;  %v734_v61 = vsel %vm694_vm2, %v584_v55, 0.0  ;;  %v802_v62 = vmul.f32 %v584_v55, %v584_v55  ;;  %v587_v0 = vadd.f32 %v586_v60, %v453_v52  ;;  %v1068_v6 = vpop.f32.mrb[0].mxu1  ;;  %v738_v20 = vsel %vm694_vm2, %v592_v49, 0.0  ;;  %v462_v49 = vld [vmem:[%s1288_s12 + $0x70] sm:$0xff] }
  0xfa   : > { %v735_v4 = vadd.f32 %v734_v61, %v733_v59  ;;  %v836_v5 = vadd.f32 %v835_v57, %v834_v58  ;;  %702 = vst.msk [vmem:[%s1296_s15 + $0x38] sm:$0xff] %vm694_vm2, %v595_v63  ;;  %v631_v13 = vpop.f32.mrb[1].mxu1  ;;  %v1336_v18 = vadd.f32 %v1068_v6, %v466_v1  ;;  %v805_v24 = vmul.f32 %v595_v63, %v595_v63  ;;  %v470_v55 = vld [vmem:[%s1288_s12 + $0xb0] sm:$0xff]  ;;  %v463_v61 = vld [vmem:[%s1288_s12 + $0x78] sm:$0xff] }
  0xfb   : > { %v837_v10 = vsel %vm694_vm2, %v802_v62, 0.0  ;;  %700 = vst.msk [vmem:[%s1296_s15 + $0x28] sm:$0xff] %vm694_vm2, %v587_v0  ;;  %v736_v12 = vsel %vm694_vm2, %v587_v0, 0.0  ;;  %v803_v16 = vmul.f32 %v587_v0, %v587_v0  ;;  %v1069_v19 = vpop.f32.mrb[2].mxu1  ;;  %v1340_v2 = vadd.f32 %v631_v13, %v464_v7 }
  0xfc   : > { %v838_v14 = vadd.f32 %v837_v10, %v836_v5  ;;  %v737_v15 = vadd.f32 %v736_v12, %v735_v4  ;;  %v1342_v3 = vadd.f32 %v1069_v19, %v467_v8  ;;  %v634_v23 = vpop.f32.mrb[3].mxu1  ;;  %713 = vst.msk [vmem:[%s1296_s15 + $0x90] sm:$0xff] %vm694_vm2, %v1336_v18  ;;  %v740_v30 = vsel %vm694_vm2, %v595_v63, 0.0  ;;  %v461_v5 = vld [vmem:[%s1288_s12 + $0x68] sm:$0xff] }
  0xfd   : > { %v1060_v21 = vpop.f32.mrb[8].mxu0  ;;  %v839_v26 = vsel %vm694_vm2, %v803_v16, 0.0  ;;  %711 = vst.msk [vmem:[%s1296_s15 + $0x80] sm:$0xff] %vm694_vm2, %v1340_v2  ;;  %v841_v34 = vsel %vm694_vm2, %v804_v9, 0.0  ;;  %v843_v42 = vsel %vm694_vm2, %v805_v24, 0.0  ;;  %v1377_v6 = vadd.f32 %v634_v23, %v465_v50 }
  0xfe   : > { %v739_v25 = vadd.f32 %v738_v20, %v737_v15  ;;  %v608_v27 = vadd.f32 %v1060_v21, %v458_v11  ;;  %v599_v28 = vpop.f32.mrb[9].mxu0  ;;  %v840_v31 = vadd.f32 %v839_v26, %v838_v14  ;;  %714 = vst.msk [vmem:[%s1296_s15 + $0x98] sm:$0xff] %vm694_vm2, %v1342_v3 }
  0xff   : > { %v600_v32 = vadd.f32 %v599_v28, %v456_v17  ;;  %v1061_v33 = vpop.f32.mrb[10].mxu0  ;;  %712 = vst.msk [vmem:[%s1296_s15 + $0x88] sm:$0xff] %vm694_vm2, %v1377_v6  ;;  %v468_v28 = vld [vmem:[%s1288_s12 + $0xa0] sm:$0xff] }
 0x100   : > { %705 = vst.msk [vmem:[%s1296_s15 + $0x50] sm:$0xff] %vm694_vm2, %v608_v27  ;;  %v741_v35 = vadd.f32 %v740_v30, %v739_v25  ;;  %v611_v36 = vadd.f32 %v1061_v33, %v459_v22  ;;  %v602_v37 = vpop.f32.mrb[11].mxu0  ;;  %v842_v38 = vadd.f32 %v841_v34, %v840_v31  ;;  %v808_v52 = vmul.f32 %v608_v27, %v608_v27  ;;  %v469_v34 = vld [vmem:[%s1288_s12 + $0xa8] sm:$0xff] }
 0x101   : > { %703 = vst.msk [vmem:[%s1296_s15 + $0x40] sm:$0xff] %vm694_vm2, %v600_v32  ;;  %v742_v39 = vsel %vm694_vm2, %v600_v32, 0.0  ;;  %v806_v40 = vmul.f32 %v600_v32, %v600_v32  ;;  %v603_v41 = vadd.f32 %v602_v37, %v457_v29  ;;  %v1072_v44 = vpop.f32.mrb[4].mxu1  ;;  %v746_v57 = vsel %vm694_vm2, %v608_v27, 0.0  ;;  %v471_v29 = vld [vmem:[%s1288_s12 + $0xb8] sm:$0xff] }
 0x102   : > { %v743_v43 = vadd.f32 %v742_v39, %v741_v35  ;;  %706 = vst.msk [vmem:[%s1296_s15 + $0x58] sm:$0xff] %vm694_vm2, %v611_v36  ;;  %v844_v45 = vadd.f32 %v843_v42, %v842_v38  ;;  %v647_v51 = vpop.f32.mrb[5].mxu1  ;;  %v809_v63 = vmul.f32 %v611_v36, %v611_v36  ;;  %v748_v7 = vsel %vm694_vm2, %v611_v36, 0.0  ;;  %v474_v35 = vld [vmem:[%s1288_s12 + $0xd0] sm:$0xff] }
 0x103   : > { %v845_v46 = vsel %vm694_vm2, %v806_v40, 0.0  ;;  %704 = vst.msk [vmem:[%s1296_s15 + $0x48] sm:$0xff] %vm694_vm2, %v603_v41  ;;  %v744_v47 = vsel %vm694_vm2, %v603_v41, 0.0  ;;  %v807_v48 = vmul.f32 %v603_v41, %v603_v41  ;;  %v1073_v56 = vpop.f32.mrb[6].mxu1  ;;  %v1380_v12 = vadd.f32 %v1072_v44, %v470_v55 }
 0x104   : > { %v745_v53 = vadd.f32 %v744_v47, %v743_v43  ;;  %v846_v58 = vadd.f32 %v845_v46, %v844_v45  ;;  %v650_v62 = vpop.f32.mrb[7].mxu1  ;;  %v849_v11 = vsel %vm694_vm2, %v808_v52, 0.0  ;;  %v851_v21 = vsel %vm694_vm2, %v809_v63, 0.0  ;;  %v472_v52 = vld [vmem:[%s1288_s12 + $0xc0] sm:$0xff] }
 0x105   : > { %v847_v59 = vsel %vm694_vm2, %v807_v48, 0.0  ;;  %v1064_v60 = vpop.f32.mrb[12].mxu0  ;;  %717 = vst.msk [vmem:[%s1296_s15 + $0xb0] sm:$0xff] %vm694_vm2, %v1380_v12  ;;  %v758_v33 = vsel %vm694_vm2, %v1340_v2, 0.0  ;;  %v814_v40 = vmul.f32 %v1340_v2, %v1340_v2  ;;  %v648_v44 = vadd.f32 %v647_v51, %v468_v28  ;;  %v475_v51 = vld [vmem:[%s1288_s12 + $0xd8] sm:$0xff] }
 0x106   : > { %v747_v0 = vadd.f32 %v746_v57, %v745_v53  ;;  %v624_v1 = vadd.f32 %v1064_v60, %v462_v49  ;;  %v615_v4 = vpop.f32.mrb[13].mxu0  ;;  %v848_v8 = vadd.f32 %v847_v59, %v846_v58  ;;  %v1411_v45 = vadd.f32 %v1073_v56, %v471_v29  ;;  %v478_v59 = vld [vmem:[%s1288_s12 + $0xf0] sm:$0xff] }
 0x107   : > { %v616_v9 = vadd.f32 %v615_v4, %v460_v54  ;;  %v1065_v10 = vpop.f32.mrb[14].mxu0  ;;  %v651_v48 = vadd.f32 %v650_v62, %v469_v34  ;;  %715 = vst.msk [vmem:[%s1296_s15 + $0xa0] sm:$0xff] %vm694_vm2, %v648_v44  ;;  %v473_v54 = vld [vmem:[%s1288_s12 + $0xc8] sm:$0xff]  ;;  %v861_v57 = vsel %vm694_vm2, %v814_v40, 0.0  ;;  %v815_v58 = vmul.f32 %v1377_v6, %v1377_v6 }
 0x108   : > { %709 = vst.msk [vmem:[%s1296_s15 + $0x70] sm:$0xff] %vm694_vm2, %v624_v1  ;;  %v749_v13 = vadd.f32 %v748_v7, %v747_v0  ;;  %v627_v14 = vadd.f32 %v1065_v10, %v463_v61  ;;  %v618_v15 = vpop.f32.mrb[15].mxu0  ;;  %v850_v16 = vadd.f32 %v849_v11, %v848_v8  ;;  %v812_v31 = vmul.f32 %v624_v1, %v624_v1 }
 0x109   : > { %707 = vst.msk [vmem:[%s1296_s15 + $0x60] sm:$0xff] %vm694_vm2, %v616_v9  ;;  %v750_v17 = vsel %vm694_vm2, %v616_v9, 0.0  ;;  %v810_v19 = vmul.f32 %v616_v9, %v616_v9  ;;  %v619_v20 = vadd.f32 %v618_v15, %v461_v5  ;;  %v1076_v23 = vpop.f32.mrb[8].mxu1  ;;  %v754_v37 = vsel %vm694_vm2, %v624_v1, 0.0  ;;  %718 = vst.msk [vmem:[%s1296_s15 + $0xb8] sm:$0xff] %vm694_vm2, %v1411_v45 }
 0x10a   : > { %v751_v22 = vadd.f32 %v750_v17, %v749_v13  ;;  %710 = vst.msk [vmem:[%s1296_s15 + $0x78] sm:$0xff] %vm694_vm2, %v627_v14  ;;  %v852_v24 = vadd.f32 %v851_v21, %v850_v16  ;;  %v663_v30 = vpop.f32.mrb[9].mxu1  ;;  %v813_v42 = vmul.f32 %v627_v14, %v627_v14  ;;  %v756_v46 = vsel %vm694_vm2, %v627_v14, 0.0  ;;  %716 = vst.msk [vmem:[%s1296_s15 + $0xa8] sm:$0xff] %vm694_vm2, %v651_v48  ;;  %v476_v13 = vld [vmem:[%s1288_s12 + $0xe0] sm:$0xff] }
 0x10b   : > { %v853_v25 = vsel %vm694_vm2, %v810_v19, 0.0  ;;  %708 = vst.msk [vmem:[%s1296_s15 + $0x68] sm:$0xff] %vm694_vm2, %v619_v20  ;;  %v752_v26 = vsel %vm694_vm2, %v619_v20, 0.0  ;;  %v811_v27 = vmul.f32 %v619_v20, %v619_v20  ;;  %v1077_v36 = vpop.f32.mrb[10].mxu1  ;;  %v1414_v49 = vadd.f32 %v1076_v23, %v474_v35  ;;  %v477_v19 = vld [vmem:[%s1288_s12 + $0xe8] sm:$0xff] }
 0x10c   : > { %v753_v32 = vadd.f32 %v752_v26, %v751_v22  ;;  %v854_v38 = vadd.f32 %v853_v25, %v852_v24  ;;  %v666_v41 = vpop.f32.mrb[11].mxu1  ;;  %v857_v50 = vsel %vm694_vm2, %v812_v31, 0.0  ;;  %v859_v55 = vsel %vm694_vm2, %v813_v42, 0.0 }
 0x10d   : > { %v855_v39 = vsel %vm694_vm2, %v811_v27, 0.0  ;;  %721 = vst.msk [vmem:[%s1296_s15 + $0xd0] sm:$0xff] %vm694_vm2, %v1414_v49  ;;  %v760_v62 = vsel %vm694_vm2, %v1377_v6, 0.0  ;;  %v664_v63 = vadd.f32 %v663_v30, %v472_v52  ;;  %v816_v1 = vmul.f32 %v1336_v18, %v1336_v18 }
 0x10e   : > { %v755_v43 = vadd.f32 %v754_v37, %v753_v32  ;;  %v856_v47 = vadd.f32 %v855_v39, %v854_v38  ;;  %v1439_v5 = vadd.f32 %v1077_v36, %v475_v51  ;;  %v667_v7 = vadd.f32 %v666_v41, %v473_v54 }
 0x10f   : > { %v762_v9 = vsel %vm694_vm2, %v1336_v18, 0.0  ;;  %v817_v6 = vmul.f32 %v1342_v3, %v1342_v3  ;;  %719 = vst.msk [vmem:[%s1296_s15 + $0xc0] sm:$0xff] %vm694_vm2, %v664_v63  ;;  %v863_v16 = vsel %vm694_vm2, %v815_v58, 0.0  ;;  %v818_v17 = vmul.f32 %v648_v44, %v648_v44  ;;  %v479_v18 = vld [vmem:[%s1288_s12 + $0xf8] sm:$0xff] }
 0x110   : > { %v757_v2 = vadd.f32 %v756_v46, %v755_v43  ;;  %v858_v53 = vadd.f32 %v857_v50, %v856_v47  ;;  %722 = vst.msk [vmem:[%s1296_s15 + $0xd8] sm:$0xff] %vm694_vm2, %v1439_v5  ;;  %720 = vst.msk [vmem:[%s1296_s15 + $0xc8] sm:$0xff] %vm694_vm2, %v667_v7  ;;  %v764_v20 = vsel %vm694_vm2, %v1342_v3, 0.0  ;;  %v766_v22 = vsel %vm694_vm2, %v648_v44, 0.0 }
 0x111   : > { %v1080_v60 = vpop.f32.mrb[12].mxu1  ;;  %v865_v23 = vsel %vm694_vm2, %v816_v1, 0.0  ;;  %v867_v27 = vsel %vm694_vm2, %v817_v6, 0.0  ;;  %v869_v31 = vsel %vm694_vm2, %v818_v17, 0.0  ;;  %v819_v32 = vmul.f32 %v651_v48, %v651_v48 }
 0x112   : > { %v759_v56 = vadd.f32 %v758_v33, %v757_v2  ;;  %v860_v61 = vadd.f32 %v859_v55, %v858_v53  ;;  %v679_v0 = vpop.f32.mrb[13].mxu1  ;;  %v1447_v11 = vadd.f32 %v1080_v60, %v478_v59  ;;  %v768_v35 = vsel %vm694_vm2, %v651_v48, 0.0 }
 0x113   : > { %v1081_v8 = vpop.f32.mrb[14].mxu1  ;;  %v680_v26 = vadd.f32 %v679_v0, %v476_v13  ;;  %v820_v37 = vmul.f32 %v1380_v12, %v1380_v12  ;;  %v770_v39 = vsel %vm694_vm2, %v1380_v12, 0.0  ;;  %v821_v42 = vmul.f32 %v1411_v45, %v1411_v45 }
 0x114   : > { %v761_v4 = vadd.f32 %v760_v62, %v759_v56  ;;  %v862_v10 = vadd.f32 %v861_v57, %v860_v61  ;;  %v682_v14 = vpop.f32.mrb[15].mxu1  ;;  %725 = vst.msk [vmem:[%s1296_s15 + $0xf0] sm:$0xff] %vm694_vm2, %v1447_v11  ;;  %v828_v25 = vmul.f32 %v1447_v11, %v1447_v11  ;;  %v691_v3 = vadd.f32 %v1081_v8, %v479_v18 }
 0x115   : > { %v683_v29 = vadd.f32 %v682_v14, %v477_v19  ;;  %723 = vst.msk [vmem:[%s1296_s15 + $0xe0] sm:$0xff] %vm694_vm2, %v680_v26  ;;  %v871_v44 = vsel %vm694_vm2, %v819_v32, 0.0  ;;  %v822_v46 = vmul.f32 %v664_v63, %v664_v63  ;;  %v772_v47 = vsel %vm694_vm2, %v1411_v45, 0.0 }
 0x116   : > { %v763_v15 = vadd.f32 %v762_v9, %v761_v4  ;;  %v864_v21 = vadd.f32 %v863_v16, %v862_v10  ;;  %v889_v33 = vsel %vm694_vm2, %v828_v25, 0.0  ;;  %726 = vst.msk [vmem:[%s1296_s15 + $0xf8] sm:$0xff] %vm694_vm2, %v691_v3  ;;  %v829_v36 = vmul.f32 %v691_v3, %v691_v3 }
 0x117   : > { %724 = vst.msk [vmem:[%s1296_s15 + $0xe8] sm:$0xff] %vm694_vm2, %v683_v29  ;;  %v774_v50 = vsel %vm694_vm2, %v664_v63, 0.0  ;;  %v873_v2 = vsel %vm694_vm2, %v820_v37, 0.0  ;;  %v875_v53 = vsel %vm694_vm2, %v821_v42, 0.0  ;;  %v877_v54 = vsel %vm694_vm2, %v822_v46, 0.0 }
 0x118   : > { %v765_v24 = vadd.f32 %v764_v20, %v763_v15  ;;  %v866_v28 = vadd.f32 %v865_v23, %v864_v21  ;;  %v891_v41 = vsel %vm694_vm2, %v829_v36, 0.0  ;;  %v823_v55 = vmul.f32 %v667_v7, %v667_v7 }
 0x119   : > { %v776_v57 = vsel %vm694_vm2, %v667_v7, 0.0  ;;  %v824_v58 = vmul.f32 %v1414_v49, %v1414_v49  ;;  %v778_v59 = vsel %vm694_vm2, %v1414_v49, 0.0  ;;  %v825_v61 = vmul.f32 %v1439_v5, %v1439_v5 }
 0x11a   : > { %v767_v30 = vadd.f32 %v766_v22, %v765_v24  ;;  %v868_v34 = vadd.f32 %v867_v27, %v866_v28  ;;  %v879_v63 = vsel %vm694_vm2, %v823_v55, 0.0  ;;  %v826_v0 = vmul.f32 %v680_v26, %v680_v26 }
 0x11b   : > { %v780_v1 = vsel %vm694_vm2, %v1439_v5, 0.0  ;;  %v782_v7 = vsel %vm694_vm2, %v680_v26, 0.0  ;;  %v881_v8 = vsel %vm694_vm2, %v824_v58, 0.0  ;;  %v883_v49 = vsel %vm694_vm2, %v825_v61, 0.0 }
 0x11c   : > { %v769_v38 = vadd.f32 %v768_v35, %v767_v30  ;;  %v870_v40 = vadd.f32 %v869_v31, %v868_v34  ;;  %v885_v13 = vsel %vm694_vm2, %v826_v0, 0.0  ;;  %v827_v14 = vmul.f32 %v683_v29, %v683_v29 }
 0x11d   : > { %v784_v16 = vsel %vm694_vm2, %v683_v29, 0.0  ;;  %v786_v5 = vsel %vm694_vm2, %v1447_v11, 0.0  ;;  %v788_v21 = vsel %vm694_vm2, %v691_v3, 0.0 }
 0x11e   : > { %v771_v43 = vadd.f32 %v770_v39, %v769_v38  ;;  %v872_v48 = vadd.f32 %v871_v44, %v870_v40  ;;  %v887_v20 = vsel %vm694_vm2, %v827_v14, 0.0 }
 0x120   : > { %v773_v52 = vadd.f32 %v772_v47, %v771_v43  ;;  %v874_v12 = vadd.f32 %v873_v2, %v872_v48 }
 0x122   : > { %v775_v51 = vadd.f32 %v774_v50, %v773_v52  ;;  %v876_v56 = vadd.f32 %v875_v53, %v874_v12 }
 0x124   : > { %v777_v45 = vadd.f32 %v776_v57, %v775_v51  ;;  %v878_v60 = vadd.f32 %v877_v54, %v876_v56 }
 0x126   : > { %v779_v62 = vadd.f32 %v778_v59, %v777_v45  ;;  %v880_v4 = vadd.f32 %v879_v63, %v878_v60 }
 0x128   : > { %v781_v9 = vadd.f32 %v780_v1, %v779_v62  ;;  %v882_v10 = vadd.f32 %v881_v8, %v880_v4 }
 0x12a   : > { %v783_v6 = vadd.f32 %v782_v7, %v781_v9  ;;  %v884_v15 = vadd.f32 %v883_v49, %v882_v10 }
 0x12c   : > { %v785_v17 = vadd.f32 %v784_v16, %v783_v6  ;;  %v886_v18 = vadd.f32 %v885_v13, %v884_v15 }
 0x12e   : > { %v787_v19 = vadd.f32 %v786_v5, %v785_v17  ;;  %v888_v22 = vadd.f32 %v887_v20, %v886_v18 }
 0x130   : > { %v789_v23 = vadd.f32 %v788_v21, %v787_v19  ;;  %v890_v24 = vadd.f32 %v889_v33, %v888_v22 }
 0x132   : > { %v790_v25 = vrot.slane %v789_v23, 4  ;;  %v892_v26 = vadd.f32 %v891_v41, %v890_v24 }
 0x134   : > { %v791_v27 = vadd.f32 %v790_v25, %v789_v23  ;;  %v893_v28 = vrot.slane %v892_v26, 4 }
 0x136   : > { %v792_v29 = vrot.slane %v791_v27, 2  ;;  %v894_v30 = vadd.f32 %v893_v28, %v892_v26 }
 0x138   : > { %v793_v31 = vadd.f32 %v792_v29, %v791_v27  ;;  %v895_v11 = vrot.slane %v894_v30, 2 }
 0x13a   : > { %v794_v32 = vrot.slane %v793_v31, 1  ;;  %v896_v3 = vadd.f32 %v895_v11, %v894_v30 }
 0x13c   : > { %v795_v34 = vadd.f32 %v794_v32, %v793_v31  ;;  %v897_v35 = vrot.slane %v896_v3, 1 }
 0x13e   : > { %797 = vst.msk [vmem:[%s287_s19] sm:$0x1] %vm796_vm3, %v795_v34  ;;  %v898_v33 = vadd.f32 %v897_v35, %v896_v3 }
 0x140   : > { %899 = vst.msk [vmem:[%s287_s19 + $0x1] sm:$0x1] %vm796_vm3, %v898_v33 }
 0x141 PF: > { %s17_s21 = sadd.s32 1, %s1100_s21  }
 0x142   : > { %p14_p5 = scmp.ge.s32.totalorder %s17_s21, 4  }
 0x144   :  { %16 = sbr.rel (!%p14_p5) target bundleno = 1 (0x1), region = 85 }

// kernel: bottleneck_forward.7
= control target key start
LH: loop header
LB: loop body
LE: loop exit
PB: predicated region body
PF: predicated region fallthrough
CT: control target
= control target key end

     0   :  { %s454_s12 = smov 0   ;;  %s645_s0 = inlined_call_operand.vmem [shape: f32[512,8], index: 0, kind: input, shape index: {}]   ;;  %s646_s1 = inlined_call_operand.vmem [shape: f32[1,8], index: 1, kind: input, shape index: {}]   ;;  %s647_s2 = inlined_call_operand.vmem [shape: f32[1,8], index: 2, kind: input, shape index: {}]   ;;  %s648_s3 = inlined_call_operand.vmem [shape: f32[512,8], index: 3, kind: output, shape index: {}]  }
   0x1 LB: > { %s405_s13 = sadd.s32 4294967295, %s432_s12   ;;  %p409_p0 = scmp.ge.s32.totalorder %s432_s12, 1  ;;  %s432_s12 = sphi %s454_s12, %s13_s12  }
   0x2   : > { %p138_p1 = scmp.lt.s32.totalorder %s432_s12, 3 }
   0x4   : > { %p139_p2 = pnand %p409_p0, %p138_p1 }
   0x5   : > { %s410_s14 = sshll.u32 (!%p139_p2), %s405_s13, 5  ;;  %v465_v0 = vld [vmem:[%s646_s1] ss:$0 sm:$0xff] (!%p139_p2)  ;;  %vm316_vm0 = vcmask (!%p139_p2), 64512  }
   0x6   : > { %142 = sbr.rel (%p139_p2) target bundleno = 46 (0x2e), region = 32  ;;  %p163_p3 = scmp.lt.s32.totalorder (!%p139_p2), %s410_s14, 63  ;;  %v475_v1 = vld [vmem:[%s647_s2] ss:$0 sm:$0xff] (!%p139_p2) }
   0xd   : > { %s650_s14 = smov (!%p163_p3, %s410_s14), 63 }
   0xe   : > { %s411_s15 = sshll.u32 %s650_s14, 3 }
   0xf   : > { %s470_s20 = scalar_lea.vmem %s645_s0, %s411_s15  ;;  %s498_s25 = scalar_lea.vmem %s648_s3, %s411_s15 }
  0x10   : > { %v174_v2 = vld [vmem:[%s470_s20] sm:$0xff]  ;;  %v175_v3 = vld [vmem:[%s470_s20 + $0x8] sm:$0xff]  ;;  %v176_v4 = vld [vmem:[%s470_s20 + $0x10] sm:$0xff] }
  0x11   : > { %v213_v5 = vmul.f32 %v465_v0, %v174_v2  ;;  %v214_v6 = vmul.f32 %v465_v0, %v175_v3  ;;  %v215_v7 = vmul.f32 %v465_v0, %v176_v4  ;;  %v177_v8 = vld [vmem:[%s470_s20 + $0x18] sm:$0xff]  ;;  %v178_v9 = vld [vmem:[%s470_s20 + $0x20] sm:$0xff]  ;;  %v179_v10 = vld [vmem:[%s470_s20 + $0x28] sm:$0xff] }
  0x12   : > { %v216_v11 = vmul.f32 %v465_v0, %v177_v8  ;;  %v217_v12 = vmul.f32 %v465_v0, %v178_v9  ;;  %v218_v13 = vmul.f32 %v465_v0, %v179_v10  ;;  %v180_v14 = vld [vmem:[%s470_s20 + $0x30] sm:$0xff]  ;;  %v181_v15 = vld [vmem:[%s470_s20 + $0x38] sm:$0xff]  ;;  %v182_v24 = vld [vmem:[%s470_s20 + $0x40] sm:$0xff] }
  0x13   : > { %v252_v16 = vadd.f32 %v475_v1, %v213_v5  ;;  %v253_v17 = vadd.f32 %v475_v1, %v214_v6  ;;  %v254_v18 = vadd.f32 %v475_v1, %v215_v7  ;;  %v219_v19 = vmul.f32 %v465_v0, %v180_v14  ;;  %v183_v25 = vld [vmem:[%s470_s20 + $0x48] sm:$0xff]  ;;  %v184_v26 = vld [vmem:[%s470_s20 + $0x50] sm:$0xff]  ;;  %v185_v31 = vld [vmem:[%s470_s20 + $0x58] sm:$0xff] }
  0x14   : > { %v255_v20 = vadd.f32 %v475_v1, %v216_v11  ;;  %v256_v21 = vadd.f32 %v475_v1, %v217_v12  ;;  %v257_v22 = vadd.f32 %v475_v1, %v218_v13  ;;  %v220_v23 = vmul.f32 %v465_v0, %v181_v15  ;;  %v186_v32 = vld [vmem:[%s470_s20 + $0x60] sm:$0xff]  ;;  %v187_v33 = vld [vmem:[%s470_s20 + $0x68] sm:$0xff]  ;;  %v188_v38 = vld [vmem:[%s470_s20 + $0x70] sm:$0xff] }
  0x15   : > { %v284_v27 = vmax.f32 %v252_v16, 0.0  ;;  %v285_v28 = vmax.f32 %v253_v17, 0.0  ;;  %v286_v29 = vmax.f32 %v254_v18, 0.0  ;;  %v258_v30 = vadd.f32 %v475_v1, %v219_v19  ;;  %v189_v43 = vld [vmem:[%s470_s20 + $0x78] sm:$0xff]  ;;  %v190_v56 = vld [vmem:[%s470_s20 + $0x80] sm:$0xff]  ;;  %v191_v57 = vld [vmem:[%s470_s20 + $0x88] sm:$0xff] }
  0x16   : > { %v287_v34 = vmax.f32 %v255_v20, 0.0  ;;  %v288_v35 = vmax.f32 %v256_v21, 0.0  ;;  %v289_v36 = vmax.f32 %v257_v22, 0.0  ;;  %v259_v37 = vadd.f32 %v475_v1, %v220_v23  ;;  %v192_v58 = vld [vmem:[%s470_s20 + $0x90] sm:$0xff]  ;;  %v193_v63 = vld [vmem:[%s470_s20 + $0x98] sm:$0xff]  ;;  %v194_v2 = vld [vmem:[%s470_s20 + $0xa0] sm:$0xff] }
  0x17   : > { %317 = vst.msk [vmem:[%s498_s25] sm:$0xff] %vm316_vm0, %v284_v27  ;;  %318 = vst.msk [vmem:[%s498_s25 + $0x8] sm:$0xff] %vm316_vm0, %v285_v28  ;;  %v290_v39 = vmax.f32 %v258_v30, 0.0  ;;  %v221_v40 = vmul.f32 %v465_v0, %v182_v24  ;;  %v222_v41 = vmul.f32 %v465_v0, %v183_v25  ;;  %v223_v42 = vmul.f32 %v465_v0, %v184_v26  ;;  %v195_v3 = vld [vmem:[%s470_s20 + $0xa8] sm:$0xff]  ;;  %v196_v8 = vld [vmem:[%s470_s20 + $0xb0] sm:$0xff] }
  0x18   : > { %319 = vst.msk [vmem:[%s498_s25 + $0x10] sm:$0xff] %vm316_vm0, %v286_v29  ;;  %320 = vst.msk [vmem:[%s498_s25 + $0x18] sm:$0xff] %vm316_vm0, %v287_v34  ;;  %v291_v44 = vmax.f32 %v259_v37, 0.0  ;;  %v224_v45 = vmul.f32 %v465_v0, %v185_v31  ;;  %v225_v46 = vmul.f32 %v465_v0, %v186_v32  ;;  %v226_v47 = vmul.f32 %v465_v0, %v187_v33  ;;  %v197_v13 = vld [vmem:[%s470_s20 + $0xb8] sm:$0xff]  ;;  %v198_v26 = vld [vmem:[%s470_s20 + $0xc0] sm:$0xff] }
  0x19   : > { %321 = vst.msk [vmem:[%s498_s25 + $0x20] sm:$0xff] %vm316_vm0, %v288_v35  ;;  %322 = vst.msk [vmem:[%s498_s25 + $0x28] sm:$0xff] %vm316_vm0, %v289_v36  ;;  %v260_v48 = vadd.f32 %v475_v1, %v221_v40  ;;  %v261_v49 = vadd.f32 %v475_v1, %v222_v41  ;;  %v262_v50 = vadd.f32 %v475_v1, %v223_v42  ;;  %v199_v27 = vld [vmem:[%s470_s20 + $0xc8] sm:$0xff]  ;;  %v200_v28 = vld [vmem:[%s470_s20 + $0xd0] sm:$0xff] }
  0x1a   : > { %323 = vst.msk [vmem:[%s498_s25 + $0x30] sm:$0xff] %vm316_vm0, %v290_v39  ;;  %v227_v51 = vmul.f32 %v465_v0, %v188_v38  ;;  %324 = vst.msk [vmem:[%s498_s25 + $0x38] sm:$0xff] %vm316_vm0, %v291_v44  ;;  %v263_v52 = vadd.f32 %v475_v1, %v224_v45  ;;  %v264_v53 = vadd.f32 %v475_v1, %v225_v46  ;;  %v201_v33 = vld [vmem:[%s470_s20 + $0xd8] sm:$0xff]  ;;  %v202_v34 = vld [vmem:[%s470_s20 + $0xe0] sm:$0xff] }
  0x1b   : > { %v265_v54 = vadd.f32 %v475_v1, %v226_v47  ;;  %v228_v55 = vmul.f32 %v465_v0, %v189_v43  ;;  %v292_v59 = vmax.f32 %v260_v48, 0.0  ;;  %v293_v60 = vmax.f32 %v261_v49, 0.0  ;;  %v203_v35 = vld [vmem:[%s470_s20 + $0xe8] sm:$0xff]  ;;  %v204_v40 = vld [vmem:[%s470_s20 + $0xf0] sm:$0xff]  ;;  %v205_v45 = vld [vmem:[%s470_s20 + $0xf8] sm:$0xff] }
  0x1c   : > { %v294_v61 = vmax.f32 %v262_v50, 0.0  ;;  %v266_v62 = vadd.f32 %v475_v1, %v227_v51  ;;  %v295_v4 = vmax.f32 %v263_v52, 0.0  ;;  %v296_v5 = vmax.f32 %v264_v53, 0.0 }
  0x1d   : > { %v297_v6 = vmax.f32 %v265_v54, 0.0  ;;  %v267_v7 = vadd.f32 %v475_v1, %v228_v55  ;;  %325 = vst.msk [vmem:[%s498_s25 + $0x40] sm:$0xff] %vm316_vm0, %v292_v59  ;;  %326 = vst.msk [vmem:[%s498_s25 + $0x48] sm:$0xff] %vm316_vm0, %v293_v60  ;;  %v229_v10 = vmul.f32 %v465_v0, %v190_v56  ;;  %v230_v11 = vmul.f32 %v465_v0, %v191_v57 }
  0x1e   : > { %327 = vst.msk [vmem:[%s498_s25 + $0x50] sm:$0xff] %vm316_vm0, %v294_v61  ;;  %v298_v9 = vmax.f32 %v266_v62, 0.0  ;;  %v231_v12 = vmul.f32 %v465_v0, %v192_v58  ;;  %328 = vst.msk [vmem:[%s498_s25 + $0x58] sm:$0xff] %vm316_vm0, %v295_v4  ;;  %v232_v15 = vmul.f32 %v465_v0, %v193_v63  ;;  %v233_v16 = vmul.f32 %v465_v0, %v194_v2 }
  0x1f   : > { %329 = vst.msk [vmem:[%s498_s25 + $0x60] sm:$0xff] %vm316_vm0, %v296_v5  ;;  %330 = vst.msk [vmem:[%s498_s25 + $0x68] sm:$0xff] %vm316_vm0, %v297_v6  ;;  %v299_v14 = vmax.f32 %v267_v7, 0.0  ;;  %v234_v17 = vmul.f32 %v465_v0, %v195_v3  ;;  %v268_v18 = vadd.f32 %v475_v1, %v229_v10  ;;  %v269_v19 = vadd.f32 %v475_v1, %v230_v11 }
  0x20   : > { %331 = vst.msk [vmem:[%s498_s25 + $0x70] sm:$0xff] %vm316_vm0, %v298_v9  ;;  %v270_v20 = vadd.f32 %v475_v1, %v231_v12  ;;  %v235_v21 = vmul.f32 %v465_v0, %v196_v8  ;;  %v271_v22 = vadd.f32 %v475_v1, %v232_v15  ;;  %v272_v23 = vadd.f32 %v475_v1, %v233_v16 }
  0x21   : > { %332 = vst.msk [vmem:[%s498_s25 + $0x78] sm:$0xff] %vm316_vm0, %v299_v14  ;;  %v273_v24 = vadd.f32 %v475_v1, %v234_v17  ;;  %v236_v25 = vmul.f32 %v465_v0, %v197_v13  ;;  %v300_v29 = vmax.f32 %v268_v18, 0.0  ;;  %v301_v30 = vmax.f32 %v269_v19, 0.0 }
  0x22   : > { %v302_v31 = vmax.f32 %v270_v20, 0.0  ;;  %v274_v32 = vadd.f32 %v475_v1, %v235_v21  ;;  %v303_v36 = vmax.f32 %v271_v22, 0.0  ;;  %v304_v37 = vmax.f32 %v272_v23, 0.0 }
  0x23   : > { %v305_v38 = vmax.f32 %v273_v24, 0.0  ;;  %v275_v39 = vadd.f32 %v475_v1, %v236_v25  ;;  %333 = vst.msk [vmem:[%s498_s25 + $0x80] sm:$0xff] %vm316_vm0, %v300_v29  ;;  %334 = vst.msk [vmem:[%s498_s25 + $0x88] sm:$0xff] %vm316_vm0, %v301_v30  ;;  %v237_v42 = vmul.f32 %v465_v0, %v198_v26  ;;  %v238_v43 = vmul.f32 %v465_v0, %v199_v27 }
  0x24   : > { %335 = vst.msk [vmem:[%s498_s25 + $0x90] sm:$0xff] %vm316_vm0, %v302_v31  ;;  %v306_v41 = vmax.f32 %v274_v32, 0.0  ;;  %v239_v44 = vmul.f32 %v465_v0, %v200_v28  ;;  %336 = vst.msk [vmem:[%s498_s25 + $0x98] sm:$0xff] %vm316_vm0, %v303_v36  ;;  %v240_v47 = vmul.f32 %v465_v0, %v201_v33  ;;  %v241_v48 = vmul.f32 %v465_v0, %v202_v34 }
  0x25   : > { %337 = vst.msk [vmem:[%s498_s25 + $0xa0] sm:$0xff] %vm316_vm0, %v304_v37  ;;  %338 = vst.msk [vmem:[%s498_s25 + $0xa8] sm:$0xff] %vm316_vm0, %v305_v38  ;;  %v307_v46 = vmax.f32 %v275_v39, 0.0  ;;  %v242_v49 = vmul.f32 %v465_v0, %v203_v35  ;;  %v276_v50 = vadd.f32 %v475_v1, %v237_v42  ;;  %v277_v51 = vadd.f32 %v475_v1, %v238_v43 }
  0x26   : > { %339 = vst.msk [vmem:[%s498_s25 + $0xb0] sm:$0xff] %vm316_vm0, %v306_v41  ;;  %v278_v52 = vadd.f32 %v475_v1, %v239_v44  ;;  %v243_v53 = vmul.f32 %v465_v0, %v204_v40  ;;  %v279_v54 = vadd.f32 %v475_v1, %v240_v47  ;;  %v280_v55 = vadd.f32 %v475_v1, %v241_v48 }
  0x27   : > { %340 = vst.msk [vmem:[%s498_s25 + $0xb8] sm:$0xff] %vm316_vm0, %v307_v46  ;;  %v281_v56 = vadd.f32 %v475_v1, %v242_v49  ;;  %v244_v57 = vmul.f32 %v465_v0, %v205_v45  ;;  %v308_v58 = vmax.f32 %v276_v50, 0.0  ;;  %v309_v59 = vmax.f32 %v277_v51, 0.0 }
  0x28   : > { %v310_v60 = vmax.f32 %v278_v52, 0.0  ;;  %v282_v61 = vadd.f32 %v475_v1, %v243_v53  ;;  %v311_v62 = vmax.f32 %v279_v54, 0.0  ;;  %v312_v63 = vmax.f32 %v280_v55, 0.0 }
  0x29   : > { %v313_v2 = vmax.f32 %v281_v56, 0.0  ;;  %v283_v3 = vadd.f32 %v475_v1, %v244_v57  ;;  %341 = vst.msk [vmem:[%s498_s25 + $0xc0] sm:$0xff] %vm316_vm0, %v308_v58  ;;  %342 = vst.msk [vmem:[%s498_s25 + $0xc8] sm:$0xff] %vm316_vm0, %v309_v59 }
  0x2a   : > { %343 = vst.msk [vmem:[%s498_s25 + $0xd0] sm:$0xff] %vm316_vm0, %v310_v60  ;;  %v314_v4 = vmax.f32 %v282_v61, 0.0  ;;  %344 = vst.msk [vmem:[%s498_s25 + $0xd8] sm:$0xff] %vm316_vm0, %v311_v62 }
  0x2b   : > { %345 = vst.msk [vmem:[%s498_s25 + $0xe0] sm:$0xff] %vm316_vm0, %v312_v63  ;;  %346 = vst.msk [vmem:[%s498_s25 + $0xe8] sm:$0xff] %vm316_vm0, %v313_v2  ;;  %v315_v0 = vmax.f32 %v283_v3, 0.0 }
  0x2c   : > { %347 = vst.msk [vmem:[%s498_s25 + $0xf0] sm:$0xff] %vm316_vm0, %v314_v4 }
  0x2d   : > { %348 = vst.msk [vmem:[%s498_s25 + $0xf8] sm:$0xff] %vm316_vm0, %v315_v0 }
  0x2e PF: > { %s13_s12 = sadd.s32 1, %s432_s12  }
  0x2f   : > { %p10_p4 = scmp.ge.s32.totalorder %s13_s12, 4  }
  0x31   :  { %12 = sbr.rel (!%p10_p4) target bundleno = 1 (0x1), region = 62 }

// kernel: bottleneck_forward.5
= control target key start
LH: loop header
LB: loop body
LE: loop exit
PB: predicated region body
PF: predicated region fallthrough
CT: control target
= control target key end

     0   :  { %s5850_s21 = smov 0   ;;  %s8102_s0 = inlined_call_operand.vmem [shape: f32[2,256,4], index: 0, kind: input, shape index: {}]   ;;  %s8103_s1 = inlined_call_operand.vmem [shape: bf16[9,4,4], index: 1, kind: input, shape index: {}]   ;;  %s8104_s2 = inlined_call_operand.vmem [shape: f32[9,256,1], index: 2, kind: input, shape index: {}]   ;;  %s8105_s3 = inlined_call_operand.vmem [shape: f32[1,4], index: 3, kind: input, shape index: {}]   ;;  %s8106_s4 = inlined_call_operand.vmem [shape: f32[1,4], index: 4, kind: input, shape index: {}]   ;;  %s8107_s5 = inlined_call_operand.vmem [shape: f32[2,256,4], index: 5, kind: output, shape index: {0}]   ;;  %s8108_s6 = inlined_call_operand.vmem [shape: f32[2,2,4], index: 6, kind: output, shape index: {1}]  }
   0x1 LB: > { %s4908_s22 = sadd.s32 4294967295, %s5812_s21   ;;  %p4912_p0 = scmp.ge.s32.totalorder %s5812_s21, 1  ;;  %s5812_s21 = sphi %s5850_s21, %s17_s21  }
   0x2   : > { %p215_p1 = scmp.lt.s32.totalorder %s5812_s21, 3 }
   0x4   : > { %p216_p2 = pnand %p4912_p0, %p215_p1 }
   0x6   : > { %219 = sbr.rel (%p216_p2) target bundleno = 895 (0x37f), region = 40 }
   0xd   : > { %v417_v0 = vld [vmem:[%s8104_s2 + $0x10] sm:$0xff]  ;;  %v415_v1 = vld [vmem:[%s8104_s2] sm:$0xff]  ;;  %v5814_v2 = vmov 0   ;;  %v418_v3 = vld [vmem:[%s8104_s2 + $0x18] sm:$0xff]  ;;  %vm1203_vm0 = vcmask 1041408   ;;  %p249_p3 = scmp.lt.s32.totalorder %s4908_s22, 1 }
   0xe   : > { %5805 = vset.pattern.permute.xlu1 %v5814_v2  ;;  %5804 = vset.pattern.permute.xlu0 %v5814_v2  ;;  %v416_v4 = vld [vmem:[%s8104_s2 + $0x8] sm:$0xff]  ;;  %v419_v6 = vld [vmem:[%s8104_s2 + $0x20] sm:$0xff]  ;;  %v422_v7 = vld [vmem:[%s8104_s2 + $0x38] sm:$0xff]  ;;  %vm1154_vm2 = vcmask 31744   ;;  %vm4718_vm4 = vcmask 24576  }
   0xf   : > { %750 = vperm.xlu1 %5805, %v417_v0   ;;  %740 = vperm.xlu0 %5804, %v415_v1   ;;  %v420_v5 = vld [vmem:[%s8104_s2 + $0x28] sm:$0xff]  ;;  %v421_v8 = vld [vmem:[%s8104_s2 + $0x30] sm:$0xff]  ;;  %v423_v10 = vld [vmem:[%s8104_s2 + $0x40] sm:$0xff]  ;;  %s8482_s22 = smov (!%p249_p3, %s4908_s22), 1 }
  0x10   : > { %v424_v9 = vld [vmem:[%s8104_s2 + $0x48] sm:$0xff]  ;;  %v426_v11 = vld [vmem:[%s8104_s2 + $0x58] sm:$0xff]  ;;  %v425_v12 = vld [vmem:[%s8104_s2 + $0x50] sm:$0xff]  ;;  %s5066_s23 = sshll.u32 %s8482_s22, 8 }
  0x11   : > { %v428_v13 = vld [vmem:[%s8104_s2 + $0x68] sm:$0xff]  ;;  %v427_v14 = vld [vmem:[%s8104_s2 + $0x60] sm:$0xff]  ;;  %v430_v15 = vld [vmem:[%s8104_s2 + $0x78] sm:$0xff]  ;;  %s6184_s26 = scalar_lea.vmem %s8102_s0, %s5066_s23  ;;  %s7949_s9 = scalar_lea.vmem %s8107_s5, %s5066_s23 }
  0x12   : > { %v429_v16 = vld [vmem:[%s8104_s2 + $0x70] sm:$0xff]  ;;  %v432_v17 = vld [vmem:[%s8104_s2 + $0x88] sm:$0xff]  ;;  %v431_v18 = vld [vmem:[%s8104_s2 + $0x80] sm:$0xff]  ;;  %s4917_s23 = sshll.u32 %s8482_s22, 1 }
  0x13   : > { %755 = vperm.xlu1 %5805, %v418_v3   ;;  %745 = vperm.xlu0 %5804, %v416_v4   ;;  %v434_v19 = vld [vmem:[%s8104_s2 + $0x98] sm:$0xff]  ;;  %v433_v20 = vld [vmem:[%s8104_s2 + $0x90] sm:$0xff]  ;;  %v436_v21 = vld [vmem:[%s8104_s2 + $0xa8] sm:$0xff]  ;;  %s262_s12 = scalar_lea.vmem %s8108_s6, %s4917_s23 }
  0x14   : > { %v435_v22 = vld [vmem:[%s8104_s2 + $0xa0] sm:$0xff]  ;;  %v438_v23 = vld [vmem:[%s8104_s2 + $0xb8] sm:$0xff]  ;;  %v437_v24 = vld [vmem:[%s8104_s2 + $0xb0] sm:$0xff] }
  0x15   : > { %v440_v25 = vld [vmem:[%s8104_s2 + $0xc8] sm:$0xff]  ;;  %v439_v26 = vld [vmem:[%s8104_s2 + $0xc0] sm:$0xff]  ;;  %v442_v27 = vld [vmem:[%s8104_s2 + $0xd8] sm:$0xff] }
  0x16   : > { %v441_v28 = vld [vmem:[%s8104_s2 + $0xd0] sm:$0xff]  ;;  %v444_v29 = vld [vmem:[%s8104_s2 + $0xe8] sm:$0xff]  ;;  %v443_v30 = vld [vmem:[%s8104_s2 + $0xe0] sm:$0xff] }
  0x17   : > { %765 = vperm.xlu1 %5805, %v420_v5   ;;  %760 = vperm.xlu0 %5804, %v419_v6   ;;  %v446_v31 = vld [vmem:[%s8104_s2 + $0xf8] sm:$0xff]  ;;  %v445_v32 = vld [vmem:[%s8104_s2 + $0xf0] sm:$0xff]  ;;  %v448_v33 = vld [vmem:[%s8104_s2 + $0x108] sm:$0xff] }
  0x18   : > { %v447_v34 = vld [vmem:[%s8104_s2 + $0x100] sm:$0xff]  ;;  %v450_v35 = vld [vmem:[%s8104_s2 + $0x118] sm:$0xff]  ;;  %v449_v36 = vld [vmem:[%s8104_s2 + $0x110] sm:$0xff] }
  0x19   : > { %v407_v37 = vld [vmem:[%s8103_s1 + $0x2] sm:$0x3]  ;;  %v452_v38 = vld [vmem:[%s8104_s2 + $0x128] sm:$0xff]  ;;  %v454_v41 = vld [vmem:[%s8104_s2 + $0x138] sm:$0xff] }
  0x1a   : > { %v451_v39 = vld [vmem:[%s8104_s2 + $0x120] sm:$0xff]  ;;  %5785 = vmatprep.subr.msk.bf16.mxu1 %vm1203_vm0, %v407_v37  ;;  %v1205_v40 = vsel %vm1203_vm0, %v407_v37, 0  ;;  %v453_v42 = vld [vmem:[%s8104_s2 + $0x130] sm:$0xff]  ;;  %v456_v43 = vld [vmem:[%s8104_s2 + $0x148] sm:$0xff] }
  0x1b   : > { %775 = vperm.xlu1 %5805, %v422_v7   ;;  %770 = vperm.xlu0 %5804, %v421_v8   ;;  %v455_v44 = vld [vmem:[%s8104_s2 + $0x140] sm:$0xff]  ;;  %v458_v45 = vld [vmem:[%s8104_s2 + $0x158] sm:$0xff]  ;;  %v457_v46 = vld [vmem:[%s8104_s2 + $0x150] sm:$0xff] }
  0x1c   : > { %5222 = vmatpush3.bf16.msra.mxu1 %v1205_v40  ;;  %v460_v47 = vld [vmem:[%s8104_s2 + $0x168] sm:$0xff]  ;;  %v459_v48 = vld [vmem:[%s8104_s2 + $0x160] sm:$0xff]  ;;  %v462_v49 = vld [vmem:[%s8104_s2 + $0x178] sm:$0xff] }
  0x1d   : > { %v461_v50 = vld [vmem:[%s8104_s2 + $0x170] sm:$0xff]  ;;  %v464_v51 = vld [vmem:[%s8104_s2 + $0x188] sm:$0xff]  ;;  %v463_v52 = vld [vmem:[%s8104_s2 + $0x180] sm:$0xff] }
  0x1e   : > { %v466_v53 = vld [vmem:[%s8104_s2 + $0x198] sm:$0xff]  ;;  %v465_v54 = vld [vmem:[%s8104_s2 + $0x190] sm:$0xff]  ;;  %v468_v55 = vld [vmem:[%s8104_s2 + $0x1a8] sm:$0xff] }
  0x1f   : > { %785 = vperm.xlu1 %5805, %v424_v9   ;;  %780 = vperm.xlu0 %5804, %v423_v10   ;;  %v467_v56 = vld [vmem:[%s8104_s2 + $0x1a0] sm:$0xff]  ;;  %v470_v57 = vld [vmem:[%s8104_s2 + $0x1b8] sm:$0xff]  ;;  %v469_v58 = vld [vmem:[%s8104_s2 + $0x1b0] sm:$0xff] }
  0x20   : > { %v472_v59 = vld [vmem:[%s8104_s2 + $0x1c8] sm:$0xff]  ;;  %v471_v60 = vld [vmem:[%s8104_s2 + $0x1c0] sm:$0xff]  ;;  %v474_v61 = vld [vmem:[%s8104_s2 + $0x1d8] sm:$0xff] }
  0x21   : > { %v473_v62 = vld [vmem:[%s8104_s2 + $0x1d0] sm:$0xff]  ;;  %v476_v63 = vld [vmem:[%s8104_s2 + $0x1e8] sm:$0xff]  ;;  %v475_v0 = vld [vmem:[%s8104_s2 + $0x1e0] sm:$0xff] }
  0x22   : > { %v478_v1 = vld [vmem:[%s8104_s2 + $0x1f8] sm:$0xff]  ;;  %v477_v2 = vld [vmem:[%s8104_s2 + $0x1f0] sm:$0xff]  ;;  %v480_v3 = vld [vmem:[%s8104_s2 + $0x208] sm:$0xff] }
  0x23   : > { %795 = vperm.xlu1 %5805, %v426_v11   ;;  %790 = vperm.xlu0 %5804, %v425_v12   ;;  %v479_v4 = vld [vmem:[%s8104_s2 + $0x200] sm:$0xff]  ;;  %v482_v7 = vld [vmem:[%s8104_s2 + $0x218] sm:$0xff]  ;;  %v481_v8 = vld [vmem:[%s8104_s2 + $0x210] sm:$0xff] }
  0x24   : > { %v6078_v11 = vld [vmem:[%s8103_s1] sm:$0x3]  ;;  %v484_v12 = vld [vmem:[%s8104_s2 + $0x228] sm:$0xff]  ;;  %v498_v40 = vld [vmem:[%s8104_s2 + $0x298] sm:$0xff] }
  0x25   : > { %5786 = vmatprep.subr.msk.bf16.mxu1 %vm1203_vm0, %v6078_v11  ;;  %v495_v37 = vld [vmem:[%s8104_s2 + $0x280] sm:$0xff] }
  0x27   : > { %805 = vperm.xlu1 %5805, %v428_v13   ;;  %800 = vperm.xlu0 %5804, %v427_v14   ;;  %v483_v13 = vld [vmem:[%s8104_s2 + $0x220] sm:$0xff] }
  0x2b   : > { %815 = vperm.xlu1 %5805, %v430_v15   ;;  %810 = vperm.xlu0 %5804, %v429_v16   ;;  %v486_v16 = vld [vmem:[%s8104_s2 + $0x238] sm:$0xff] }
  0x2f   : > { %825 = vperm.xlu1 %5805, %v432_v17   ;;  %820 = vperm.xlu0 %5804, %v431_v18   ;;  %v485_v17 = vld [vmem:[%s8104_s2 + $0x230] sm:$0xff] }
  0x33   : > { %835 = vperm.xlu1 %5805, %v434_v19   ;;  %830 = vperm.xlu0 %5804, %v433_v20   ;;  %v488_v20 = vld [vmem:[%s8104_s2 + $0x248] sm:$0xff] }
  0x37   : > { %845 = vperm.xlu1 %5805, %v436_v21   ;;  %840 = vperm.xlu0 %5804, %v435_v22   ;;  %v487_v21 = vld [vmem:[%s8104_s2 + $0x240] sm:$0xff] }
  0x3b   : > { %855 = vperm.xlu1 %5805, %v438_v23   ;;  %850 = vperm.xlu0 %5804, %v437_v24   ;;  %v490_v24 = vld [vmem:[%s8104_s2 + $0x258] sm:$0xff] }
  0x3f   : > { %865 = vperm.xlu1 %5805, %v440_v25   ;;  %860 = vperm.xlu0 %5804, %v439_v26   ;;  %v489_v25 = vld [vmem:[%s8104_s2 + $0x250] sm:$0xff] }
  0x43   : > { %875 = vperm.xlu1 %5805, %v442_v27   ;;  %870 = vperm.xlu0 %5804, %v441_v28   ;;  %v492_v28 = vld [vmem:[%s8104_s2 + $0x268] sm:$0xff] }
  0x47   : > { %885 = vperm.xlu1 %5805, %v444_v29   ;;  %880 = vperm.xlu0 %5804, %v443_v30   ;;  %v491_v29 = vld [vmem:[%s8104_s2 + $0x260] sm:$0xff] }
  0x4b   : > { %895 = vperm.xlu1 %5805, %v446_v31   ;;  %890 = vperm.xlu0 %5804, %v445_v32   ;;  %v494_v32 = vld [vmem:[%s8104_s2 + $0x278] sm:$0xff] }
  0x4f   : > { %953 = vperm.xlu1 %5805, %v448_v33   ;;  %948 = vperm.xlu0 %5804, %v447_v34   ;;  %v493_v33 = vld [vmem:[%s8104_s2 + $0x270] sm:$0xff] }
  0x53   : > { %963 = vperm.xlu1 %5805, %v450_v35   ;;  %958 = vperm.xlu0 %5804, %v449_v36   ;;  %v496_v36 = vld [vmem:[%s8104_s2 + $0x288] sm:$0xff] }
  0x57   : > { %973 = vperm.xlu1 %5805, %v452_v38   ;;  %968 = vperm.xlu0 %5804, %v451_v39  }
  0x5b   : > { %983 = vperm.xlu1 %5805, %v454_v41   ;;  %978 = vperm.xlu0 %5804, %v453_v42   ;;  %v497_v41 = vld [vmem:[%s8104_s2 + $0x290] sm:$0xff] }
  0x5f   : > { %993 = vperm.xlu1 %5805, %v456_v43   ;;  %988 = vperm.xlu0 %5804, %v455_v44   ;;  %v500_v44 = vld [vmem:[%s8104_s2 + $0x2a8] sm:$0xff] }
  0x63   : > { %1003 = vperm.xlu1 %5805, %v458_v45   ;;  %998 = vperm.xlu0 %5804, %v457_v46   ;;  %v499_v45 = vld [vmem:[%s8104_s2 + $0x2a0] sm:$0xff] }
  0x67   : > { %1013 = vperm.xlu1 %5805, %v460_v47   ;;  %1008 = vperm.xlu0 %5804, %v459_v48   ;;  %v502_v48 = vld [vmem:[%s8104_s2 + $0x2b8] sm:$0xff] }
  0x6b   : > { %1023 = vperm.xlu1 %5805, %v462_v49   ;;  %1018 = vperm.xlu0 %5804, %v461_v50   ;;  %v501_v49 = vld [vmem:[%s8104_s2 + $0x2b0] sm:$0xff] }
  0x6f   : > { %1033 = vperm.xlu1 %5805, %v464_v51   ;;  %1028 = vperm.xlu0 %5804, %v463_v52   ;;  %v6199_v52 = vld [vmem:[%s8105_s3] ss:$0 sm:$0xff] }
  0x73   : > { %1043 = vperm.xlu1 %5805, %v466_v53   ;;  %1038 = vperm.xlu0 %5804, %v465_v54   ;;  %v293_v53 = vld [vmem:[%s6184_s26 + $0xe8] sm:$0xff]  ;;  %v294_v54 = vld [vmem:[%s6184_s26 + $0xf0] sm:$0xff] }
  0x77   : > { %1053 = vperm.xlu1 %5805, %v468_v55   ;;  %1048 = vperm.xlu0 %5804, %v467_v56   ;;  %v504_v55 = vld [vmem:[%s8104_s2 + $0x2c8] sm:$0xff]  ;;  %v503_v56 = vld [vmem:[%s8104_s2 + $0x2c0] sm:$0xff] }
  0x7b   : > { %1063 = vperm.xlu1 %5805, %v470_v57   ;;  %1058 = vperm.xlu0 %5804, %v469_v58  }
  0x7f   : > { %1073 = vperm.xlu1 %5805, %v472_v59   ;;  %1068 = vperm.xlu0 %5804, %v471_v60   ;;  %v332_v59 = vmul.f32 %v6199_v52, %v293_v53  ;;  %v333_v60 = vmul.f32 %v6199_v52, %v294_v54 }
  0x83   : > { %1083 = vperm.xlu1 %5805, %v474_v61   ;;  %1078 = vperm.xlu0 %5804, %v473_v62   ;;  %v6218_v61 = vld [vmem:[%s8106_s4] ss:$0 sm:$0xff]  ;;  %v506_v62 = vld [vmem:[%s8104_s2 + $0x2d8] sm:$0xff] }
  0x87   : > { %1093 = vperm.xlu1 %5805, %v476_v63   ;;  %1088 = vperm.xlu0 %5804, %v475_v0   ;;  %v505_v63 = vld [vmem:[%s8104_s2 + $0x2d0] sm:$0xff]  ;;  %v295_v0 = vld [vmem:[%s6184_s26 + $0xf8] sm:$0xff] }
  0x8b   : > { %1103 = vperm.xlu1 %5805, %v478_v1   ;;  %1098 = vperm.xlu0 %5804, %v477_v2  }
  0x8e   : > { %v6061_v5 = vpop.permute.xlu1 %750  ;;  %v6063_v6 = vpop.permute.xlu0 %740 }
  0x8f   : > { %1652 = vperm.xlu1 %5805, %v480_v3   ;;  %1647 = vperm.xlu0 %5804, %v479_v4   ;;  %v371_v3 = vadd.f32 %v6218_v61, %v332_v59  ;;  %v372_v4 = vadd.f32 %v6218_v61, %v333_v60  ;;  %v511_v59 = vld [vmem:[%s8104_s2 + $0x300] sm:$0xff] }
  0x92   : > { %v6071_v9 = vpop.permute.xlu1 %755  ;;  %v6073_v10 = vpop.permute.xlu0 %745 }
  0x93   : > { %1662 = vperm.xlu1 %5805, %v482_v7   ;;  %1657 = vperm.xlu0 %5804, %v481_v8   ;;  %v703_v7 = vlaneseq  ;;  %v508_v8 = vld [vmem:[%s8104_s2 + $0x2e8] sm:$0xff] }
  0x96   : > { %v6088_v14 = vpop.permute.xlu1 %765  ;;  %v6090_v15 = vpop.permute.xlu0 %760 }
  0x97   : > { %1672 = vperm.xlu1 %5805, %v484_v12   ;;  %1667 = vperm.xlu0 %5804, %v483_v13   ;;  %v507_v12 = vld [vmem:[%s8104_s2 + $0x2e0] sm:$0xff] }
  0x98   : > { %v264_v13 = vld [vmem:[%s6184_s26] sm:$0xff] }
  0x9a   : > { %v6098_v18 = vpop.permute.xlu1 %775  ;;  %v6100_v19 = vpop.permute.xlu0 %770 }
  0x9b   : > { %1682 = vperm.xlu1 %5805, %v486_v16   ;;  %1677 = vperm.xlu0 %5804, %v485_v17   ;;  %v334_v16 = vmul.f32 %v6199_v52, %v295_v0  ;;  %v265_v17 = vld [vmem:[%s6184_s26 + $0x8] sm:$0xff]  ;;  %v268_v0 = vld [vmem:[%s6184_s26 + $0x20] sm:$0xff] }
  0x9e   : > { %v6108_v22 = vpop.permute.xlu1 %785  ;;  %v6110_v23 = vpop.permute.xlu0 %780 }
  0x9f   : > { %1692 = vperm.xlu1 %5805, %v488_v20   ;;  %1687 = vperm.xlu0 %5804, %v487_v21  }
  0xa2   : > { %v6118_v26 = vpop.permute.xlu1 %795  ;;  %v6120_v27 = vpop.permute.xlu0 %790 }
  0xa3   : > { %1702 = vperm.xlu1 %5805, %v490_v24   ;;  %1697 = vperm.xlu0 %5804, %v489_v25   ;;  %v6246_v24 = vmax.f32 %v371_v3, 0.0  ;;  %v6248_v25 = vmax.f32 %v372_v4, 0.0  ;;  %v269_v3 = vld [vmem:[%s6184_s26 + $0x28] sm:$0xff] }
  0xa5   : > { %8254 = vst [vmem:[#allocation14_spill] sm:$0xff] %v6248_v25 }
  0xa6   : > { %v6128_v30 = vpop.permute.xlu1 %805  ;;  %v6130_v31 = vpop.permute.xlu0 %800 }
  0xa7   : > { %1712 = vperm.xlu1 %5805, %v492_v28   ;;  %1707 = vperm.xlu0 %5804, %v491_v29   ;;  %v6250_v28 = vshrl.u32 %v703_v7, 7  ;;  %v303_v29 = vmul.f32 %v6199_v52, %v264_v13 }
  0xa9   : > { %vm1612_vm1 = vcmp.lt.s32.totalorder %v6250_v28, 7  ;;  %v342_v54 = vadd.f32 %v6218_v61, %v303_v29  ;;  %v308_v29 = vmul.f32 %v6199_v52, %v269_v3  ;;  %vm705_vm3 = vcmp.lt.s32.totalorder %v6250_v28, 1  ;;  %v617_v28 = vld [vmem:[%s8104_s2 + $0x750] sm:$0xff] }
  0xaa   : > { %v6138_v34 = vpop.permute.xlu1 %815  ;;  %v6140_v35 = vpop.permute.xlu0 %810 }
  0xab   : > { %1722 = vperm.xlu1 %5805, %v494_v32   ;;  %1717 = vperm.xlu0 %5804, %v493_v33   ;;  %v510_v32 = vld [vmem:[%s8104_s2 + $0x2f8] sm:$0xff]  ;;  %v509_v33 = vld [vmem:[%s8104_s2 + $0x2f0] sm:$0xff]  ;;  %v6294_v13 = vmax.f32 %v342_v54, 0.0 }
  0xac   : > { %v271_v54 = vld [vmem:[%s6184_s26 + $0x38] sm:$0xff] }
  0xad   : > { %8259 = vst [vmem:[#allocation19_spill] sm:$0xff] %v6294_v13 }
  0xae   : > { %v6150_v38 = vpop.permute.xlu1 %825  ;;  %v6152_v39 = vpop.permute.xlu0 %820 }
  0xaf   : > { %1732 = vperm.xlu1 %5805, %v496_v36   ;;  %1727 = vperm.xlu0 %5804, %v495_v37   ;;  %v373_v36 = vadd.f32 %v6218_v61, %v334_v16  ;;  %v304_v37 = vmul.f32 %v6199_v52, %v265_v17  ;;  %v307_v17 = vmul.f32 %v6199_v52, %v268_v0 }
  0xb1   : > { %v6286_v60 = vmax.f32 %v373_v36, 0.0  ;;  %v346_v3 = vadd.f32 %v6218_v61, %v307_v17  ;;  %v310_v17 = vmul.f32 %v6199_v52, %v271_v54 }
  0xb2   : > { %v6164_v42 = vpop.permute.xlu1 %835  ;;  %v6166_v43 = vpop.permute.xlu0 %830 }
  0xb3   : > { %8242 = vst [vmem:[#allocation2_spill] sm:$0xff] %v6164_v42  ;;  %8243 = vst [vmem:[#allocation3_spill] sm:$0xff] %v6166_v43  ;;  %1742 = vperm.xlu1 %5805, %v498_v40   ;;  %1737 = vperm.xlu0 %5804, %v497_v41   ;;  %v266_v40 = vld [vmem:[%s6184_s26 + $0x10] sm:$0xff]  ;;  %v8110_v41 = vrot.slane %v6248_v25, 1 }
  0xb4   : > { %8258 = vst [vmem:[#allocation18_spill] sm:$0xff] %v6286_v60 }
  0xb6   : > { %v6175_v46 = vpop.permute.xlu1 %845  ;;  %v6177_v47 = vpop.permute.xlu0 %840 }
  0xb7   : > { %8244 = vst [vmem:[#allocation4_spill] sm:$0xff] %v6175_v46  ;;  %8245 = vst [vmem:[#allocation5_spill] sm:$0xff] %v6177_v47  ;;  %1752 = vperm.xlu1 %5805, %v500_v44   ;;  %1747 = vperm.xlu0 %5804, %v499_v45   ;;  %v8109_v44 = vrot.slane %v6246_v24, 1  ;;  %v267_v45 = vld [vmem:[%s6184_s26 + $0x18] sm:$0xff] }
  0xb9   : > { %v6276_v53 = vsel %vm1612_vm1, %v8109_v44, %v8110_v41 }
  0xba   : > { %v6192_v50 = vpop.permute.xlu1 %855  ;;  %v6194_v51 = vpop.permute.xlu0 %850  ;;  %8257 = vst [vmem:[#allocation17_spill] sm:$0xff] %v6276_v53 }
  0xbb   : > { %8246 = vst [vmem:[#allocation6_spill] sm:$0xff] %v6192_v50  ;;  %8247 = vst [vmem:[#allocation7_spill] sm:$0xff] %v6194_v51  ;;  %1762 = vperm.xlu1 %5805, %v502_v48   ;;  %1757 = vperm.xlu0 %5804, %v501_v49   ;;  %v528_v51 = vld [vmem:[%s8104_s2 + $0x388] sm:$0xff] }
  0xbe   : > { %v6209_v57 = vpop.permute.xlu1 %865  ;;  %v6211_v58 = vpop.permute.xlu0 %860 }
  0xbf   : > { %8248 = vst [vmem:[#allocation8_spill] sm:$0xff] %v6209_v57  ;;  %8249 = vst [vmem:[#allocation9_spill] sm:$0xff] %v6211_v58  ;;  %1772 = vperm.xlu1 %5805, %v504_v55   ;;  %1767 = vperm.xlu0 %5804, %v503_v56   ;;  %v305_v55 = vmul.f32 %v6199_v52, %v266_v40  ;;  %v512_v56 = vld [vmem:[%s8104_s2 + $0x308] sm:$0xff]  ;;  %v270_v40 = vld [vmem:[%s6184_s26 + $0x30] sm:$0xff] }
  0xc1   : > { %v344_v16 = vadd.f32 %v6218_v61, %v305_v55 }
  0xc2   : > { %v6227_v1 = vpop.permute.xlu1 %875  ;;  %v6229_v2 = vpop.permute.xlu0 %870 }
  0xc3   : > { %8250 = vst [vmem:[#allocation10_spill] sm:$0xff] %v6227_v1  ;;  %8251 = vst [vmem:[#allocation11_spill] sm:$0xff] %v6229_v2  ;;  %1782 = vperm.xlu1 %5805, %v506_v62   ;;  %1777 = vperm.xlu0 %5804, %v505_v63   ;;  %v343_v62 = vadd.f32 %v6218_v61, %v304_v37  ;;  %v306_v63 = vmul.f32 %v6199_v52, %v267_v45 }
  0xc5   : > { %v6305_v36 = vmax.f32 %v343_v62, 0.0  ;;  %v345_v37 = vadd.f32 %v6218_v61, %v306_v63  ;;  %v347_v62 = vadd.f32 %v6218_v61, %v308_v29  ;;  %v309_v63 = vmul.f32 %v6199_v52, %v270_v40  ;;  %v272_v29 = vld [vmem:[%s6184_s26 + $0x40] sm:$0xff] }
  0xc6   : > { %v6242_v20 = vpop.permute.xlu1 %885  ;;  %v6244_v21 = vpop.permute.xlu0 %880 }
  0xc7   : > { %8252 = vst [vmem:[#allocation12_spill] sm:$0xff] %v6242_v20  ;;  %8253 = vst [vmem:[#allocation13_spill] sm:$0xff] %v6244_v21  ;;  %1792 = vperm.xlu1 %5805, %v508_v8   ;;  %1787 = vperm.xlu0 %5804, %v507_v12   ;;  %v6340_v54 = vmax.f32 %v347_v62, 0.0  ;;  %v274_v62 = vld [vmem:[%s6184_s26 + $0x50] sm:$0xff] }
  0xc8   : > { %8260 = vst [vmem:[#allocation20_spill] sm:$0xff] %v6305_v36 }
  0xc9   : > { %8264 = vst [vmem:[#allocation24_spill] sm:$0xff] %v6340_v54 }
  0xca   : > { %v6265_v48 = vpop.permute.xlu1 %895  ;;  %v6267_v49 = vpop.permute.xlu0 %890 }
  0xcb   : > { %8255 = vst [vmem:[#allocation15_spill] sm:$0xff] %v6265_v48  ;;  %8256 = vst [vmem:[#allocation16_spill] sm:$0xff] %v6267_v49  ;;  %1802 = vperm.xlu1 %5805, %v510_v32   ;;  %1797 = vperm.xlu0 %5804, %v509_v33   ;;  %v514_v32 = vld [vmem:[%s8104_s2 + $0x318] sm:$0xff]  ;;  %v513_v33 = vld [vmem:[%s8104_s2 + $0x310] sm:$0xff] }
  0xce   : > { %v954_v4 = vpop.permute.xlu1 %953  ;;  %v949_v7 = vpop.permute.xlu0 %948 }
  0xcf   : > { %v1107_v8 = vmul.f32 %v954_v4, %v6286_v60  ;;  %v1106_v12 = vmul.f32 %v949_v7, %v6248_v25  ;;  %2104 = vperm.xlu1 %5805, %v512_v56   ;;  %2099 = vperm.xlu0 %5804, %v511_v59   ;;  %v516_v4 = vld [vmem:[%s8104_s2 + $0x328] sm:$0xff]  ;;  %v515_v7 = vld [vmem:[%s8104_s2 + $0x320] sm:$0xff] }
  0xd1   : > { %v1138_v45 = vpack.c.bf16 %v1107_v8, %v1106_v12  ;;  %v6322_v8 = vmax.f32 %v344_v16, 0.0  ;;  %v6324_v12 = vmax.f32 %v345_v37, 0.0  ;;  %v6336_v16 = vld [vmem:[%s8103_s1 + $0x4] sm:$0x3]  ;;  %v6338_v37 = vmax.f32 %v346_v3, 0.0 }
  0xd2   : > { %v964_v55 = vpop.permute.xlu1 %963  ;;  %v959_v56 = vpop.permute.xlu0 %958 }
  0xd3   : > { %v1109_v59 = vmul.f32 %v964_v55, %v6305_v36  ;;  %v1108_v0 = vmul.f32 %v959_v56, %v6294_v13  ;;  %2114 = vperm.xlu1 %5805, %v514_v32   ;;  %2109 = vperm.xlu0 %5804, %v513_v33   ;;  %8261 = vst [vmem:[#allocation21_spill] sm:$0xff] %v6322_v8  ;;  %8262 = vst [vmem:[#allocation22_spill] sm:$0xff] %v6324_v12  ;;  %v273_v33 = vld [vmem:[%s6184_s26 + $0x48] sm:$0xff] }
  0xd4   : > { %5223 = vmatprep.mubr.msk.bf16.mxu1 %vm1154_vm2, %v1138_v45  ;;  %v1417_v45 = vsel %vm1203_vm0, %v6078_v11, 0  ;;  %8263 = vst [vmem:[#allocation23_spill] sm:$0xff] %v6338_v37  ;;  %v518_v11 = vld [vmem:[%s8104_s2 + $0x338] sm:$0xff]  ;;  %v312_v3 = vmul.f32 %v6199_v52, %v273_v33  ;;  %v2550_v20 = vpack.c.bf16 %v6324_v12, %v6322_v8 }
  0xd5   : > { %v1139_v32 = vpack.c.bf16 %v1109_v59, %v1108_v0  ;;  %v348_v59 = vadd.f32 %v6218_v61, %v309_v63  ;;  %v517_v0 = vld [vmem:[%s8104_s2 + $0x330] sm:$0xff] }
  0xd6   : > { %v974_v40 = vpop.permute.xlu1 %973  ;;  %v969_v55 = vpop.permute.xlu0 %968 }
  0xd7   : > { %v1111_v56 = vmul.f32 %v974_v40, %v6324_v12  ;;  %v1110_v44 = vmul.f32 %v969_v55, %v6322_v8  ;;  %2124 = vperm.xlu1 %5805, %v516_v4   ;;  %2119 = vperm.xlu0 %5804, %v515_v7   ;;  %v349_v4 = vadd.f32 %v6218_v61, %v310_v17  ;;  %v275_v40 = vld [vmem:[%s6184_s26 + $0x58] sm:$0xff]  ;;  %v6359_v17 = vmax.f32 %v348_v59, 0.0 }
  0xd8   : > { %5224 = vmatmul.mubr.msk.bf16.vlgmr.msra.gmra.mrb[0].mxu1 %vm1154_vm2, %v1139_v32  ;;  %v311_v7 = vmul.f32 %v6199_v52, %v272_v29  ;;  %v313_v29 = vmul.f32 %v6199_v52, %v274_v62  ;;  %v314_v33 = vmul.f32 %v6199_v52, %v275_v40 }
  0xd9   : > { %v1140_v63 = vpack.c.bf16 %v1111_v56, %v1110_v44  ;;  %5256 = vmatpush3.bf16.msra.mxu1 %v1417_v45  ;;  %8265 = vst [vmem:[#allocation25_spill] sm:$0xff] %v6359_v17  ;;  %v276_v44 = vld [vmem:[%s6184_s26 + $0x60] sm:$0xff]  ;;  %v520_v45 = vld [vmem:[%s8104_s2 + $0x348] sm:$0xff] }
  0xda   : > { %v984_v32 = vpop.permute.xlu1 %983  ;;  %v979_v55 = vpop.permute.xlu0 %978  ;;  %5787 = vmatprep.subr.msk.bf16.mxu1 %vm1203_vm0, %v6336_v16  ;;  %v519_v56 = vld [vmem:[%s8104_s2 + $0x340] sm:$0xff]  ;;  %v350_v59 = vadd.f32 %v6218_v61, %v311_v7  ;;  %v352_v7 = vadd.f32 %v6218_v61, %v313_v29 }
  0xdb   : > { %v1113_v41 = vmul.f32 %v984_v32, %v6340_v54  ;;  %v1112_v53 = vmul.f32 %v979_v55, %v6338_v37  ;;  %2134 = vperm.xlu1 %5805, %v518_v11   ;;  %2129 = vperm.xlu0 %5804, %v517_v0   ;;  %v6371_v32 = vmax.f32 %v349_v4, 0.0  ;;  %v351_v11 = vadd.f32 %v6218_v61, %v312_v3  ;;  %v277_v0 = vld [vmem:[%s6184_s26 + $0x68] sm:$0xff]  ;;  %v522_v3 = vld [vmem:[%s8104_s2 + $0x358] sm:$0xff] }
  0xdc   : > { %5227 = vmatprep.mubr.msk.bf16.mxu1 %vm1154_vm2, %v1140_v63  ;;  %v315_v63 = vmul.f32 %v6199_v52, %v276_v44  ;;  %v6382_v4 = vld [vmem:[%s8103_s1 + $0x8] sm:$0x3]  ;;  %v521_v44 = vld [vmem:[%s8104_s2 + $0x350] sm:$0xff] }
  0xdd   : > { %8266 = vst [vmem:[#allocation26_spill] sm:$0xff] %v6371_v32  ;;  %v1141_v62 = vpack.c.bf16 %v1113_v41, %v1112_v53  ;;  %8267 = vst [vmem:[#allocation27_spill] sm:$0xff] %v6382_v4  ;;  %v353_v41 = vadd.f32 %v6218_v61, %v314_v33  ;;  %v316_v53 = vmul.f32 %v6199_v52, %v277_v0  ;;  %5789 = vmatprep.subr.msk.bf16.mxu0 %vm1203_vm0, %v6382_v4  ;;  %v279_v0 = vld [vmem:[%s6184_s26 + $0x78] sm:$0xff] }
  0xde   : > { %v994_v40 = vpop.permute.xlu1 %993  ;;  %v989_v55 = vpop.permute.xlu0 %988  ;;  %v6398_v29 = vsel %vm1203_vm0, %v6382_v4, 0  ;;  %v6400_v33 = vmax.f32 %v350_v59, 0.0  ;;  %v354_v4 = vadd.f32 %v6218_v61, %v315_v63  ;;  %v524_v63 = vld [vmem:[%s8104_s2 + $0x368] sm:$0xff] }
  0xdf   : > { %v1115_v49 = vmul.f32 %v994_v40, %v6371_v32  ;;  %v1114_v48 = vmul.f32 %v989_v55, %v6359_v17  ;;  %2144 = vperm.xlu1 %5805, %v520_v45   ;;  %2139 = vperm.xlu0 %5804, %v519_v56   ;;  %8268 = vst [vmem:[#allocation28_spill] sm:$0xff] %v6398_v29  ;;  %v6402_v45 = vmax.f32 %v351_v11, 0.0  ;;  %v278_v56 = vld [vmem:[%s6184_s26 + $0x70] sm:$0xff] }
  0xe0   : > { %5228 = vmatmul.mubr.msk.bf16.gmra.mrb[4].mxu1 %vm1154_vm2, %v1141_v62  ;;  %8269 = vst [vmem:[#allocation29_spill] sm:$0xff] %v6400_v33  ;;  %5358 = vmatpush3.bf16.msra.mxu0 %v6398_v29  ;;  %v2549_v40 = vpack.c.bf16 %v6305_v36, %v6294_v13  ;;  %v318_v29 = vmul.f32 %v6199_v52, %v279_v0 }
  0xe1   : > { %8270 = vst [vmem:[#allocation30_spill] sm:$0xff] %v6402_v45  ;;  %v1142_v62 = vpack.c.bf16 %v1115_v49, %v1114_v48  ;;  %v355_v48 = vadd.f32 %v6218_v61, %v316_v53  ;;  %v317_v49 = vmul.f32 %v6199_v52, %v278_v56  ;;  %v281_v56 = vld [vmem:[%s6184_s26 + $0x88] sm:$0xff] }
  0xe2   : > { %v1004_v55 = vpop.permute.xlu1 %1003  ;;  %v999_v21 = vpop.permute.xlu0 %998  ;;  %5359 = vmatprep.mubr.msk.bf16.mxu0 %vm1154_vm2, %v2549_v40  ;;  %v6434_v40 = vmax.f32 %v354_v4, 0.0  ;;  %v320_v4 = vmul.f32 %v6199_v52, %v281_v56 }
  0xe3   : > { %v1117_v59 = vmul.f32 %v1004_v55, %v6402_v45  ;;  %v1116_v11 = vmul.f32 %v999_v21, %v6400_v33  ;;  %2154 = vperm.xlu1 %5805, %v522_v3   ;;  %2149 = vperm.xlu0 %5804, %v521_v44   ;;  %v523_v55 = vld [vmem:[%s8104_s2 + $0x360] sm:$0xff]  ;;  %v6425_v21 = vmax.f32 %v352_v7, 0.0  ;;  %v6427_v3 = vmax.f32 %v353_v41, 0.0 }
  0xe4   : > { %5231 = vmatprep.mubr.msk.bf16.mxu1 %vm1154_vm2, %v1142_v62  ;;  %5360 = vmatmul.mubr.msk.bf16.vlgmr.msra.gmra.mrb[0].mxu0 %vm1154_vm2, %v2550_v20  ;;  %v280_v44 = vld [vmem:[%s6184_s26 + $0x80] sm:$0xff]  ;;  %8273 = vst [vmem:[#allocation33_spill] sm:$0xff] %v6434_v40  ;;  %v6436_v7 = vmax.f32 %v355_v48, 0.0  ;;  %v356_v41 = vadd.f32 %v6218_v61, %v317_v49  ;;  %v357_v20 = vadd.f32 %v6218_v61, %v318_v29  ;;  %v282_v48 = vld [vmem:[%s6184_s26 + $0x90] sm:$0xff] }
  0xe5   : > { %8271 = vst [vmem:[#allocation31_spill] sm:$0xff] %v6425_v21  ;;  %8272 = vst [vmem:[#allocation32_spill] sm:$0xff] %v6427_v3  ;;  %v1143_v53 = vpack.c.bf16 %v1117_v59, %v1116_v11  ;;  %v526_v59 = vld [vmem:[%s8104_s2 + $0x378] sm:$0xff]  ;;  %v525_v11 = vld [vmem:[%s8104_s2 + $0x370] sm:$0xff]  ;;  %v2551_v29 = vpack.c.bf16 %v6340_v54, %v6338_v37  ;;  %v321_v56 = vmul.f32 %v6199_v52, %v282_v48 }
  0xe6   : > { %v1014_v0 = vpop.permute.xlu1 %1013  ;;  %v1009_v62 = vpop.permute.xlu0 %1008  ;;  %8274 = vst [vmem:[#allocation34_spill] sm:$0xff] %v6436_v7  ;;  %v285_v48 = vld [vmem:[%s6184_s26 + $0xa8] sm:$0xff] }
  0xe7   : > { %v1119_v2 = vmul.f32 %v1014_v0, %v6427_v3  ;;  %v1118_v1 = vmul.f32 %v1009_v62, %v6425_v21  ;;  %2164 = vperm.xlu1 %5805, %v524_v63   ;;  %2159 = vperm.xlu0 %5804, %v523_v55   ;;  %v319_v63 = vmul.f32 %v6199_v52, %v280_v44  ;;  %v283_v55 = vld [vmem:[%s6184_s26 + $0x98] sm:$0xff]  ;;  %v6457_v44 = vmax.f32 %v356_v41, 0.0 }
  0xe8   : > { %5232 = vmatmul.mubr.msk.bf16.gmra.mrb[8].mxu1 %vm1154_vm2, %v1143_v53  ;;  %v2552_v62 = vpack.c.bf16 %v6371_v32, %v6359_v17  ;;  %5363 = vmatprep.mubr.msk.bf16.mxu0 %vm1154_vm2, %v2551_v29 }
  0xe9   : > { %v1144_v49 = vpack.c.bf16 %v1119_v2, %v1118_v1  ;;  %8275 = vst [vmem:[#allocation35_spill] sm:$0xff] %v6457_v44  ;;  %v322_v1 = vmul.f32 %v6199_v52, %v283_v55  ;;  %v284_v2 = vld [vmem:[%s6184_s26 + $0xa0] sm:$0xff]  ;;  %v358_v41 = vadd.f32 %v6218_v61, %v319_v63 }
  0xea   : > { %v1024_v53 = vpop.permute.xlu1 %1023  ;;  %v1019_v0 = vpop.permute.xlu0 %1018  ;;  %v323_v50 = vmul.f32 %v6199_v52, %v284_v2  ;;  %v286_v2 = vld [vmem:[%s6184_s26 + $0xb0] sm:$0xff] }
  0xeb   : > { %v1121_v58 = vmul.f32 %v1024_v53, %v6436_v7  ;;  %v1120_v57 = vmul.f32 %v1019_v0, %v6434_v40  ;;  %2174 = vperm.xlu1 %5805, %v526_v59   ;;  %2169 = vperm.xlu0 %5804, %v525_v11   ;;  %v527_v53 = vld [vmem:[%s8104_s2 + $0x380] sm:$0xff]  ;;  %v6470_v59 = vmax.f32 %v357_v20, 0.0  ;;  %v359_v11 = vadd.f32 %v6218_v61, %v320_v4  ;;  %v529_v4 = vld [vmem:[%s8104_s2 + $0x390] sm:$0xff] }
  0xec   : > { %5235 = vmatprep.mubr.msk.bf16.mxu1 %vm1154_vm2, %v1144_v49  ;;  %5364 = vmatmul.mubr.msk.bf16.gmra.mrb[4].mxu0 %vm1154_vm2, %v2552_v62  ;;  %v360_v20 = vadd.f32 %v6218_v61, %v321_v56  ;;  %v361_v63 = vadd.f32 %v6218_v61, %v322_v1  ;;  %v6489_v62 = vmax.f32 %v358_v41, 0.0  ;;  %v287_v56 = vld [vmem:[%s6184_s26 + $0xb8] sm:$0xff]  ;;  %v2553_v1 = vpack.c.bf16 %v6402_v45, %v6400_v33 }
  0xed   : > { %8276 = vst [vmem:[#allocation36_spill] sm:$0xff] %v6470_v59  ;;  %v1145_v55 = vpack.c.bf16 %v1121_v58, %v1120_v57  ;;  %v324_v57 = vmul.f32 %v6199_v52, %v285_v48  ;;  %v530_v58 = vld [vmem:[%s8104_s2 + $0x398] sm:$0xff] }
  0xee   : > { %v1034_v49 = vpop.permute.xlu1 %1033  ;;  %v1029_v0 = vpop.permute.xlu0 %1028  ;;  %8277 = vst [vmem:[#allocation37_spill] sm:$0xff] %v6489_v62  ;;  %5367 = vmatprep.mubr.msk.bf16.mxu0 %vm1154_vm2, %v2553_v1 }
  0xef   : > { %v1123_v47 = vmul.f32 %v1034_v49, %v6470_v59  ;;  %v1122_v29 = vmul.f32 %v1029_v0, %v6457_v44  ;;  %2184 = vperm.xlu1 %5805, %v528_v51   ;;  %2179 = vperm.xlu0 %5804, %v527_v53   ;;  %v6491_v51 = vmax.f32 %v359_v11, 0.0  ;;  %v2554_v49 = vpack.c.bf16 %v6427_v3, %v6425_v21 }
  0xf0   : > { %5236 = vmatmul.mubr.msk.bf16.gmra.mrb[12].mxu1 %vm1154_vm2, %v1145_v55  ;;  %v362_v0 = vadd.f32 %v6218_v61, %v323_v50  ;;  %v325_v11 = vmul.f32 %v6199_v52, %v286_v2  ;;  %v543_v50 = vld [vmem:[%s8104_s2 + $0x500] sm:$0xff] }
  0xf1   : > { %8278 = vst [vmem:[#allocation38_spill] sm:$0xff] %v6491_v51  ;;  %v1146_v53 = vpack.c.bf16 %v1123_v47, %v1122_v29  ;;  %v363_v47 = vadd.f32 %v6218_v61, %v324_v57  ;;  %v326_v29 = vmul.f32 %v6199_v52, %v287_v56  ;;  %v288_v2 = vld [vmem:[%s6184_s26 + $0xc0] sm:$0xff]  ;;  %v289_v56 = vld [vmem:[%s6184_s26 + $0xc8] sm:$0xff] }
  0xf2   : > { %v1044_v48 = vpop.permute.xlu1 %1043  ;;  %v1039_v55 = vpop.permute.xlu0 %1038  ;;  %v6520_v43 = vmax.f32 %v362_v0, 0.0  ;;  %v544_v0 = vld [vmem:[%s8104_s2 + $0x508] sm:$0xff] }
  0xf3   : > { %v1125_v46 = vmul.f32 %v1044_v48, %v6491_v51  ;;  %v1124_v41 = vmul.f32 %v1039_v55, %v6489_v62  ;;  %2194 = vperm.xlu1 %5805, %v530_v58   ;;  %2189 = vperm.xlu0 %5804, %v529_v4   ;;  %v531_v48 = vld [vmem:[%s8104_s2 + $0x3a0] sm:$0xff]  ;;  %v6513_v58 = vmax.f32 %v360_v20, 0.0  ;;  %v6515_v4 = vmax.f32 %v361_v63, 0.0 }
  0xf4   : > { %5239 = vmatprep.mubr.msk.bf16.mxu1 %vm1154_vm2, %v1146_v53  ;;  %5368 = vmatmul.mubr.msk.bf16.gmra.mrb[8].mxu0 %vm1154_vm2, %v2554_v49  ;;  %8281 = vst [vmem:[#allocation41_spill] sm:$0xff] %v6520_v43  ;;  %v6527_v20 = vmax.f32 %v363_v47, 0.0  ;;  %v364_v63 = vadd.f32 %v6218_v61, %v325_v11  ;;  %v365_v1 = vadd.f32 %v6218_v61, %v326_v29  ;;  %v545_v49 = vld [vmem:[%s8104_s2 + $0x510] sm:$0xff]  ;;  %v291_v29 = vld [vmem:[%s6184_s26 + $0xd8] sm:$0xff] }
  0xf5   : > { %8279 = vst [vmem:[#allocation39_spill] sm:$0xff] %v6513_v58  ;;  %8280 = vst [vmem:[#allocation40_spill] sm:$0xff] %v6515_v4  ;;  %v1147_v57 = vpack.c.bf16 %v1125_v46, %v1124_v41  ;;  %v411_v46 = vld [vmem:[%s8103_s1 + $0xa] sm:$0x3]  ;;  %v327_v47 = vmul.f32 %v6199_v52, %v288_v2  ;;  %v328_v11 = vmul.f32 %v6199_v52, %v289_v56  ;;  %v547_v56 = vld [vmem:[%s8104_s2 + $0x520] sm:$0xff] }
  0xf6   : > { %v1054_v53 = vpop.permute.xlu1 %1053  ;;  %v1049_v55 = vpop.permute.xlu0 %1048  ;;  %8282 = vst [vmem:[#allocation42_spill] sm:$0xff] %v6527_v20  ;;  %5791 = vmatprep.subr.msk.bf16.mxu0 %vm1203_vm0, %v411_v46  ;;  %v3066_v41 = vsel %vm1203_vm0, %v411_v46, 0  ;;  %v6550_v2 = vmax.f32 %v364_v63, 0.0 }
  0xf7   : > { %v1127_v42 = vmul.f32 %v1054_v53, %v6515_v4  ;;  %v1126_v51 = vmul.f32 %v1049_v55, %v6513_v58  ;;  %2811 = vperm.xlu1 %5805, %v543_v50   ;;  %2199 = vperm.xlu0 %5804, %v531_v48   ;;  %v290_v50 = vld [vmem:[%s6184_s26 + $0xd0] sm:$0xff]  ;;  %v2556_v4 = vpack.c.bf16 %v6470_v59, %v6457_v44 }
  0xf8   : > { %5240 = vmatmul.mubr.msk.bf16.gmra.mrb[16].mxu1 %vm1154_vm2, %v1147_v57  ;;  %5392 = vmatpush3.bf16.msra.mxu0 %v3066_v41  ;;  %v2555_v57 = vpack.c.bf16 %v6436_v7, %v6434_v40  ;;  %8283 = vst [vmem:[#allocation43_spill] sm:$0xff] %v6550_v2  ;;  %v546_v41 = vld [vmem:[%s8104_s2 + $0x518] sm:$0xff]  ;;  %v366_v63 = vadd.f32 %v6218_v61, %v327_v47 }
  0xf9   : > { %v1148_v48 = vpack.c.bf16 %v1127_v42, %v1126_v51  ;;  %v329_v42 = vmul.f32 %v6199_v52, %v290_v50  ;;  %v330_v51 = vmul.f32 %v6199_v52, %v291_v29  ;;  %v292_v29 = vld [vmem:[%s6184_s26 + $0xe0] sm:$0xff] }
  0xfa   : > { %v1064_v53 = vpop.permute.xlu1 %1063  ;;  %v1059_v55 = vpop.permute.xlu0 %1058  ;;  %5371 = vmatprep.mubr.msk.bf16.mxu0 %vm1154_vm2, %v2555_v57  ;;  %v6579_v47 = vmax.f32 %v366_v63, 0.0  ;;  %v551_v63 = vld [vmem:[%s8104_s2 + $0x540] sm:$0xff] }
  0xfb   : > { %v1129_v58 = vmul.f32 %v1064_v53, %v6527_v20  ;;  %v1128_v46 = vmul.f32 %v1059_v55, %v6520_v43  ;;  %2821 = vperm.xlu1 %5805, %v545_v49   ;;  %2816 = vperm.xlu0 %5804, %v544_v0   ;;  %v6562_v49 = vmax.f32 %v365_v1, 0.0  ;;  %v367_v0 = vadd.f32 %v6218_v61, %v328_v11 }
  0xfc   : > { %5243 = vmatprep.mubr.msk.bf16.mxu1 %vm1154_vm2, %v1148_v48  ;;  %5372 = vmatmul.mubr.msk.bf16.gmra.mrb[12].mxu0 %vm1154_vm2, %v2556_v4  ;;  %v368_v57 = vadd.f32 %v6218_v61, %v329_v42  ;;  %v369_v1 = vadd.f32 %v6218_v61, %v330_v51  ;;  %v548_v4 = vld [vmem:[%s8104_s2 + $0x528] sm:$0xff]  ;;  %8285 = vst [vmem:[#allocation45_spill] sm:$0xff] %v6579_v47 }
  0xfd   : > { %8284 = vst [vmem:[#allocation44_spill] sm:$0xff] %v6562_v49  ;;  %v1149_v50 = vpack.c.bf16 %v1129_v58, %v1128_v46  ;;  %v549_v58 = vld [vmem:[%s8104_s2 + $0x530] sm:$0xff]  ;;  %v6581_v11 = vmax.f32 %v367_v0, 0.0  ;;  %v331_v46 = vmul.f32 %v6199_v52, %v292_v29  ;;  %v550_v0 = vld [vmem:[%s8104_s2 + $0x538] sm:$0xff] }
  0xfe   : > { %v1074_v48 = vpop.permute.xlu1 %1073  ;;  %v1069_v53 = vpop.permute.xlu0 %1068  ;;  %v6593_v52 = vmax.f32 %v368_v57, 0.0 }
  0xff   : > { %v1131_v55 = vmul.f32 %v1074_v48, %v6562_v49  ;;  %v1130_v20 = vmul.f32 %v1069_v53, %v6550_v2  ;;  %2831 = vperm.xlu1 %5805, %v547_v56   ;;  %2826 = vperm.xlu0 %5804, %v546_v41   ;;  %8286 = vst [vmem:[#allocation46_spill] sm:$0xff] %v6581_v11  ;;  %v702_v53 = vrot.slane %v6286_v60, 7 }
 0x100   : > { %5244 = vmatmul.mubr.msk.bf16.gmra.mrb[20].mxu1 %vm1154_vm2, %v1149_v50  ;;  %8287 = vst [vmem:[#allocation47_spill] sm:$0xff] %v6593_v52  ;;  %v370_v29 = vadd.f32 %v6218_v61, %v331_v46  ;;  %v552_v46 = vld [vmem:[%s8104_s2 + $0x548] sm:$0xff] }
 0x101   : > { %v1150_v56 = vpack.c.bf16 %v1131_v55, %v1130_v20  ;;  %v6595_v20 = vmax.f32 %v369_v1, 0.0  ;;  %v8124_v55 = vrot.slane %v6246_v24, 7  ;;  %v553_v1 = vld [vmem:[%s8104_s2 + $0x550] sm:$0xff] }
 0x102   : > { %v1084_v42 = vpop.permute.xlu1 %1083  ;;  %v1079_v41 = vpop.permute.xlu0 %1078 }
 0x103   : > { %v1133_v51 = vmul.f32 %v1084_v42, %v6581_v11  ;;  %v1132_v50 = vmul.f32 %v1079_v41, %v6579_v47  ;;  %2841 = vperm.xlu1 %5805, %v549_v58   ;;  %2836 = vperm.xlu0 %5804, %v548_v4   ;;  %8288 = vst [vmem:[#allocation48_spill] sm:$0xff] %v6595_v20  ;;  %v701_v58 = vrot.slane %v6248_v25, 7  ;;  %v6615_v41 = vmax.f32 %v370_v29, 0.0 }
 0x104   : > { %5247 = vmatprep.mubr.msk.bf16.mxu1 %vm1154_vm2, %v1150_v56  ;;  %v673_v29 = vrot.slane %v6322_v8, 7 }
 0x105   : > { %v1151_v48 = vpack.c.bf16 %v1133_v51, %v1132_v50  ;;  %v6606_v61 = vsel %vm705_vm3, %v701_v58, %v702_v53  ;;  %8290 = vst [vmem:[#allocation50_spill] sm:$0xff] %v6615_v41  ;;  %v6621_v50 = vsel %vm705_vm3, %v8124_v55, %v701_v58  ;;  %v555_v58 = vld [vmem:[%s8104_s2 + $0x560] sm:$0xff] }
 0x106   : > { %v1094_v4 = vpop.permute.xlu1 %1093  ;;  %v1089_v56 = vpop.permute.xlu0 %1088  ;;  %8289 = vst [vmem:[#allocation49_spill] sm:$0xff] %v6606_v61  ;;  %8291 = vst [vmem:[#allocation51_spill] sm:$0xff] %v6621_v50 }
 0x107   : > { %v1135_v42 = vmul.f32 %v1094_v4, %v6595_v20  ;;  %v1134_v57 = vmul.f32 %v1089_v56, %v6593_v52  ;;  %2851 = vperm.xlu1 %5805, %v551_v63   ;;  %2846 = vperm.xlu0 %5804, %v550_v0   ;;  %v899_v4 = vmul.f32 %v6073_v10, %v6606_v61  ;;  %v554_v10 = vld [vmem:[%s8104_s2 + $0x558] sm:$0xff] }
 0x108   : > { %5248 = vmatmul.mubr.msk.bf16.gmra.mrb[24].mxu1 %vm1154_vm2, %v1151_v48  ;;  %v672_v48 = vrot.slane %v6305_v36, 7 }
 0x109   : > { %v1152_v51 = vpack.c.bf16 %v1135_v42, %v1134_v57  ;;  %v674_v42 = vrot.slane %v6324_v12, 7  ;;  %v671_v57 = vrot.slane %v6294_v13, 7 }
 0x10a   : > { %v1104_v63 = vpop.permute.xlu1 %1103  ;;  %v1099_v0 = vpop.permute.xlu0 %1098  ;;  %v6654_v12 = vsel %vm705_vm3, %v672_v48, %v673_v29 }
 0x10b   : > { %v1137_v56 = vmul.f32 %v1104_v63, %v6246_v24  ;;  %v1136_v25 = vmul.f32 %v1099_v0, %v6615_v41  ;;  %2861 = vperm.xlu1 %5805, %v553_v1   ;;  %2856 = vperm.xlu0 %5804, %v552_v46   ;;  %v898_v1 = vmul.f32 %v6063_v6, %v6621_v50  ;;  %v557_v6 = vld [vmem:[%s8104_s2 + $0x570] sm:$0xff] }
 0x10c   : > { %5251 = vmatprep.mubr.msk.bf16.mxu1 %vm1154_vm2, %v1152_v51  ;;  %v6646_v51 = vsel %vm705_vm3, %v671_v57, %v672_v48  ;;  %v6650_v61 = vsel %vm705_vm3, %v673_v29, %v674_v42  ;;  %8294 = vst [vmem:[#allocation54_spill] sm:$0xff] %v6654_v12 }
 0x10d   : > { %v1153_v46 = vpack.c.bf16 %v1137_v56, %v1136_v25  ;;  %8292 = vst [vmem:[#allocation52_spill] sm:$0xff] %v6646_v51  ;;  %v930_v55 = vpack.c.bf16 %v899_v4, %v898_v1  ;;  %8293 = vst [vmem:[#allocation53_spill] sm:$0xff] %v6650_v61  ;;  %v556_v25 = vld [vmem:[%s8104_s2 + $0x568] sm:$0xff]  ;;  %v6665_v4 = vsel %vm705_vm3, %v702_v53, %v671_v57  ;;  %v675_v1 = vrot.slane %v6338_v37, 7 }
 0x10e   : > { %v6640_v63 = vpop.permute.xlu1 %1652  ;;  %v6642_v0 = vpop.permute.xlu0 %1647  ;;  %8295 = vst [vmem:[#allocation55_spill] sm:$0xff] %v6665_v4  ;;  %v901_v48 = vmul.f32 %v6071_v9, %v6646_v51  ;;  %v676_v53 = vrot.slane %v6340_v54, 7  ;;  %v677_v9 = vrot.slane %v6359_v17, 7  ;;  %v678_v57 = vrot.slane %v6371_v32, 7  ;;  %v8311_v51 = vld [vmem:[#allocation40_spill] sm:$0xff] }
 0x10f   : > { %2871 = vperm.xlu1 %5805, %v555_v58   ;;  %2866 = vperm.xlu0 %5804, %v554_v10   ;;  %v903_v58 = vmul.f32 %v6088_v14, %v6650_v61  ;;  %v902_v10 = vmul.f32 %v6090_v15, %v6654_v12  ;;  %v559_v14 = vld [vmem:[%s8104_s2 + $0x580] sm:$0xff]  ;;  %v558_v15 = vld [vmem:[%s8104_s2 + $0x578] sm:$0xff]  ;;  %v6702_v61 = vsel %vm705_vm3, %v674_v42, %v675_v1  ;;  %v561_v42 = vld [vmem:[%s8104_s2 + $0x590] sm:$0xff] }
 0x110   : > { %5252 = vmatmul.mubr.msk.bf16.gmra.mrb[28].mxu1 %vm1154_vm2, %v1153_v46  ;;  %v6698_v12 = vsel %vm705_vm3, %v675_v1, %v676_v53  ;;  %8297 = vst [vmem:[#allocation57_spill] sm:$0xff] %v6702_v61 }
 0x111   : > { %5257 = vmatprep.mubr.msk.bf16.mxu1 %vm1154_vm2, %v930_v55  ;;  %v900_v55 = vmul.f32 %v6061_v5, %v6665_v4  ;;  %v1902_v5 = vsel %vm1203_vm0, %v6336_v16, 0  ;;  %8296 = vst [vmem:[#allocation56_spill] sm:$0xff] %v6698_v12  ;;  %v6715_v16 = vsel %vm705_vm3, %v676_v53, %v677_v9  ;;  %v905_v1 = vmul.f32 %v6098_v18, %v6698_v12 }
 0x112   : > { %v6670_v56 = vpop.permute.xlu1 %1662  ;;  %v6672_v29 = vpop.permute.xlu0 %1657  ;;  %8299 = vst [vmem:[#allocation59_spill] sm:$0xff] %v6715_v16  ;;  %v904_v53 = vmul.f32 %v6100_v19, %v6702_v61  ;;  %v679_v18 = vrot.slane %v6400_v33, 7  ;;  %v680_v19 = vrot.slane %v6402_v45, 7  ;;  %v563_v61 = vld [vmem:[%s8104_s2 + $0x5a0] sm:$0xff] }
 0x113   : > { %2881 = vperm.xlu1 %5805, %v557_v6   ;;  %2876 = vperm.xlu0 %5804, %v556_v25   ;;  %v931_v46 = vpack.c.bf16 %v901_v48, %v900_v55  ;;  %v932_v25 = vpack.c.bf16 %v903_v58, %v902_v10  ;;  %v6707_v48 = vld [vmem:[%s8103_s1 + $0x6] sm:$0x3]  ;;  %v6711_v55 = vsel %vm705_vm3, %v677_v9, %v678_v57  ;;  %v560_v58 = vld [vmem:[%s8104_s2 + $0x588] sm:$0xff] }
 0x114   : > { %8298 = vst [vmem:[#allocation58_spill] sm:$0xff] %v6711_v55  ;;  %v6728_v10 = vld [vmem:[%s8103_s1 + $0xc] sm:$0x3] }
 0x115   : > { %8300 = vst [vmem:[#allocation60_spill] sm:$0xff] %v6728_v10  ;;  %5792 = vmatprep.subr.msk.bf16.mxu0 %vm1203_vm0, %v6728_v10 }
 0x116   : > { %v6690_v50 = vpop.permute.xlu1 %1672  ;;  %v6692_v6 = vpop.permute.xlu0 %1667 }
 0x117   : > { %2891 = vperm.xlu1 %5805, %v559_v14   ;;  %2886 = vperm.xlu0 %5804, %v558_v15   ;;  %v907_v15 = vmul.f32 %v6108_v22, %v6711_v55  ;;  %v562_v22 = vld [vmem:[%s8104_s2 + $0x598] sm:$0xff]  ;;  %v933_v55 = vpack.c.bf16 %v905_v1, %v904_v53  ;;  %v565_v53 = vld [vmem:[%s8104_s2 + $0x5b0] sm:$0xff] }
 0x118   : > { %5258 = vmatmul.mubr.msk.bf16.vlgmr.msra.gmra.mrb[0].mxu1 %vm1154_vm2, %v931_v46  ;;  %v906_v46 = vmul.f32 %v6110_v23, %v6715_v16 }
 0x119   : > { %5261 = vmatprep.mubr.msk.bf16.mxu1 %vm1154_vm2, %v932_v25  ;;  %5290 = vmatpush3.bf16.msra.mxu1 %v1902_v5  ;;  %v681_v5 = vrot.slane %v6425_v21, 7  ;;  %v682_v25 = vrot.slane %v6427_v3, 7 }
 0x11a   : > { %v6734_v9 = vpop.permute.xlu1 %1682  ;;  %v6736_v14 = vpop.permute.xlu0 %1677  ;;  %5788 = vmatprep.subr.msk.bf16.mxu1 %vm1203_vm0, %v6707_v48  ;;  %v934_v12 = vpack.c.bf16 %v907_v15, %v906_v46 }
 0x11b   : > { %2901 = vperm.xlu1 %5805, %v561_v42   ;;  %2896 = vperm.xlu0 %5804, %v560_v58   ;;  %v6762_v42 = vsel %vm705_vm3, %v679_v18, %v680_v19  ;;  %v6766_v58 = vsel %vm705_vm3, %v678_v57, %v679_v18  ;;  %v6770_v4 = vsel %vm705_vm3, %v681_v5, %v682_v25  ;;  %v564_v57 = vld [vmem:[%s8104_s2 + $0x5a8] sm:$0xff] }
 0x11c   : > { %8301 = vst [vmem:[#allocation61_spill] sm:$0xff] %v6762_v42  ;;  %8302 = vst [vmem:[#allocation62_spill] sm:$0xff] %v6766_v58  ;;  %v6774_v1 = vsel %vm705_vm3, %v680_v19, %v681_v5  ;;  %v908_v15 = vmul.f32 %v6120_v27, %v6766_v58  ;;  %v683_v5 = vrot.slane %v6434_v40, 7  ;;  %v686_v27 = vrot.slane %v6470_v59, 7 }
 0x11d   : > { %8303 = vst [vmem:[#allocation63_spill] sm:$0xff] %v6770_v4  ;;  %8304 = vst [vmem:[#allocation64_spill] sm:$0xff] %v6774_v1  ;;  %v910_v19 = vmul.f32 %v6130_v31, %v6774_v1 }
 0x11e   : > { %v6756_v23 = vpop.permute.xlu1 %1692  ;;  %v6758_v16 = vpop.permute.xlu0 %1687 }
 0x11f   : > { %2911 = vperm.xlu1 %5805, %v563_v61   ;;  %2906 = vperm.xlu0 %5804, %v562_v22   ;;  %v909_v61 = vmul.f32 %v6118_v26, %v6762_v42  ;;  %v685_v26 = vrot.slane %v6457_v44, 7  ;;  %v567_v22 = vld [vmem:[%s8104_s2 + $0x5c0] sm:$0xff] }
 0x120   : > { %5262 = vmatmul.mubr.msk.bf16.gmra.mrb[4].mxu1 %vm1154_vm2, %v933_v55  ;;  %v911_v55 = vmul.f32 %v6128_v30, %v6770_v4  ;;  %v566_v30 = vld [vmem:[%s8104_s2 + $0x5b8] sm:$0xff] }
 0x121   : > { %5265 = vmatprep.mubr.msk.bf16.mxu1 %vm1154_vm2, %v934_v12  ;;  %v684_v12 = vrot.slane %v6436_v7, 7  ;;  %v935_v4 = vpack.c.bf16 %v909_v61, %v908_v15  ;;  %v6820_v42 = vsel %vm705_vm3, %v685_v26, %v686_v27  ;;  %v569_v15 = vld [vmem:[%s8104_s2 + $0x5d0] sm:$0xff] }
 0x122   : > { %v6788_v46 = vpop.permute.xlu1 %1702  ;;  %v6790_v18 = vpop.permute.xlu0 %1697  ;;  %v936_v58 = vpack.c.bf16 %v911_v55, %v910_v19  ;;  %8307 = vst [vmem:[#allocation67_spill] sm:$0xff] %v6820_v42 }
 0x123   : > { %2921 = vperm.xlu1 %5805, %v565_v53   ;;  %2916 = vperm.xlu0 %5804, %v564_v57   ;;  %v6812_v53 = vsel %vm705_vm3, %v683_v5, %v684_v12  ;;  %v6816_v57 = vsel %vm705_vm3, %v682_v25, %v683_v5  ;;  %v6824_v61 = vsel %vm705_vm3, %v684_v12, %v685_v26  ;;  %v568_v25 = vld [vmem:[%s8104_s2 + $0x5c8] sm:$0xff] }
 0x124   : > { %8305 = vst [vmem:[#allocation65_spill] sm:$0xff] %v6812_v53  ;;  %8306 = vst [vmem:[#allocation66_spill] sm:$0xff] %v6816_v57  ;;  %v913_v55 = vmul.f32 %v6138_v34, %v6812_v53  ;;  %v912_v19 = vmul.f32 %v6140_v35, %v6816_v57  ;;  %v914_v26 = vmul.f32 %v6152_v39, %v6824_v61  ;;  %v8310_v34 = vld [vmem:[#allocation39_spill] sm:$0xff]  ;;  %v690_v35 = vrot.slane %v8311_v51, 7  ;;  %v571_v57 = vld [vmem:[%s8104_s2 + $0x5e0] sm:$0xff] }
 0x125   : > { %8308 = vst [vmem:[#allocation68_spill] sm:$0xff] %v6824_v61  ;;  %v689_v53 = vrot.slane %v8310_v34, 7  ;;  %v8321_v34 = vld [vmem:[#allocation5_spill] sm:$0xff] }
 0x126   : > { %v6806_v31 = vpop.permute.xlu1 %1712  ;;  %v6808_v1 = vpop.permute.xlu0 %1707 }
 0x127   : > { %2931 = vperm.xlu1 %5805, %v567_v22   ;;  %2926 = vperm.xlu0 %5804, %v566_v30   ;;  %v687_v22 = vrot.slane %v6489_v62, 7  ;;  %v8309_v30 = vld [vmem:[#allocation38_spill] sm:$0xff]  ;;  %v6870_v51 = vsel %vm705_vm3, %v689_v53, %v690_v35 }
 0x128   : > { %5266 = vmatmul.mubr.msk.bf16.gmra.mrb[8].mxu1 %vm1154_vm2, %v935_v4  ;;  %v915_v4 = vmul.f32 %v6150_v38, %v6820_v42  ;;  %v570_v38 = vld [vmem:[%s8104_s2 + $0x5d8] sm:$0xff]  ;;  %v937_v42 = vpack.c.bf16 %v913_v55, %v912_v19  ;;  %8316 = vst [vmem:[#allocation73_spill] sm:$0xff] %v6870_v51  ;;  %v573_v19 = vld [vmem:[%s8104_s2 + $0x5f0] sm:$0xff] }
 0x129   : > { %5269 = vmatprep.mubr.msk.bf16.mxu1 %vm1154_vm2, %v936_v58  ;;  %v688_v58 = vrot.slane %v8309_v30, 7 }
 0x12a   : > { %v6838_v5 = vpop.permute.xlu1 %1722  ;;  %v6840_v12 = vpop.permute.xlu0 %1717  ;;  %v938_v10 = vpack.c.bf16 %v915_v4, %v914_v26  ;;  %v8319_v26 = vld [vmem:[#allocation3_spill] sm:$0xff] }
 0x12b   : > { %2941 = vperm.xlu1 %5805, %v569_v15   ;;  %2936 = vperm.xlu0 %5804, %v568_v25   ;;  %v6862_v15 = vsel %vm705_vm3, %v687_v22, %v688_v58  ;;  %v6866_v25 = vsel %vm705_vm3, %v686_v27, %v687_v22  ;;  %v6874_v55 = vsel %vm705_vm3, %v688_v58, %v689_v53  ;;  %v572_v27 = vld [vmem:[%s8104_s2 + $0x5e8] sm:$0xff] }
 0x12c   : > { %8314 = vst [vmem:[#allocation71_spill] sm:$0xff] %v6862_v15  ;;  %8315 = vst [vmem:[#allocation72_spill] sm:$0xff] %v6866_v25  ;;  %v916_v22 = vmul.f32 %v8319_v26, %v6866_v25  ;;  %v918_v30 = vmul.f32 %v8321_v34, %v6874_v55  ;;  %v694_v26 = vrot.slane %v6562_v49, 7  ;;  %v575_v25 = vld [vmem:[%s8104_s2 + $0x600] sm:$0xff] }
 0x12d   : > { %8317 = vst [vmem:[#allocation74_spill] sm:$0xff] %v6874_v55 }
 0x12e   : > { %v6856_v39 = vpop.permute.xlu1 %1732  ;;  %v6858_v61 = vpop.permute.xlu0 %1727 }
 0x12f   : > { %8312 = vst [vmem:[#allocation69_spill] sm:$0xff] %v6856_v39  ;;  %8313 = vst [vmem:[#allocation70_spill] sm:$0xff] %v6858_v61  ;;  %2951 = vperm.xlu1 %5805, %v571_v57   ;;  %2946 = vperm.xlu0 %5804, %v570_v38   ;;  %v8318_v57 = vld [vmem:[#allocation2_spill] sm:$0xff]  ;;  %v691_v61 = vrot.slane %v6520_v43, 7 }
 0x130   : > { %5270 = vmatmul.mubr.msk.bf16.gmra.mrb[12].mxu1 %vm1154_vm2, %v937_v42  ;;  %v917_v4 = vmul.f32 %v8318_v57, %v6862_v15  ;;  %v8320_v42 = vld [vmem:[#allocation4_spill] sm:$0xff]  ;;  %v8322_v39 = vld [vmem:[#allocation42_spill] sm:$0xff]  ;;  %v693_v57 = vrot.slane %v6550_v2, 7  ;;  %v695_v2 = vrot.slane %v6579_v47, 7 }
 0x131   : > { %5273 = vmatprep.mubr.msk.bf16.mxu1 %vm1154_vm2, %v938_v10  ;;  %v919_v38 = vmul.f32 %v8320_v42, %v6870_v51  ;;  %v692_v10 = vrot.slane %v8322_v39, 7  ;;  %v574_v42 = vld [vmem:[%s8104_s2 + $0x5f8] sm:$0xff] }
 0x132   : > { %v6888_v53 = vpop.permute.xlu1 %1742  ;;  %v6890_v58 = vpop.permute.xlu0 %1737  ;;  %v939_v51 = vpack.c.bf16 %v917_v4, %v916_v22  ;;  %v6920_v49 = vsel %vm705_vm3, %v693_v57, %v694_v26  ;;  %v8330_v22 = vld [vmem:[#allocation7_spill] sm:$0xff] }
 0x133   : > { %2961 = vperm.xlu1 %5805, %v573_v19   ;;  %2956 = vperm.xlu0 %5804, %v572_v27   ;;  %v940_v15 = vpack.c.bf16 %v919_v38, %v918_v30  ;;  %v6912_v19 = vsel %vm705_vm3, %v691_v61, %v692_v10  ;;  %v6916_v27 = vsel %vm705_vm3, %v690_v35, %v691_v61  ;;  %v577_v30 = vld [vmem:[%s8104_s2 + $0x610] sm:$0xff]  ;;  %v576_v61 = vld [vmem:[%s8104_s2 + $0x608] sm:$0xff]  ;;  %v8329_v35 = vld [vmem:[#allocation6_spill] sm:$0xff] }
 0x134   : > { %8325 = vst [vmem:[#allocation4_spill] sm:$0xff] %v6912_v19  ;;  %8326 = vst [vmem:[#allocation5_spill] sm:$0xff] %v6916_v27  ;;  %v6924_v4 = vsel %vm705_vm3, %v692_v10, %v693_v57  ;;  %v920_v38 = vmul.f32 %v8330_v22, %v6916_v27  ;;  %v698_v22 = vrot.slane %v6595_v20, 7 }
 0x135   : > { %8327 = vst [vmem:[#allocation75_spill] sm:$0xff] %v6920_v49  ;;  %8328 = vst [vmem:[#allocation76_spill] sm:$0xff] %v6924_v4 }
 0x136   : > { %v6906_v34 = vpop.permute.xlu1 %1752  ;;  %v6908_v55 = vpop.permute.xlu0 %1747 }
 0x137   : > { %8323 = vst [vmem:[#allocation2_spill] sm:$0xff] %v6906_v34  ;;  %8324 = vst [vmem:[#allocation3_spill] sm:$0xff] %v6908_v55  ;;  %3263 = vperm.xlu1 %5805, %v575_v25   ;;  %2966 = vperm.xlu0 %5804, %v574_v42   ;;  %v921_v25 = vmul.f32 %v8329_v35, %v6912_v19  ;;  %v8334_v55 = vld [vmem:[#allocation9_spill] sm:$0xff]  ;;  %v697_v35 = vrot.slane %v6593_v52, 7  ;;  %v579_v19 = vld [vmem:[%s8104_s2 + $0x620] sm:$0xff] }
 0x138   : > { %5274 = vmatmul.mubr.msk.bf16.gmra.mrb[16].mxu1 %vm1154_vm2, %v939_v51  ;;  %v8333_v51 = vld [vmem:[#allocation8_spill] sm:$0xff]  ;;  %v922_v34 = vmul.f32 %v8334_v55, %v6924_v4 }
 0x139   : > { %5277 = vmatprep.mubr.msk.bf16.mxu1 %vm1154_vm2, %v940_v15  ;;  %v923_v42 = vmul.f32 %v8333_v51, %v6920_v49  ;;  %v696_v15 = vrot.slane %v6581_v11, 7  ;;  %v578_v51 = vld [vmem:[%s8104_s2 + $0x618] sm:$0xff]  ;;  %v941_v49 = vpack.c.bf16 %v921_v25, %v920_v38  ;;  %v8342_v38 = vld [vmem:[#allocation11_spill] sm:$0xff] }
 0x13a   : > { %v6938_v10 = vpop.permute.xlu1 %1762  ;;  %v6940_v57 = vpop.permute.xlu0 %1757 }
 0x13b   : > { %8331 = vst [vmem:[#allocation6_spill] sm:$0xff] %v6938_v10  ;;  %8332 = vst [vmem:[#allocation7_spill] sm:$0xff] %v6940_v57  ;;  %3273 = vperm.xlu1 %5805, %v577_v30   ;;  %3268 = vperm.xlu0 %5804, %v576_v61   ;;  %v942_v27 = vpack.c.bf16 %v923_v42, %v922_v34  ;;  %v6962_v30 = vsel %vm705_vm3, %v695_v2, %v696_v15  ;;  %v581_v34 = vld [vmem:[%s8104_s2 + $0x630] sm:$0xff]  ;;  %v699_v10 = vrot.slane %v6615_v41, 7 }
 0x13c   : > { %8337 = vst [vmem:[#allocation77_spill] sm:$0xff] %v6962_v30  ;;  %v6966_v61 = vsel %vm705_vm3, %v694_v26, %v695_v2  ;;  %v6970_v57 = vsel %vm705_vm3, %v697_v35, %v698_v22  ;;  %v6974_v25 = vsel %vm705_vm3, %v696_v15, %v697_v35  ;;  %v580_v2 = vld [vmem:[%s8104_s2 + $0x628] sm:$0xff]  ;;  %v8341_v26 = vld [vmem:[#allocation10_spill] sm:$0xff] }
 0x13d   : > { %8338 = vst [vmem:[#allocation78_spill] sm:$0xff] %v6966_v61  ;;  %8339 = vst [vmem:[#allocation79_spill] sm:$0xff] %v6970_v57  ;;  %v924_v42 = vmul.f32 %v8342_v38, %v6966_v61  ;;  %v583_v38 = vld [vmem:[%s8104_s2 + $0x640] sm:$0xff]  ;;  %v1581_v61 = vrot.slane %v6305_v36, 1 }
 0x13e   : > { %v6956_v55 = vpop.permute.xlu1 %1772  ;;  %v6958_v4 = vpop.permute.xlu0 %1767  ;;  %8340 = vst [vmem:[#allocation80_spill] sm:$0xff] %v6974_v25 }
 0x13f   : > { %8335 = vst [vmem:[#allocation8_spill] sm:$0xff] %v6956_v55  ;;  %8336 = vst [vmem:[#allocation9_spill] sm:$0xff] %v6958_v4  ;;  %3283 = vperm.xlu1 %5805, %v579_v19   ;;  %3278 = vperm.xlu0 %5804, %v578_v51   ;;  %v925_v19 = vmul.f32 %v8341_v26, %v6962_v30  ;;  %v8344_v4 = vld [vmem:[#allocation13_spill] sm:$0xff]  ;;  %v1611_v26 = vrot.slane %v6286_v60, 1 }
 0x140   : > { %5278 = vmatmul.mubr.msk.bf16.gmra.mrb[20].mxu1 %vm1154_vm2, %v941_v49  ;;  %v8343_v49 = vld [vmem:[#allocation12_spill] sm:$0xff]  ;;  %v926_v55 = vmul.f32 %v8344_v4, %v6974_v25  ;;  %v582_v30 = vld [vmem:[%s8104_s2 + $0x638] sm:$0xff] }
 0x141   : > { %5281 = vmatprep.mubr.msk.bf16.mxu1 %vm1154_vm2, %v942_v27  ;;  %v927_v51 = vmul.f32 %v8343_v49, %v6970_v57  ;;  %v1580_v27 = vrot.slane %v6294_v13, 1  ;;  %v943_v49 = vpack.c.bf16 %v925_v19, %v924_v42  ;;  %v7017_v13 = vsel %vm705_vm3, %v698_v22, %v699_v10  ;;  %v8349_v42 = vld [vmem:[#allocation14_spill] sm:$0xff]  ;;  %v8352_v22 = vld [vmem:[#allocation15_spill] sm:$0xff] }
 0x142   : > { %v6988_v15 = vpop.permute.xlu1 %1782  ;;  %v6990_v35 = vpop.permute.xlu0 %1777  ;;  %8347 = vst [vmem:[#allocation11_spill] sm:$0xff] %v7017_v13  ;;  %v8350_v60 = vrot.slane %v8349_v42, 1 }
 0x143   : > { %3293 = vperm.xlu1 %5805, %v581_v34   ;;  %3288 = vperm.xlu0 %5804, %v580_v2   ;;  %v944_v25 = vpack.c.bf16 %v927_v51, %v926_v55  ;;  %v8345_v34 = vrot.slane %v6246_v24, 7  ;;  %v7021_v19 = vsel %vm1612_vm1, %v1611_v26, %v1580_v27  ;;  %v585_v51 = vld [vmem:[%s8104_s2 + $0x650] sm:$0xff] }
 0x144   : > { %8348 = vst [vmem:[#allocation12_spill] sm:$0xff] %v7021_v19  ;;  %v7027_v55 = vsel %vm1612_vm1, %v8350_v60, %v1611_v26 }
 0x145   : > { %v7013_v2 = vsel %vm705_vm3, %v699_v10, %v8345_v34  ;;  %8351 = vst [vmem:[#allocation13_spill] sm:$0xff] %v7027_v55  ;;  %v584_v10 = vld [vmem:[%s8104_s2 + $0x648] sm:$0xff]  ;;  %v1805_v42 = vmul.f32 %v6642_v0, %v7027_v55 }
 0x146   : > { %v7005_v57 = vpop.permute.xlu1 %1792  ;;  %v7007_v4 = vpop.permute.xlu0 %1787  ;;  %8346 = vst [vmem:[#allocation10_spill] sm:$0xff] %v7013_v2  ;;  %v8366_v55 = vld [vmem:[#allocation39_spill] sm:$0xff] }
 0x147   : > { %3303 = vperm.xlu1 %5805, %v583_v38   ;;  %3298 = vperm.xlu0 %5804, %v582_v30   ;;  %v929_v30 = vmul.f32 %v8352_v22, %v7013_v2  ;;  %v8353_v38 = vld [vmem:[#allocation16_spill] sm:$0xff]  ;;  %v8354_v22 = vld [vmem:[#allocation22_spill] sm:$0xff] }
 0x148   : > { %5282 = vmatmul.mubr.msk.bf16.gmra.mrb[24].mxu1 %vm1154_vm2, %v943_v49  ;;  %v928_v34 = vmul.f32 %v8353_v38, %v7017_v13  ;;  %v1806_v49 = vmul.f32 %v6640_v63, %v7021_v19  ;;  %v1583_v2 = vrot.slane %v8354_v22, 1  ;;  %v1584_v38 = vrot.slane %v6338_v37, 1  ;;  %v587_v13 = vld [vmem:[%s8104_s2 + $0x660] sm:$0xff]  ;;  %v586_v63 = vld [vmem:[%s8104_s2 + $0x658] sm:$0xff] }
 0x149   : > { %5285 = vmatprep.mubr.msk.bf16.mxu1 %vm1154_vm2, %v944_v25  ;;  %v1582_v25 = vrot.slane %v6322_v8, 1 }
 0x14a   : > { %v7041_v60 = vpop.permute.xlu1 %1802  ;;  %v7043_v26 = vpop.permute.xlu0 %1797  ;;  %v945_v19 = vpack.c.bf16 %v929_v30, %v928_v34  ;;  %v1837_v8 = vpack.c.bf16 %v1806_v49, %v1805_v42  ;;  %v7073_v37 = vsel %vm1612_vm1, %v1583_v2, %v1584_v38  ;;  %v589_v42 = vld [vmem:[%s8104_s2 + $0x670] sm:$0xff] }
 0x14b   : > { %3313 = vperm.xlu1 %5805, %v585_v51   ;;  %3308 = vperm.xlu0 %5804, %v584_v10   ;;  %v7065_v51 = vsel %vm1612_vm1, %v1581_v61, %v1582_v25  ;;  %v7069_v10 = vsel %vm1612_vm1, %v1580_v27, %v1581_v61  ;;  %v7077_v30 = vsel %vm1612_vm1, %v1582_v25, %v1583_v2  ;;  %v588_v61 = vld [vmem:[%s8104_s2 + $0x668] sm:$0xff]  ;;  %v1585_v25 = vrot.slane %v6340_v54, 1 }
 0x14c   : > { %8355 = vst [vmem:[#allocation15_spill] sm:$0xff] %v7065_v51  ;;  %8356 = vst [vmem:[#allocation16_spill] sm:$0xff] %v7069_v10  ;;  %v1807_v27 = vmul.f32 %v6672_v29, %v7069_v10  ;;  %v1809_v49 = vmul.f32 %v6692_v6, %v7077_v30  ;;  %v1588_v29 = vrot.slane %v6400_v33, 1 }
 0x14e   : > { %v7059_v0 = vpop.permute.xlu1 %2104  ;;  %v7061_v36 = vpop.permute.xlu0 %2099 }
 0x14f   : > { %3323 = vperm.xlu1 %5805, %v587_v13   ;;  %3318 = vperm.xlu0 %5804, %v586_v63   ;;  %v1808_v13 = vmul.f32 %v6670_v56, %v7065_v51  ;;  %v1587_v56 = vrot.slane %v6371_v32, 1  ;;  %v591_v63 = vld [vmem:[%s8104_s2 + $0x680] sm:$0xff]  ;;  %v7121_v32 = vsel %vm1612_vm1, %v1584_v38, %v1585_v25  ;;  %v592_v38 = vld [vmem:[%s8104_s2 + $0x688] sm:$0xff] }
 0x150   : > { %5286 = vmatmul.mubr.msk.bf16.gmra.mrb[28].mxu1 %vm1154_vm2, %v945_v19  ;;  %v1810_v19 = vmul.f32 %v6690_v50, %v7073_v37  ;;  %v590_v50 = vld [vmem:[%s8104_s2 + $0x678] sm:$0xff] }
 0x151   : > { %5291 = vmatprep.mubr.msk.bf16.mxu1 %vm1154_vm2, %v1837_v8  ;;  %v1586_v8 = vrot.slane %v6359_v17, 1  ;;  %v1838_v22 = vpack.c.bf16 %v1808_v13, %v1807_v27  ;;  %v7125_v13 = vsel %vm1612_vm1, %v1587_v56, %v1588_v29 }
 0x152   : > { %v7091_v2 = vpop.permute.xlu1 %2114  ;;  %v7093_v34 = vpop.permute.xlu0 %2109 }
 0x153   : > { %3333 = vperm.xlu1 %5805, %v589_v42   ;;  %3328 = vperm.xlu0 %5804, %v588_v61   ;;  %v2354_v42 = vsel %vm1203_vm0, %v6707_v48, 0  ;;  %v1839_v61 = vpack.c.bf16 %v1810_v19, %v1809_v49  ;;  %v7117_v33 = vsel %vm1612_vm1, %v1585_v25, %v1586_v8  ;;  %v7129_v27 = vsel %vm1612_vm1, %v1586_v8, %v1587_v56  ;;  %v593_v48 = vld [vmem:[%s8104_s2 + $0x690] sm:$0xff]  ;;  %v8357_v8 = vld [vmem:[#allocation27_spill] sm:$0xff] }
 0x154   : > { %v1812_v19 = vmul.f32 %v6734_v9, %v7117_v33  ;;  %v1811_v49 = vmul.f32 %v6736_v14, %v7121_v32  ;;  %v1814_v56 = vmul.f32 %v6756_v23, %v7125_v13  ;;  %v1590_v9 = vrot.slane %v6425_v21, 1  ;;  %v594_v23 = vld [vmem:[%s8104_s2 + $0x698] sm:$0xff] }
 0x155   : > { %v1591_v14 = vrot.slane %v6427_v3, 1 }
 0x156   : > { %v7109_v6 = vpop.permute.xlu1 %2124  ;;  %v7111_v54 = vpop.permute.xlu0 %2119 }
 0x157   : > { %3343 = vperm.xlu1 %5805, %v591_v63   ;;  %3338 = vperm.xlu0 %5804, %v590_v50   ;;  %v1813_v63 = vmul.f32 %v6758_v16, %v7129_v27  ;;  %v1589_v50 = vrot.slane %v6402_v45, 1 }
 0x158   : > { %5292 = vmatmul.mubr.msk.bf16.vlgmr.msra.gmra.mrb[0].mxu1 %vm1154_vm2, %v1838_v22 }
 0x159   : > { %5295 = vmatprep.mubr.msk.bf16.mxu1 %vm1154_vm2, %v1839_v61  ;;  %5324 = vmatpush3.bf16.msra.mxu1 %v2354_v42  ;;  %v1592_v42 = vrot.slane %v6434_v40, 1  ;;  %v595_v61 = vld [vmem:[%s8104_s2 + $0x6a0] sm:$0xff]  ;;  %v1841_v21 = vpack.c.bf16 %v1814_v56, %v1813_v63 }
 0x15a   : > { %v7143_v25 = vpop.permute.xlu1 %2134  ;;  %v7145_v22 = vpop.permute.xlu0 %2129  ;;  %5790 = vmatprep.subr.msk.bf16.mxu1 %vm1203_vm0, %v8357_v8  ;;  %v1840_v8 = vpack.c.bf16 %v1812_v19, %v1811_v49  ;;  %v7181_v19 = vsel %vm1612_vm1, %v1590_v9, %v1591_v14  ;;  %v597_v49 = vld [vmem:[%s8104_s2 + $0x6b0] sm:$0xff] }
 0x15b   : > { %3353 = vperm.xlu1 %5805, %v593_v48   ;;  %3348 = vperm.xlu0 %5804, %v592_v38   ;;  %v7169_v48 = vsel %vm1612_vm1, %v1589_v50, %v1590_v9  ;;  %v7173_v38 = vsel %vm1612_vm1, %v1588_v29, %v1589_v50  ;;  %v7177_v40 = vsel %vm1612_vm1, %v1591_v14, %v1592_v42  ;;  %v596_v29 = vld [vmem:[%s8104_s2 + $0x6a8] sm:$0xff] }
 0x15c   : > { %v1816_v56 = vmul.f32 %v6788_v46, %v7169_v48  ;;  %v1815_v63 = vmul.f32 %v6790_v18, %v7173_v38  ;;  %v1818_v14 = vmul.f32 %v6806_v31, %v7177_v40  ;;  %v1595_v46 = vrot.slane %v6470_v59, 1  ;;  %v598_v31 = vld [vmem:[%s8104_s2 + $0x6b8] sm:$0xff]  ;;  %v8365_v59 = vld [vmem:[#allocation38_spill] sm:$0xff] }
 0x15d   : > { %v1596_v18 = vrot.slane %v6489_v62, 1  ;;  %v1597_v17 = vrot.slane %v8365_v59, 1 }
 0x15e   : > { %v7163_v16 = vpop.permute.xlu1 %2144  ;;  %v7165_v45 = vpop.permute.xlu0 %2139  ;;  %v1842_v3 = vpack.c.bf16 %v1816_v56, %v1815_v63  ;;  %v601_v63 = vld [vmem:[%s8104_s2 + $0x6d0] sm:$0xff] }
 0x15f   : > { %3363 = vperm.xlu1 %5805, %v595_v61   ;;  %3358 = vperm.xlu0 %5804, %v594_v23   ;;  %v1817_v61 = vmul.f32 %v6808_v1, %v7181_v19  ;;  %v1593_v23 = vrot.slane %v6436_v7, 1  ;;  %v7227_v62 = vsel %vm1612_vm1, %v1595_v46, %v1596_v18 }
 0x160   : > { %5296 = vmatmul.mubr.msk.bf16.gmra.mrb[4].mxu1 %vm1154_vm2, %v1840_v8  ;;  %v599_v8 = vld [vmem:[%s8104_s2 + $0x6c0] sm:$0xff] }
 0x161   : > { %5299 = vmatprep.mubr.msk.bf16.mxu1 %vm1154_vm2, %v1841_v21  ;;  %v1594_v21 = vrot.slane %v6457_v44, 1  ;;  %v1843_v44 = vpack.c.bf16 %v1818_v14, %v1817_v61 }
 0x162   : > { %v7195_v50 = vpop.permute.xlu1 %2154  ;;  %v7197_v9 = vpop.permute.xlu0 %2149 }
 0x163   : > { %8358 = vst [vmem:[#allocation27_spill] sm:$0xff] %v7197_v9  ;;  %3373 = vperm.xlu1 %5805, %v597_v49   ;;  %3368 = vperm.xlu0 %5804, %v596_v29   ;;  %v7219_v49 = vsel %vm1612_vm1, %v1593_v23, %v1594_v21  ;;  %v7223_v29 = vsel %vm1612_vm1, %v1592_v42, %v1593_v23  ;;  %v600_v42 = vld [vmem:[%s8104_s2 + $0x6c8] sm:$0xff] }
 0x164   : > { %v7231_v56 = vsel %vm1612_vm1, %v1594_v21, %v1595_v46  ;;  %v1820_v14 = vmul.f32 %v6838_v5, %v7219_v49  ;;  %v1819_v61 = vmul.f32 %v6840_v12, %v7223_v29  ;;  %v8367_v5 = vld [vmem:[#allocation40_spill] sm:$0xff]  ;;  %v1600_v12 = vrot.slane %v6520_v43, 1 }
 0x166   : > { %v7213_v1 = vpop.permute.xlu1 %2164  ;;  %v7215_v7 = vpop.permute.xlu0 %2159 }
 0x167   : > { %8359 = vst [vmem:[#allocation81_spill] sm:$0xff] %v7213_v1  ;;  %8360 = vst [vmem:[#allocation82_spill] sm:$0xff] %v7215_v7  ;;  %3383 = vperm.xlu1 %5805, %v599_v8   ;;  %3378 = vperm.xlu0 %5804, %v598_v31   ;;  %v8364_v8 = vld [vmem:[#allocation70_spill] sm:$0xff]  ;;  %v1599_v7 = vrot.slane %v8367_v5, 1 }
 0x168   : > { %5300 = vmatmul.mubr.msk.bf16.gmra.mrb[8].mxu1 %vm1154_vm2, %v1842_v3  ;;  %v8363_v3 = vld [vmem:[#allocation69_spill] sm:$0xff]  ;;  %v1821_v31 = vmul.f32 %v8364_v8, %v7231_v56 }
 0x169   : > { %5303 = vmatprep.mubr.msk.bf16.mxu1 %vm1154_vm2, %v1843_v44  ;;  %v1822_v46 = vmul.f32 %v8363_v3, %v7227_v62  ;;  %v1598_v44 = vrot.slane %v8366_v55, 1  ;;  %v602_v3 = vld [vmem:[%s8104_s2 + $0x6d8] sm:$0xff]  ;;  %v7277_v43 = vsel %vm1612_vm1, %v1599_v7, %v1600_v12 }
 0x16a   : > { %v7245_v23 = vpop.permute.xlu1 %2174  ;;  %v7247_v21 = vpop.permute.xlu0 %2169 }
 0x16b   : > { %8361 = vst [vmem:[#allocation83_spill] sm:$0xff] %v7245_v23  ;;  %8362 = vst [vmem:[#allocation84_spill] sm:$0xff] %v7247_v21  ;;  %3393 = vperm.xlu1 %5805, %v601_v63   ;;  %3388 = vperm.xlu0 %5804, %v600_v42   ;;  %v603_v21 = vld [vmem:[%s8104_s2 + $0x6e0] sm:$0xff]  ;;  %v1844_v23 = vpack.c.bf16 %v1820_v14, %v1819_v61  ;;  %v1845_v55 = vpack.c.bf16 %v1822_v46, %v1821_v31  ;;  %v605_v61 = vld [vmem:[%s8104_s2 + $0x6f0] sm:$0xff] }
 0x16c   : > { %v7269_v63 = vsel %vm1612_vm1, %v1597_v17, %v1598_v44  ;;  %v7273_v42 = vsel %vm1612_vm1, %v1596_v18, %v1597_v17  ;;  %v7281_v14 = vsel %vm1612_vm1, %v1598_v44, %v1599_v7  ;;  %v604_v17 = vld [vmem:[%s8104_s2 + $0x6e8] sm:$0xff]  ;;  %v1601_v7 = vrot.slane %v8322_v39, 1 }
 0x16d   : > { %v1824_v18 = vmul.f32 %v6888_v53, %v7269_v63  ;;  %v8370_v46 = vld [vmem:[#allocation43_spill] sm:$0xff]  ;;  %v1604_v53 = vrot.slane %v6579_v47, 1  ;;  %v1608_v47 = vrot.slane %v6615_v41, 1 }
 0x16e   : > { %v7263_v8 = vpop.permute.xlu1 %2184  ;;  %v7265_v59 = vpop.permute.xlu0 %2179 }
 0x16f   : > { %8368 = vst [vmem:[#allocation69_spill] sm:$0xff] %v7263_v8  ;;  %8369 = vst [vmem:[#allocation70_spill] sm:$0xff] %v7265_v59  ;;  %3403 = vperm.xlu1 %5805, %v603_v21   ;;  %3398 = vperm.xlu0 %5804, %v602_v3   ;;  %v1823_v21 = vmul.f32 %v6890_v58, %v7273_v42  ;;  %v8373_v3 = vld [vmem:[#allocation2_spill] sm:$0xff]  ;;  %v8374_v59 = vld [vmem:[#allocation3_spill] sm:$0xff] }
 0x170   : > { %5304 = vmatmul.mubr.msk.bf16.gmra.mrb[12].mxu1 %vm1154_vm2, %v1844_v23  ;;  %v1602_v23 = vrot.slane %v8370_v46, 1  ;;  %v1826_v5 = vmul.f32 %v8373_v3, %v7277_v43  ;;  %v8375_v8 = vld [vmem:[#allocation44_spill] sm:$0xff]  ;;  %v607_v58 = vld [vmem:[%s8104_s2 + $0x700] sm:$0xff]  ;;  %v606_v46 = vld [vmem:[%s8104_s2 + $0x6f8] sm:$0xff] }
 0x171   : > { %5307 = vmatprep.mubr.msk.bf16.mxu1 %vm1154_vm2, %v1845_v55  ;;  %v1825_v55 = vmul.f32 %v8374_v59, %v7281_v14  ;;  %v1603_v1 = vrot.slane %v8375_v8, 1  ;;  %v1846_v39 = vpack.c.bf16 %v1824_v18, %v1823_v21  ;;  %v1605_v21 = vrot.slane %v6581_v11, 1  ;;  %v8383_v11 = vld [vmem:[#allocation9_spill] sm:$0xff] }
 0x172   : > { %v7297_v31 = vpop.permute.xlu1 %2194  ;;  %v7299_v44 = vpop.permute.xlu0 %2189  ;;  %v7315_v3 = vsel %vm1612_vm1, %v1601_v7, %v1602_v23 }
 0x173   : > { %8371 = vst [vmem:[#allocation85_spill] sm:$0xff] %v7297_v31  ;;  %8372 = vst [vmem:[#allocation86_spill] sm:$0xff] %v7299_v44  ;;  %3413 = vperm.xlu1 %5805, %v605_v61   ;;  %3408 = vperm.xlu0 %5804, %v604_v17   ;;  %v1847_v8 = vpack.c.bf16 %v1826_v5, %v1825_v55  ;;  %v7321_v61 = vsel %vm1612_vm1, %v1600_v12, %v1601_v7  ;;  %v609_v5 = vld [vmem:[%s8104_s2 + $0x710] sm:$0xff]  ;;  %v608_v12 = vld [vmem:[%s8104_s2 + $0x708] sm:$0xff]  ;;  %v1606_v7 = vrot.slane %v6593_v52, 1 }
 0x174   : > { %8377 = vst [vmem:[#allocation3_spill] sm:$0xff] %v7321_v61  ;;  %v7325_v17 = vsel %vm1612_vm1, %v1603_v1, %v1604_v53  ;;  %v7329_v18 = vsel %vm1612_vm1, %v1602_v23, %v1603_v1  ;;  %v8380_v1 = vld [vmem:[#allocation6_spill] sm:$0xff] }
 0x175   : > { %8378 = vst [vmem:[#allocation87_spill] sm:$0xff] %v7325_v17  ;;  %8379 = vst [vmem:[#allocation88_spill] sm:$0xff] %v7329_v18  ;;  %v1828_v23 = vmul.f32 %v8380_v1, %v7315_v3  ;;  %v1829_v52 = vmul.f32 %v8383_v11, %v7329_v18  ;;  %v611_v1 = vld [vmem:[%s8104_s2 + $0x720] sm:$0xff]  ;;  %v7365_v11 = vsel %vm1612_vm1, %v1604_v53, %v1605_v21  ;;  %v613_v53 = vld [vmem:[%s8104_s2 + $0x730] sm:$0xff] }
 0x176   : > { %v2812_v59 = vpop.permute.xlu1 %2811  ;;  %v7317_v44 = vpop.permute.xlu0 %2199 }
 0x177   : > { %8376 = vst [vmem:[#allocation2_spill] sm:$0xff] %v7317_v44  ;;  %3715 = vperm.xlu1 %5805, %v607_v58   ;;  %3418 = vperm.xlu0 %5804, %v606_v46   ;;  %v1607_v46 = vrot.slane %v6595_v20, 1  ;;  %v8382_v58 = vld [vmem:[#allocation8_spill] sm:$0xff]  ;;  %v2969_v20 = vmul.f32 %v2812_v59, %v7069_v10 }
 0x178   : > { %5308 = vmatmul.mubr.msk.bf16.gmra.mrb[16].mxu1 %vm1154_vm2, %v1846_v39  ;;  %v8381_v39 = vld [vmem:[#allocation7_spill] sm:$0xff]  ;;  %v1830_v44 = vmul.f32 %v8382_v58, %v7325_v17  ;;  %v7361_v17 = vsel %vm1612_vm1, %v1605_v21, %v1606_v7  ;;  %v1831_v21 = vmul.f32 %v6990_v35, %v7365_v11  ;;  %v614_v35 = vld [vmem:[%s8104_s2 + $0x738] sm:$0xff] }
 0x179   : > { %5311 = vmatprep.mubr.msk.bf16.mxu1 %vm1154_vm2, %v1847_v8  ;;  %v1827_v55 = vmul.f32 %v8381_v39, %v7321_v61  ;;  %v610_v39 = vld [vmem:[%s8104_s2 + $0x718] sm:$0xff] }
 0x17a   : > { %v2822_v31 = vpop.permute.xlu1 %2821  ;;  %v2817_v9 = vpop.permute.xlu0 %2816 }
 0x17b   : > { %v2970_v8 = vmul.f32 %v2817_v9, %v7065_v51  ;;  %3725 = vperm.xlu1 %5805, %v609_v5   ;;  %3720 = vperm.xlu0 %5804, %v608_v12   ;;  %v1848_v41 = vpack.c.bf16 %v1828_v23, %v1827_v55  ;;  %v7369_v9 = vsel %vm1612_vm1, %v1607_v46, %v1608_v47  ;;  %v8386_v55 = vld [vmem:[#allocation60_spill] sm:$0xff]  ;;  %v8416_v51 = vld [vmem:[#allocation70_spill] sm:$0xff] }
 0x17c   : > { %8384 = vst [vmem:[#allocation6_spill] sm:$0xff] %v7369_v9  ;;  %v1849_v12 = vpack.c.bf16 %v1830_v44, %v1829_v52  ;;  %v2971_v10 = vmul.f32 %v2822_v31, %v7077_v30  ;;  %v7375_v23 = vsel %vm1612_vm1, %v1606_v7, %v1607_v46  ;;  %v612_v52 = vld [vmem:[%s8104_s2 + $0x728] sm:$0xff]  ;;  %v1832_v44 = vmul.f32 %v6988_v15, %v7361_v17 }
 0x17d   : > { %v3001_v58 = vpack.c.bf16 %v2970_v8, %v2969_v20  ;;  %8385 = vst [vmem:[#allocation7_spill] sm:$0xff] %v7375_v23  ;;  %v3518_v8 = vsel %vm1203_vm0, %v8386_v55, 0  ;;  %v7401_v15 = vld [vmem:[%s8103_s1 + $0xe] sm:$0x3] }
 0x17e   : > { %v2832_v59 = vpop.permute.xlu1 %2831  ;;  %v2827_v5 = vpop.permute.xlu0 %2826 }
 0x17f   : > { %v2972_v20 = vmul.f32 %v2827_v5, %v7073_v37  ;;  %3735 = vperm.xlu1 %5805, %v611_v1   ;;  %3730 = vperm.xlu0 %5804, %v610_v39   ;;  %v1833_v1 = vmul.f32 %v7007_v4, %v7375_v23 }
 0x180   : > { %5312 = vmatmul.mubr.msk.bf16.gmra.mrb[20].mxu1 %vm1154_vm2, %v1848_v41  ;;  %5393 = vmatprep.mubr.msk.bf16.mxu0 %vm1154_vm2, %v3001_v58  ;;  %v1834_v41 = vmul.f32 %v7005_v57, %v7369_v9  ;;  %v615_v57 = vld [vmem:[%s8104_s2 + $0x740] sm:$0xff]  ;;  %v1850_v58 = vpack.c.bf16 %v1832_v44, %v1831_v21  ;;  %v8389_v21 = vld [vmem:[#allocation17_spill] sm:$0xff] }
 0x181   : > { %v3002_v31 = vpack.c.bf16 %v2972_v20, %v2971_v10  ;;  %5315 = vmatprep.mubr.msk.bf16.mxu1 %vm1154_vm2, %v1849_v12  ;;  %v2973_v10 = vmul.f32 %v2832_v59, %v7121_v32  ;;  %v8387_v59 = vrot.slane %v6246_v24, 1 }
 0x182   : > { %v2842_v7 = vpop.permute.xlu1 %2841  ;;  %v2837_v46 = vpop.permute.xlu0 %2836 }
 0x183   : > { %v2974_v39 = vmul.f32 %v2837_v46, %v7117_v33  ;;  %3745 = vperm.xlu1 %5805, %v613_v53   ;;  %3740 = vperm.xlu0 %5804, %v612_v52   ;;  %v7414_v5 = vsel %vm1612_vm1, %v1608_v47, %v8387_v59  ;;  %v1851_v53 = vpack.c.bf16 %v1834_v41, %v1833_v1  ;;  %v616_v47 = vld [vmem:[%s8104_s2 + $0x748] sm:$0xff]  ;;  %v8390_v46 = vld [vmem:[#allocation52_spill] sm:$0xff] }
 0x184   : > { %5394 = vmatmul.mubr.msk.bf16.vlgmr.msra.gmra.mrb[0].mxu0 %vm1154_vm2, %v3002_v31  ;;  %8388 = vst [vmem:[#allocation8_spill] sm:$0xff] %v7414_v5  ;;  %v2975_v52 = vmul.f32 %v2842_v7, %v7129_v27  ;;  %v1836_v41 = vmul.f32 %v7041_v60, %v8389_v21  ;;  %v1835_v7 = vmul.f32 %v7043_v26, %v7414_v5  ;;  %v619_v60 = vld [vmem:[%s8104_s2 + $0x760] sm:$0xff]  ;;  %v618_v26 = vld [vmem:[%s8104_s2 + $0x758] sm:$0xff] }
 0x185   : > { %v3003_v4 = vpack.c.bf16 %v2974_v39, %v2973_v10  ;;  %5426 = vmatpush3.bf16.msra.mxu0 %v3518_v8  ;;  %v2258_v55 = vmul.f32 %v7059_v0, %v8390_v46  ;;  %v8391_v10 = vld [vmem:[#allocation55_spill] sm:$0xff] }
 0x186   : > { %v2852_v12 = vpop.permute.xlu1 %2851  ;;  %v2847_v20 = vpop.permute.xlu0 %2846  ;;  %5793 = vmatprep.subr.msk.bf16.mxu0 %vm1203_vm0, %v7401_v15  ;;  %v2257_v39 = vmul.f32 %v7061_v36, %v8391_v10 }
 0x187   : > { %v2976_v31 = vmul.f32 %v2847_v20, %v7125_v13  ;;  %3755 = vperm.xlu1 %5805, %v615_v57   ;;  %3750 = vperm.xlu0 %5804, %v614_v35   ;;  %v2977_v57 = vmul.f32 %v2852_v12, %v7173_v38 }
 0x188   : > { %5316 = vmatmul.mubr.msk.bf16.gmra.mrb[24].mxu1 %vm1154_vm2, %v1850_v58  ;;  %5397 = vmatprep.mubr.msk.bf16.mxu0 %vm1154_vm2, %v3003_v4  ;;  %v1852_v4 = vpack.c.bf16 %v1836_v41, %v1835_v7  ;;  %v2289_v59 = vpack.c.bf16 %v2258_v55, %v2257_v39  ;;  %v8394_v7 = vld [vmem:[#allocation56_spill] sm:$0xff]  ;;  %v8395_v39 = vld [vmem:[#allocation57_spill] sm:$0xff] }
 0x189   : > { %v3004_v44 = vpack.c.bf16 %v2976_v31, %v2975_v52  ;;  %5319 = vmatprep.mubr.msk.bf16.mxu1 %vm1154_vm2, %v1851_v53  ;;  %v621_v53 = vld [vmem:[%s8104_s2 + $0x770] sm:$0xff]  ;;  %v620_v52 = vld [vmem:[%s8104_s2 + $0x768] sm:$0xff]  ;;  %v2262_v55 = vmul.f32 %v7109_v6, %v8394_v7 }
 0x18a   : > { %v2862_v8 = vpop.permute.xlu1 %2861  ;;  %v2857_v1 = vpop.permute.xlu0 %2856 }
 0x18b   : > { %v2978_v35 = vmul.f32 %v2857_v1, %v7169_v48  ;;  %3765 = vperm.xlu1 %5805, %v617_v28   ;;  %3760 = vperm.xlu0 %5804, %v616_v47   ;;  %v2979_v12 = vmul.f32 %v2862_v8, %v7181_v19  ;;  %v8392_v28 = vld [vmem:[#allocation53_spill] sm:$0xff] }
 0x18c   : > { %5398 = vmatmul.mubr.msk.bf16.gmra.mrb[4].mxu0 %vm1154_vm2, %v3004_v44  ;;  %v2260_v47 = vmul.f32 %v7091_v2, %v8392_v28  ;;  %v8393_v44 = vld [vmem:[#allocation54_spill] sm:$0xff] }
 0x18d   : > { %v3005_v0 = vpack.c.bf16 %v2978_v35, %v2977_v57  ;;  %v2259_v41 = vmul.f32 %v7093_v34, %v8393_v44  ;;  %v2261_v57 = vmul.f32 %v7111_v54, %v8395_v39  ;;  %v623_v2 = vld [vmem:[%s8104_s2 + $0x780] sm:$0xff]  ;;  %v622_v34 = vld [vmem:[%s8104_s2 + $0x778] sm:$0xff] }
 0x18e   : > { %v2872_v58 = vpop.permute.xlu1 %2871  ;;  %v2867_v36 = vpop.permute.xlu0 %2866 }
 0x18f   : > { %v2980_v20 = vmul.f32 %v2867_v36, %v7177_v40  ;;  %3775 = vperm.xlu1 %5805, %v619_v60   ;;  %3770 = vperm.xlu0 %5804, %v618_v26   ;;  %v2981_v35 = vmul.f32 %v2872_v58, %v7223_v29  ;;  %v2290_v26 = vpack.c.bf16 %v2260_v47, %v2259_v41  ;;  %v8398_v47 = vld [vmem:[#allocation59_spill] sm:$0xff] }
 0x190   : > { %5320 = vmatmul.mubr.msk.bf16.gmra.mrb[28].mxu1 %vm1154_vm2, %v1852_v4  ;;  %5401 = vmatprep.mubr.msk.bf16.mxu0 %vm1154_vm2, %v3005_v0  ;;  %v2291_v4 = vpack.c.bf16 %v2262_v55, %v2261_v57  ;;  %v2263_v41 = vmul.f32 %v7145_v22, %v8398_v47  ;;  %v8399_v55 = vld [vmem:[#allocation61_spill] sm:$0xff] }
 0x191   : > { %v3006_v31 = vpack.c.bf16 %v2980_v20, %v2979_v12  ;;  %5325 = vmatprep.mubr.msk.bf16.mxu1 %vm1154_vm2, %v2289_v59  ;;  %v625_v59 = vld [vmem:[%s8104_s2 + $0x790] sm:$0xff]  ;;  %v624_v12 = vld [vmem:[%s8104_s2 + $0x788] sm:$0xff]  ;;  %v626_v22 = vld [vmem:[%s8104_s2 + $0x798] sm:$0xff] }
 0x192   : > { %v2882_v8 = vpop.permute.xlu1 %2881  ;;  %v2877_v1 = vpop.permute.xlu0 %2876 }
 0x193   : > { %v2982_v60 = vmul.f32 %v2877_v1, %v7219_v49  ;;  %3785 = vperm.xlu1 %5805, %v621_v53   ;;  %3780 = vperm.xlu0 %5804, %v620_v52   ;;  %v2983_v58 = vmul.f32 %v2882_v8, %v7231_v56  ;;  %v8396_v53 = vld [vmem:[#allocation28_spill] sm:$0xff]  ;;  %v8397_v52 = vld [vmem:[#allocation58_spill] sm:$0xff]  ;;  %v2266_v8 = vmul.f32 %v7163_v16, %v8399_v55 }
 0x194   : > { %5402 = vmatmul.mubr.msk.bf16.gmra.mrb[8].mxu0 %vm1154_vm2, %v3006_v31  ;;  %v2264_v31 = vmul.f32 %v7143_v25, %v8397_v52  ;;  %v627_v25 = vld [vmem:[%s8104_s2 + $0x7a0] sm:$0xff] }
 0x195   : > { %v3007_v6 = vpack.c.bf16 %v2982_v60, %v2981_v35  ;;  %v8400_v35 = vld [vmem:[#allocation62_spill] sm:$0xff] }
 0x196   : > { %v2892_v0 = vpop.permute.xlu1 %2891  ;;  %v2887_v54 = vpop.permute.xlu0 %2886  ;;  %v2265_v60 = vmul.f32 %v7165_v45, %v8400_v35 }
 0x197   : > { %v2984_v36 = vmul.f32 %v2887_v54, %v7227_v62  ;;  %3795 = vperm.xlu1 %5805, %v623_v2   ;;  %3790 = vperm.xlu0 %5804, %v622_v34   ;;  %v2985_v2 = vmul.f32 %v2892_v0, %v7273_v42 }
 0x198   : > { %5326 = vmatmul.mubr.msk.bf16.vlgmr.msra.gmra.mrb[0].mxu1 %vm1154_vm2, %v2290_v26  ;;  %5405 = vmatprep.mubr.msk.bf16.mxu0 %vm1154_vm2, %v3007_v6  ;;  %v2292_v6 = vpack.c.bf16 %v2264_v31, %v2263_v41  ;;  %v2293_v54 = vpack.c.bf16 %v2266_v8, %v2265_v60  ;;  %v8403_v31 = vld [vmem:[#allocation27_spill] sm:$0xff]  ;;  %v8404_v8 = vld [vmem:[#allocation65_spill] sm:$0xff] }
 0x199   : > { %v3008_v20 = vpack.c.bf16 %v2984_v36, %v2983_v58  ;;  %5329 = vmatprep.mubr.msk.bf16.mxu1 %vm1154_vm2, %v2291_v4  ;;  %5528 = vmatpush3.bf16.msra.mxu1 %v8396_v53  ;;  %v629_v58 = vld [vmem:[%s8104_s2 + $0x7b0] sm:$0xff]  ;;  %v628_v36 = vld [vmem:[%s8104_s2 + $0x7a8] sm:$0xff] }
 0x19a   : > { %v2902_v1 = vpop.permute.xlu1 %2901  ;;  %v2897_v57 = vpop.permute.xlu0 %2896  ;;  %v8402_v53 = vld [vmem:[#allocation64_spill] sm:$0xff] }
 0x19b   : > { %v2986_v34 = vmul.f32 %v2897_v57, %v7269_v63  ;;  %3805 = vperm.xlu1 %5805, %v625_v59   ;;  %3800 = vperm.xlu0 %5804, %v624_v12   ;;  %v2987_v0 = vmul.f32 %v2902_v1, %v7281_v14  ;;  %v8401_v12 = vld [vmem:[#allocation63_spill] sm:$0xff]  ;;  %v2267_v41 = vmul.f32 %v8403_v31, %v8402_v53  ;;  %v8405_v1 = vld [vmem:[#allocation81_spill] sm:$0xff] }
 0x19c   : > { %5406 = vmatmul.mubr.msk.bf16.gmra.mrb[12].mxu0 %vm1154_vm2, %v3008_v20  ;;  %v2268_v20 = vmul.f32 %v7195_v50, %v8401_v12  ;;  %v2270_v57 = vmul.f32 %v8405_v1, %v8404_v8  ;;  %v631_v50 = vld [vmem:[%s8104_s2 + $0x7c0] sm:$0xff] }
 0x19d   : > { %v3009_v16 = vpack.c.bf16 %v2986_v34, %v2985_v2  ;;  %v8406_v34 = vld [vmem:[#allocation66_spill] sm:$0xff] }
 0x19e   : > { %v2912_v26 = vpop.permute.xlu1 %2911  ;;  %v2907_v45 = vpop.permute.xlu0 %2906 }
 0x19f   : > { %v2988_v4 = vmul.f32 %v2907_v45, %v7277_v43  ;;  %3815 = vperm.xlu1 %5805, %v627_v25   ;;  %3810 = vperm.xlu0 %5804, %v626_v22   ;;  %v8407_v25 = vld [vmem:[#allocation82_spill] sm:$0xff]  ;;  %v630_v45 = vld [vmem:[%s8104_s2 + $0x7b8] sm:$0xff] }
 0x1a0   : > { %5330 = vmatmul.mubr.msk.bf16.gmra.mrb[4].mxu1 %vm1154_vm2, %v2292_v6  ;;  %5409 = vmatprep.mubr.msk.bf16.mxu0 %vm1154_vm2, %v3009_v16  ;;  %v2269_v22 = vmul.f32 %v8407_v25, %v8406_v34  ;;  %v2989_v16 = vmul.f32 %v2912_v26, %v7321_v61  ;;  %v8411_v25 = vld [vmem:[#allocation68_spill] sm:$0xff] }
 0x1a1   : > { %v3010_v59 = vpack.c.bf16 %v2988_v4, %v2987_v0  ;;  %5333 = vmatprep.mubr.msk.bf16.mxu1 %vm1154_vm2, %v2293_v54  ;;  %v2294_v0 = vpack.c.bf16 %v2268_v20, %v2267_v41  ;;  %v8409_v41 = vld [vmem:[#allocation67_spill] sm:$0xff] }
 0x1a2   : > { %v2922_v60 = vpop.permute.xlu1 %2921  ;;  %v2917_v2 = vpop.permute.xlu0 %2916  ;;  %v2295_v1 = vpack.c.bf16 %v2270_v57, %v2269_v22  ;;  %v8410_v57 = vld [vmem:[#allocation83_spill] sm:$0xff]  ;;  %v8412_v22 = vld [vmem:[#allocation84_spill] sm:$0xff] }
 0x1a3   : > { %v2990_v6 = vmul.f32 %v2917_v2, %v7315_v3  ;;  %3825 = vperm.xlu1 %5805, %v629_v58   ;;  %3820 = vperm.xlu0 %5804, %v628_v36   ;;  %v2991_v26 = vmul.f32 %v2922_v60, %v7329_v18  ;;  %v8408_v2 = vld [vmem:[#allocation87_spill] sm:$0xff]  ;;  %v633_v36 = vld [vmem:[%s8104_s2 + $0x7d0] sm:$0xff]  ;;  %v2272_v60 = vmul.f32 %v8410_v57, %v8409_v41 }
 0x1a4   : > { %5410 = vmatmul.mubr.msk.bf16.gmra.mrb[16].mxu0 %vm1154_vm2, %v3010_v59  ;;  %v632_v59 = vld [vmem:[%s8104_s2 + $0x7c8] sm:$0xff] }
 0x1a5   : > { %v3011_v54 = vpack.c.bf16 %v2990_v6, %v2989_v16  ;;  %v2271_v16 = vmul.f32 %v8412_v22, %v8411_v25  ;;  %v8413_v6 = vld [vmem:[#allocation71_spill] sm:$0xff] }
 0x1a6   : > { %v2932_v4 = vpop.permute.xlu1 %2931  ;;  %v2927_v31 = vpop.permute.xlu0 %2926 }
 0x1a7   : > { %v2992_v58 = vmul.f32 %v2927_v31, %v8408_v2  ;;  %3835 = vperm.xlu1 %5805, %v631_v50   ;;  %3830 = vperm.xlu0 %5804, %v630_v45   ;;  %v8414_v50 = vld [vmem:[#allocation69_spill] sm:$0xff]  ;;  %v8415_v31 = vld [vmem:[#allocation72_spill] sm:$0xff]  ;;  %v2993_v2 = vmul.f32 %v2932_v4, %v7365_v11  ;;  %v2296_v22 = vpack.c.bf16 %v2272_v60, %v2271_v16 }
 0x1a8   : > { %5334 = vmatmul.mubr.msk.bf16.gmra.mrb[8].mxu1 %vm1154_vm2, %v2294_v0  ;;  %5413 = vmatprep.mubr.msk.bf16.mxu0 %vm1154_vm2, %v3011_v54  ;;  %v2274_v45 = vmul.f32 %v8414_v50, %v8413_v6  ;;  %v2273_v18 = vmul.f32 %v8416_v51, %v8415_v31  ;;  %v8418_v60 = vld [vmem:[#allocation85_spill] sm:$0xff] }
 0x1a9   : > { %v3012_v20 = vpack.c.bf16 %v2992_v58, %v2991_v26  ;;  %5337 = vmatprep.mubr.msk.bf16.mxu1 %vm1154_vm2, %v2295_v1  ;;  %v635_v1 = vld [vmem:[%s8104_s2 + $0x7e0] sm:$0xff]  ;;  %v634_v58 = vld [vmem:[%s8104_s2 + $0x7d8] sm:$0xff] }
 0x1aa   : > { %v2942_v54 = vpop.permute.xlu1 %2941  ;;  %v2937_v0 = vpop.permute.xlu0 %2936  ;;  %v2297_v61 = vpack.c.bf16 %v2274_v45, %v2273_v18  ;;  %v8417_v18 = vld [vmem:[#allocation73_spill] sm:$0xff]  ;;  %v8419_v45 = vld [vmem:[#allocation74_spill] sm:$0xff] }
 0x1ab   : > { %v2994_v26 = vmul.f32 %v2937_v0, %v7361_v17  ;;  %3845 = vperm.xlu1 %5805, %v633_v36   ;;  %3840 = vperm.xlu0 %5804, %v632_v59   ;;  %v2995_v4 = vmul.f32 %v2942_v54, %v7375_v23  ;;  %v637_v59 = vld [vmem:[%s8104_s2 + $0x7f0] sm:$0xff]  ;;  %v2276_v16 = vmul.f32 %v8418_v60, %v8417_v18  ;;  %v8420_v54 = vld [vmem:[#allocation86_spill] sm:$0xff] }
 0x1ac   : > { %5414 = vmatmul.mubr.msk.bf16.gmra.mrb[20].mxu0 %vm1154_vm2, %v3012_v20  ;;  %v2275_v0 = vmul.f32 %v8420_v54, %v8419_v45  ;;  %v8421_v54 = vld [vmem:[#allocation13_spill] sm:$0xff] }
 0x1ad   : > { %v3013_v57 = vpack.c.bf16 %v2994_v26, %v2993_v2  ;;  %v636_v2 = vld [vmem:[%s8104_s2 + $0x7e8] sm:$0xff] }
 0x1ae   : > { %v2952_v50 = vpop.permute.xlu1 %2951  ;;  %v2947_v51 = vpop.permute.xlu0 %2946 }
 0x1af   : > { %v2996_v36 = vmul.f32 %v2947_v51, %v7369_v9  ;;  %3855 = vperm.xlu1 %5805, %v635_v1   ;;  %3850 = vperm.xlu0 %5804, %v634_v58   ;;  %v2997_v58 = vmul.f32 %v2952_v50, %v7414_v5  ;;  %v8422_v5 = vld [vmem:[#allocation12_spill] sm:$0xff]  ;;  %v8463_v9 = vld [vmem:[#allocation18_spill] sm:$0xff] }
 0x1b0   : > { %5338 = vmatmul.mubr.msk.bf16.gmra.mrb[12].mxu1 %vm1154_vm2, %v2296_v22  ;;  %5417 = vmatprep.mubr.msk.bf16.mxu0 %vm1154_vm2, %v3013_v57  ;;  %v638_v22 = vld [vmem:[%s8104_s2 + $0x7f8] sm:$0xff] }
 0x1b1   : > { %v3014_v20 = vpack.c.bf16 %v2996_v36, %v2995_v4  ;;  %5341 = vmatprep.mubr.msk.bf16.mxu1 %vm1154_vm2, %v2297_v61  ;;  %v639_v61 = vld [vmem:[%s8104_s2 + $0x800] sm:$0xff]  ;;  %v2298_v4 = vpack.c.bf16 %v2276_v16, %v2275_v0 }
 0x1b2   : > { %v2962_v26 = vpop.permute.xlu1 %2961  ;;  %v2957_v1 = vpop.permute.xlu0 %2956 }
 0x1b3   : > { %v2998_v57 = vmul.f32 %v2957_v1, %v8389_v21  ;;  %3865 = vperm.xlu1 %5805, %v637_v59   ;;  %3860 = vperm.xlu0 %5804, %v636_v2   ;;  %v2999_v50 = vmul.f32 %v2962_v26, %v8421_v54  ;;  %v641_v59 = vld [vmem:[%s8104_s2 + $0x810] sm:$0xff]  ;;  %v640_v2 = vld [vmem:[%s8104_s2 + $0x808] sm:$0xff] }
 0x1b4   : > { %5418 = vmatmul.mubr.msk.bf16.gmra.mrb[24].mxu0 %vm1154_vm2, %v3014_v20 }
 0x1b5   : > { %v3015_v51 = vpack.c.bf16 %v2998_v57, %v2997_v58  ;;  %v532_v57 = vld [vmem:[%s8104_s2 + $0x3a8] sm:$0xff] }
 0x1b6   : > { %v3264_v36 = vpop.permute.xlu1 %3263  ;;  %v2967_v60 = vpop.permute.xlu0 %2966 }
 0x1b7   : > { %v3000_v1 = vmul.f32 %v2967_v60, %v8422_v5  ;;  %4167 = vperm.xlu1 %5805, %v639_v61   ;;  %3870 = vperm.xlu0 %5804, %v638_v22   ;;  %v3421_v26 = vmul.f32 %v3264_v36, %v8393_v44  ;;  %v642_v61 = vld [vmem:[%s8104_s2 + $0x818] sm:$0xff]  ;;  %v643_v36 = vld [vmem:[%s8104_s2 + $0x820] sm:$0xff]  ;;  %v8460_v5 = vld [vmem:[#allocation48_spill] sm:$0xff] }
 0x1b8   : > { %5342 = vmatmul.mubr.msk.bf16.gmra.mrb[16].mxu1 %vm1154_vm2, %v2298_v4  ;;  %5421 = vmatprep.mubr.msk.bf16.mxu0 %vm1154_vm2, %v3015_v51 }
 0x1b9   : > { %v3016_v20 = vpack.c.bf16 %v3000_v1, %v2999_v50 }
 0x1ba   : > { %v3274_v16 = vpop.permute.xlu1 %3273  ;;  %v3269_v0 = vpop.permute.xlu0 %3268 }
 0x1bb   : > { %v3422_v58 = vmul.f32 %v3269_v0, %v8392_v28  ;;  %4177 = vperm.xlu1 %5805, %v641_v59   ;;  %4172 = vperm.xlu0 %5804, %v640_v2   ;;  %v3423_v60 = vmul.f32 %v3274_v16, %v8395_v39  ;;  %v644_v28 = vld [vmem:[%s8104_s2 + $0x828] sm:$0xff]  ;;  %v3970_v39 = vsel %vm1203_vm0, %v7401_v15, 0  ;;  %v534_v16 = vld [vmem:[%s8104_s2 + $0x3b8] sm:$0xff]  ;;  %v533_v15 = vld [vmem:[%s8104_s2 + $0x3b0] sm:$0xff] }
 0x1bc   : > { %5422 = vmatmul.mubr.msk.bf16.gmra.mrb[28].mxu0 %vm1154_vm2, %v3016_v20  ;;  %v7618_v20 = vld [vmem:[%s8103_s1 + $0x10] sm:$0x3] }
 0x1bd   : > { %v3453_v22 = vpack.c.bf16 %v3422_v58, %v3421_v26 }
 0x1be   : > { %v3284_v51 = vpop.permute.xlu1 %3283  ;;  %v3279_v4 = vpop.permute.xlu0 %3278 }
 0x1bf   : > { %v3424_v44 = vmul.f32 %v3279_v4, %v8394_v7  ;;  %2204 = vperm.xlu1 %5805, %v532_v57   ;;  %4182 = vperm.xlu0 %5804, %v642_v61   ;;  %v3425_v7 = vmul.f32 %v3284_v51, %v8398_v47  ;;  %v646_v57 = vld [vmem:[%s8104_s2 + $0x838] sm:$0xff]  ;;  %v645_v61 = vld [vmem:[%s8104_s2 + $0x830] sm:$0xff] }
 0x1c0   : > { %5427 = vmatprep.mubr.msk.bf16.mxu0 %vm1154_vm2, %v3453_v22 }
 0x1c1   : > { %v3454_v50 = vpack.c.bf16 %v3424_v44, %v3423_v60  ;;  %v535_v44 = vld [vmem:[%s8104_s2 + $0x3c0] sm:$0xff] }
 0x1c2   : > { %v3294_v1 = vpop.permute.xlu1 %3293  ;;  %v3289_v59 = vpop.permute.xlu0 %3288 }
 0x1c3   : > { %v3426_v2 = vmul.f32 %v3289_v59, %v8397_v52  ;;  %4192 = vperm.xlu1 %5805, %v644_v28   ;;  %4187 = vperm.xlu0 %5804, %v643_v36   ;;  %v3427_v26 = vmul.f32 %v3294_v1, %v8400_v35  ;;  %v647_v59 = vld [vmem:[%s8104_s2 + $0x840] sm:$0xff] }
 0x1c4   : > { %5428 = vmatmul.mubr.msk.bf16.vlgmr.msra.gmra.mrb[0].mxu0 %vm1154_vm2, %v3454_v50 }
 0x1c5   : > { %v3455_v47 = vpack.c.bf16 %v3426_v2, %v3425_v7  ;;  %5460 = vmatpush3.bf16.msra.mxu0 %v3970_v39 }
 0x1c6   : > { %v3304_v52 = vpop.permute.xlu1 %3303  ;;  %v3299_v0 = vpop.permute.xlu0 %3298  ;;  %5794 = vmatprep.subr.msk.bf16.mxu0 %vm1203_vm0, %v7618_v20 }
 0x1c7   : > { %v3428_v58 = vmul.f32 %v3299_v0, %v8399_v55  ;;  %2214 = vperm.xlu1 %5805, %v534_v16   ;;  %2209 = vperm.xlu0 %5804, %v533_v15   ;;  %v3429_v60 = vmul.f32 %v3304_v52, %v8402_v53  ;;  %v536_v55 = vld [vmem:[%s8104_s2 + $0x3c8] sm:$0xff]  ;;  %v537_v15 = vld [vmem:[%s8104_s2 + $0x3d0] sm:$0xff] }
 0x1c8   : > { %5431 = vmatprep.mubr.msk.bf16.mxu0 %vm1154_vm2, %v3455_v47 }
 0x1c9   : > { %v3456_v22 = vpack.c.bf16 %v3428_v58, %v3427_v26  ;;  %v649_v58 = vld [vmem:[%s8104_s2 + $0x850] sm:$0xff] }
 0x1ca   : > { %v3314_v51 = vpop.permute.xlu1 %3313  ;;  %v3309_v4 = vpop.permute.xlu0 %3308 }
 0x1cb   : > { %v3430_v35 = vmul.f32 %v3309_v4, %v8401_v12  ;;  %4202 = vperm.xlu1 %5805, %v646_v57   ;;  %4197 = vperm.xlu0 %5804, %v645_v61   ;;  %v3431_v1 = vmul.f32 %v3314_v51, %v8406_v34  ;;  %v648_v12 = vld [vmem:[%s8104_s2 + $0x848] sm:$0xff]  ;;  %v539_v4 = vld [vmem:[%s8104_s2 + $0x3e0] sm:$0xff] }
 0x1cc   : > { %5432 = vmatmul.mubr.msk.bf16.gmra.mrb[4].mxu0 %vm1154_vm2, %v3456_v22 }
 0x1cd   : > { %v3457_v28 = vpack.c.bf16 %v3430_v35, %v3429_v60 }
 0x1ce   : > { %v3324_v36 = vpop.permute.xlu1 %3323  ;;  %v3319_v50 = vpop.permute.xlu0 %3318 }
 0x1cf   : > { %v3432_v53 = vmul.f32 %v3319_v50, %v8404_v8  ;;  %2224 = vperm.xlu1 %5805, %v536_v55   ;;  %2219 = vperm.xlu0 %5804, %v535_v44   ;;  %v3433_v16 = vmul.f32 %v3324_v36, %v8411_v25  ;;  %v538_v8 = vld [vmem:[%s8104_s2 + $0x3d8] sm:$0xff]  ;;  %v651_v50 = vld [vmem:[%s8104_s2 + $0x860] sm:$0xff] }
 0x1d0   : > { %5435 = vmatprep.mubr.msk.bf16.mxu0 %vm1154_vm2, %v3457_v28  ;;  %v8423_v44 = vld [vmem:[#allocation5_spill] sm:$0xff] }
 0x1d1   : > { %v3458_v39 = vpack.c.bf16 %v3432_v53, %v3431_v1 }
 0x1d2   : > { %v3334_v7 = vpop.permute.xlu1 %3333  ;;  %v3329_v2 = vpop.permute.xlu0 %3328 }
 0x1d3   : > { %v3434_v34 = vmul.f32 %v3329_v2, %v8409_v41  ;;  %4212 = vperm.xlu1 %5805, %v648_v12   ;;  %4207 = vperm.xlu0 %5804, %v647_v59   ;;  %v3435_v26 = vmul.f32 %v3334_v7, %v8415_v31  ;;  %v650_v41 = vld [vmem:[%s8104_s2 + $0x858] sm:$0xff]  ;;  %v8425_v59 = vld [vmem:[#allocation76_spill] sm:$0xff]  ;;  %v8426_v7 = vld [vmem:[#allocation75_spill] sm:$0xff] }
 0x1d4   : > { %5436 = vmatmul.mubr.msk.bf16.gmra.mrb[8].mxu0 %vm1154_vm2, %v3458_v39 }
 0x1d5   : > { %v3459_v47 = vpack.c.bf16 %v3434_v34, %v3433_v16  ;;  %v542_v16 = vld [vmem:[%s8104_s2 + $0x3f8] sm:$0xff]  ;;  %v541_v34 = vld [vmem:[%s8104_s2 + $0x3f0] sm:$0xff] }
 0x1d6   : > { %v3344_v52 = vpop.permute.xlu1 %3343  ;;  %v3339_v0 = vpop.permute.xlu0 %3338 }
 0x1d7   : > { %v3436_v25 = vmul.f32 %v3339_v0, %v8413_v6  ;;  %2234 = vperm.xlu1 %5805, %v538_v8   ;;  %2229 = vperm.xlu0 %5804, %v537_v15   ;;  %v3437_v51 = vmul.f32 %v3344_v52, %v8419_v45  ;;  %v540_v6 = vld [vmem:[%s8104_s2 + $0x3e8] sm:$0xff]  ;;  %v8424_v45 = vld [vmem:[#allocation4_spill] sm:$0xff]  ;;  %v8427_v52 = vld [vmem:[#allocation78_spill] sm:$0xff] }
 0x1d8   : > { %5439 = vmatprep.mubr.msk.bf16.mxu0 %vm1154_vm2, %v3459_v47 }
 0x1d9   : > { %v3460_v57 = vpack.c.bf16 %v3436_v25, %v3435_v26  ;;  %v8428_v26 = vld [vmem:[#allocation77_spill] sm:$0xff] }
 0x1da   : > { %v3354_v61 = vpop.permute.xlu1 %3353  ;;  %v3349_v22 = vpop.permute.xlu0 %3348 }
 0x1db   : > { %v3438_v31 = vmul.f32 %v3349_v22, %v8417_v18  ;;  %4222 = vperm.xlu1 %5805, %v650_v41   ;;  %4217 = vperm.xlu0 %5804, %v649_v58   ;;  %v3439_v28 = vmul.f32 %v3354_v61, %v8423_v44  ;;  %v652_v18 = vld [vmem:[%s8104_s2 + $0x868] sm:$0xff]  ;;  %v654_v41 = vld [vmem:[%s8104_s2 + $0x878] sm:$0xff]  ;;  %v653_v58 = vld [vmem:[%s8104_s2 + $0x870] sm:$0xff] }
 0x1dc   : > { %5440 = vmatmul.mubr.msk.bf16.gmra.mrb[12].mxu0 %vm1154_vm2, %v3460_v57 }
 0x1dd   : > { %v3461_v60 = vpack.c.bf16 %v3438_v31, %v3437_v51  ;;  %v8429_v51 = vld [vmem:[#allocation80_spill] sm:$0xff] }
 0x1de   : > { %v3364_v35 = vpop.permute.xlu1 %3363  ;;  %v3359_v55 = vpop.permute.xlu0 %3358 }
 0x1df   : > { %v3440_v36 = vmul.f32 %v3359_v55, %v8424_v45  ;;  %2244 = vperm.xlu1 %5805, %v540_v6   ;;  %2239 = vperm.xlu0 %5804, %v539_v4   ;;  %v3441_v39 = vmul.f32 %v3364_v35, %v8425_v59  ;;  %v8430_v6 = vld [vmem:[#allocation79_spill] sm:$0xff]  ;;  %v655_v35 = vld [vmem:[%s8104_s2 + $0x880] sm:$0xff] }
 0x1e0   : > { %5443 = vmatprep.mubr.msk.bf16.mxu0 %vm1154_vm2, %v3461_v60  ;;  %v656_v60 = vld [vmem:[%s8104_s2 + $0x888] sm:$0xff] }
 0x1e1   : > { %v3462_v1 = vpack.c.bf16 %v3440_v36, %v3439_v28 }
 0x1e2   : > { %v3374_v53 = vpop.permute.xlu1 %3373  ;;  %v3369_v12 = vpop.permute.xlu0 %3368 }
 0x1e3   : > { %v3442_v2 = vmul.f32 %v3369_v12, %v8426_v7  ;;  %4232 = vperm.xlu1 %5805, %v652_v18   ;;  %4227 = vperm.xlu0 %5804, %v651_v50   ;;  %v3443_v0 = vmul.f32 %v3374_v53, %v8427_v52  ;;  %v8431_v18 = vld [vmem:[#allocation11_spill] sm:$0xff]  ;;  %v658_v12 = vld [vmem:[%s8104_s2 + $0x898] sm:$0xff] }
 0x1e4   : > { %5444 = vmatmul.mubr.msk.bf16.gmra.mrb[16].mxu0 %vm1154_vm2, %v3462_v1  ;;  %v8432_v1 = vld [vmem:[#allocation10_spill] sm:$0xff] }
 0x1e5   : > { %v3463_v8 = vpack.c.bf16 %v3442_v2, %v3441_v39  ;;  %v657_v39 = vld [vmem:[%s8104_s2 + $0x890] sm:$0xff] }
 0x1e6   : > { %v3384_v15 = vpop.permute.xlu1 %3383  ;;  %v3379_v47 = vpop.permute.xlu0 %3378 }
 0x1e7   : > { %v3444_v25 = vmul.f32 %v3379_v47, %v8428_v26  ;;  %2254 = vperm.xlu1 %5805, %v542_v16   ;;  %2249 = vperm.xlu0 %5804, %v541_v34   ;;  %v3445_v31 = vmul.f32 %v3384_v15, %v8429_v51  ;;  %v8434_v47 = vld [vmem:[#allocation49_spill] sm:$0xff] }
 0x1e8   : > { %5447 = vmatprep.mubr.msk.bf16.mxu0 %vm1154_vm2, %v3463_v8  ;;  %v8433_v8 = vld [vmem:[#allocation51_spill] sm:$0xff] }
 0x1e9   : > { %v3464_v57 = vpack.c.bf16 %v3444_v25, %v3443_v0  ;;  %v660_v25 = vld [vmem:[%s8104_s2 + $0x8a8] sm:$0xff] }
 0x1ea   : > { %v3394_v61 = vpop.permute.xlu1 %3393  ;;  %v3389_v22 = vpop.permute.xlu0 %3388 }
 0x1eb   : > { %v3446_v4 = vmul.f32 %v3389_v22, %v8430_v6  ;;  %4242 = vperm.xlu1 %5805, %v654_v41   ;;  %4237 = vperm.xlu0 %5804, %v653_v58   ;;  %v3447_v50 = vmul.f32 %v3394_v61, %v8431_v18  ;;  %v659_v41 = vld [vmem:[%s8104_s2 + $0x8a0] sm:$0xff] }
 0x1ec   : > { %5448 = vmatmul.mubr.msk.bf16.gmra.mrb[20].mxu0 %vm1154_vm2, %v3464_v57 }
 0x1ed   : > { %v3465_v55 = vpack.c.bf16 %v3446_v4, %v3445_v31  ;;  %v662_v4 = vld [vmem:[%s8104_s2 + $0x8b8] sm:$0xff] }
 0x1ee   : > { %v3404_v28 = vpop.permute.xlu1 %3403  ;;  %v3399_v36 = vpop.permute.xlu0 %3398 }
 0x1ef   : > { %v3448_v53 = vmul.f32 %v3399_v36, %v8432_v1  ;;  %4252 = vperm.xlu1 %5805, %v656_v60   ;;  %4247 = vperm.xlu0 %5804, %v655_v35   ;;  %v3449_v15 = vmul.f32 %v3404_v28, %v8433_v8  ;;  %v661_v60 = vld [vmem:[%s8104_s2 + $0x8b0] sm:$0xff]  ;;  %v8435_v36 = vld [vmem:[#allocation21_spill] sm:$0xff] }
 0x1f0   : > { %5451 = vmatprep.mubr.msk.bf16.mxu0 %vm1154_vm2, %v3465_v55 }
 0x1f1   : > { %v3466_v2 = vpack.c.bf16 %v3448_v53, %v3447_v50 }
 0x1f2   : > { %v3414_v16 = vpop.permute.xlu1 %3413  ;;  %v3409_v34 = vpop.permute.xlu0 %3408 }
 0x1f3   : > { %v3450_v0 = vmul.f32 %v3409_v34, %v8434_v47  ;;  %4262 = vperm.xlu1 %5805, %v658_v12   ;;  %4257 = vperm.xlu0 %5804, %v657_v39   ;;  %v3451_v22 = vmul.f32 %v3414_v16, %v8391_v10  ;;  %v8436_v10 = vld [vmem:[#allocation22_spill] sm:$0xff]  ;;  %v8437_v34 = vld [vmem:[#allocation23_spill] sm:$0xff] }
 0x1f4   : > { %5452 = vmatmul.mubr.msk.bf16.gmra.mrb[24].mxu0 %vm1154_vm2, %v3466_v2  ;;  %v663_v12 = vld [vmem:[%s8104_s2 + $0x8c0] sm:$0xff] }
 0x1f5   : > { %v3467_v58 = vpack.c.bf16 %v3450_v0, %v3449_v15  ;;  %v8438_v0 = vld [vmem:[#allocation24_spill] sm:$0xff] }
 0x1f6   : > { %v3716_v57 = vpop.permute.xlu1 %3715  ;;  %v3419_v61 = vpop.permute.xlu0 %3418 }
 0x1f7   : > { %v3452_v31 = vmul.f32 %v3419_v61, %v8390_v46  ;;  %4272 = vperm.xlu1 %5805, %v660_v25   ;;  %4267 = vperm.xlu0 %5804, %v659_v41   ;;  %v3873_v50 = vmul.f32 %v3716_v57, %v8435_v36  ;;  %v664_v46 = vld [vmem:[%s8104_s2 + $0x8c8] sm:$0xff]  ;;  %v666_v41 = vld [vmem:[%s8104_s2 + $0x8d8] sm:$0xff]  ;;  %v667_v36 = vld [vmem:[%s8104_s2 + $0x8e0] sm:$0xff] }
 0x1f8   : > { %5455 = vmatprep.mubr.msk.bf16.mxu0 %vm1154_vm2, %v3467_v58  ;;  %v665_v58 = vld [vmem:[%s8104_s2 + $0x8d0] sm:$0xff] }
 0x1f9   : > { %v3468_v35 = vpack.c.bf16 %v3452_v31, %v3451_v22  ;;  %v4422_v31 = vsel %vm1203_vm0, %v7618_v20, 0 }
 0x1fa   : > { %v3726_v55 = vpop.permute.xlu1 %3725  ;;  %v3721_v28 = vpop.permute.xlu0 %3720 }
 0x1fb   : > { %v3874_v53 = vmul.f32 %v3721_v28, %v8436_v10  ;;  %4282 = vperm.xlu1 %5805, %v662_v4   ;;  %4277 = vperm.xlu0 %5804, %v661_v60   ;;  %v3875_v15 = vmul.f32 %v3726_v55, %v8437_v34  ;;  %v8439_v4 = vld [vmem:[#allocation25_spill] sm:$0xff]  ;;  %v668_v28 = vld [vmem:[%s8104_s2 + $0x8e8] sm:$0xff] }
 0x1fc   : > { %5456 = vmatmul.mubr.msk.bf16.gmra.mrb[28].mxu0 %vm1154_vm2, %v3468_v35  ;;  %v8440_v35 = vld [vmem:[#allocation26_spill] sm:$0xff] }
 0x1fd   : > { %v3905_v39 = vpack.c.bf16 %v3874_v53, %v3873_v50  ;;  %v8441_v53 = vld [vmem:[#allocation29_spill] sm:$0xff] }
 0x1fe   : > { %v3736_v2 = vpop.permute.xlu1 %3735  ;;  %v3731_v16 = vpop.permute.xlu0 %3730 }
 0x1ff   : > { %v3876_v25 = vmul.f32 %v3731_v16, %v8438_v0  ;;  %4292 = vperm.xlu1 %5805, %v664_v46   ;;  %4287 = vperm.xlu0 %5804, %v663_v12   ;;  %v3877_v60 = vmul.f32 %v3736_v2, %v8439_v4  ;;  %v8442_v12 = vld [vmem:[#allocation30_spill] sm:$0xff]  ;;  %v670_v2 = vld [vmem:[%s8104_s2 + $0x8f8] sm:$0xff]  ;;  %v669_v16 = vld [vmem:[%s8104_s2 + $0x8f0] sm:$0xff] }
 0x200   : > { %5461 = vmatprep.mubr.msk.bf16.mxu0 %vm1154_vm2, %v3905_v39  ;;  %v8445_v4 = vld [vmem:[#allocation33_spill] sm:$0xff] }
 0x201   : > { %v3906_v57 = vpack.c.bf16 %v3876_v25, %v3875_v15  ;;  %v8443_v25 = vld [vmem:[#allocation31_spill] sm:$0xff] }
 0x202   : > { %v3746_v61 = vpop.permute.xlu1 %3745  ;;  %v3741_v22 = vpop.permute.xlu0 %3740 }
 0x203   : > { %v3878_v55 = vmul.f32 %v3741_v22, %v8440_v35  ;;  %4302 = vperm.xlu1 %5805, %v666_v41   ;;  %4297 = vperm.xlu0 %5804, %v665_v58   ;;  %v3879_v46 = vmul.f32 %v3746_v61, %v8441_v53  ;;  %v8444_v58 = vld [vmem:[#allocation32_spill] sm:$0xff]  ;;  %v8446_v35 = vld [vmem:[#allocation34_spill] sm:$0xff] }
 0x204   : > { %5462 = vmatmul.mubr.msk.bf16.vlgmr.msra.gmra.mrb[0].mxu0 %vm1154_vm2, %v3906_v57  ;;  %v8448_v53 = vld [vmem:[#allocation36_spill] sm:$0xff] }
 0x205   : > { %v3907_v50 = vpack.c.bf16 %v3878_v55, %v3877_v60  ;;  %5494 = vmatpush3.bf16.msra.mxu0 %v4422_v31 }
 0x206   : > { %v3756_v10 = vpop.permute.xlu1 %3755  ;;  %v3751_v20 = vpop.permute.xlu0 %3750 }
 0x207   : > { %v3880_v39 = vmul.f32 %v3751_v20, %v8442_v12  ;;  %4312 = vperm.xlu1 %5805, %v668_v28   ;;  %4307 = vperm.xlu0 %5804, %v667_v36   ;;  %v3881_v41 = vmul.f32 %v3756_v10, %v8443_v25  ;;  %v8447_v20 = vld [vmem:[#allocation35_spill] sm:$0xff] }
 0x208   : > { %5465 = vmatprep.mubr.msk.bf16.mxu0 %vm1154_vm2, %v3907_v50 }
 0x209   : > { %v3908_v34 = vpack.c.bf16 %v3880_v39, %v3879_v46 }
 0x20a   : > { %v3766_v15 = vpop.permute.xlu1 %3765  ;;  %v3761_v0 = vpop.permute.xlu0 %3760 }
 0x20b   : > { %v3882_v57 = vmul.f32 %v3761_v0, %v8444_v58  ;;  %4322 = vperm.xlu1 %5805, %v670_v2   ;;  %4317 = vperm.xlu0 %5804, %v669_v16   ;;  %v3883_v60 = vmul.f32 %v3766_v15, %v8445_v4  ;;  %v8449_v16 = vld [vmem:[#allocation37_spill] sm:$0xff]  ;;  %v8450_v0 = vld [vmem:[#allocation38_spill] sm:$0xff] }
 0x20c   : > { %5466 = vmatmul.mubr.msk.bf16.gmra.mrb[4].mxu0 %vm1154_vm2, %v3908_v34 }
 0x20d   : > { %v3909_v61 = vpack.c.bf16 %v3882_v57, %v3881_v41  ;;  %v8451_v57 = vld [vmem:[#allocation39_spill] sm:$0xff] }
 0x20e   : > { %v3776_v22 = vpop.permute.xlu1 %3775  ;;  %v3771_v31 = vpop.permute.xlu0 %3770 }
 0x20f   : > { %v3884_v55 = vmul.f32 %v3771_v31, %v8446_v35  ;;  %5469 = vmatprep.mubr.msk.bf16.mxu0 %vm1154_vm2, %v3909_v61  ;;  %v3885_v10 = vmul.f32 %v3776_v22, %v8447_v20  ;;  %v8452_v31 = vld [vmem:[#allocation40_spill] sm:$0xff] }
 0x211   : > { %v3910_v28 = vpack.c.bf16 %v3884_v55, %v3883_v60  ;;  %v8453_v55 = vld [vmem:[#allocation41_spill] sm:$0xff] }
 0x212   : > { %v3786_v36 = vpop.permute.xlu1 %3785  ;;  %v3781_v50 = vpop.permute.xlu0 %3780 }
 0x213   : > { %v3886_v46 = vmul.f32 %v3781_v50, %v8448_v53  ;;  %v3887_v34 = vmul.f32 %v3786_v36, %v8449_v16  ;;  %v8454_v50 = vld [vmem:[#allocation42_spill] sm:$0xff] }
 0x214   : > { %5470 = vmatmul.mubr.msk.bf16.gmra.mrb[8].mxu0 %vm1154_vm2, %v3910_v28 }
 0x215   : > { %v3911_v12 = vpack.c.bf16 %v3886_v46, %v3885_v10  ;;  %v8455_v46 = vld [vmem:[#allocation43_spill] sm:$0xff] }
 0x216   : > { %v3796_v39 = vpop.permute.xlu1 %3795  ;;  %v3791_v2 = vpop.permute.xlu0 %3790 }
 0x217   : > { %v3888_v15 = vmul.f32 %v3791_v2, %v8450_v0  ;;  %5473 = vmatprep.mubr.msk.bf16.mxu0 %vm1154_vm2, %v3911_v12  ;;  %v3889_v61 = vmul.f32 %v3796_v39, %v8451_v57  ;;  %v8456_v2 = vld [vmem:[#allocation44_spill] sm:$0xff] }
 0x219   : > { %v3912_v25 = vpack.c.bf16 %v3888_v15, %v3887_v34 }
 0x21a   : > { %v3806_v41 = vpop.permute.xlu1 %3805  ;;  %v3801_v58 = vpop.permute.xlu0 %3800 }
 0x21b   : > { %v3890_v22 = vmul.f32 %v3801_v58, %v8452_v31  ;;  %v3891_v28 = vmul.f32 %v3806_v41, %v8453_v55  ;;  %v8457_v58 = vld [vmem:[#allocation45_spill] sm:$0xff] }
 0x21c   : > { %5474 = vmatmul.mubr.msk.bf16.gmra.mrb[12].mxu0 %vm1154_vm2, %v3912_v25 }
 0x21d   : > { %v3913_v4 = vpack.c.bf16 %v3890_v22, %v3889_v61  ;;  %v8458_v22 = vld [vmem:[#allocation46_spill] sm:$0xff] }
 0x21e   : > { %v3816_v60 = vpop.permute.xlu1 %3815  ;;  %v3811_v35 = vpop.permute.xlu0 %3810 }
 0x21f   : > { %v3892_v36 = vmul.f32 %v3811_v35, %v8454_v50  ;;  %5477 = vmatprep.mubr.msk.bf16.mxu0 %vm1154_vm2, %v3913_v4  ;;  %v3893_v12 = vmul.f32 %v3816_v60, %v8455_v46 }
 0x221   : > { %v3914_v20 = vpack.c.bf16 %v3892_v36, %v3891_v28  ;;  %v8459_v36 = vld [vmem:[#allocation47_spill] sm:$0xff] }
 0x222   : > { %v3826_v10 = vpop.permute.xlu1 %3825  ;;  %v3821_v53 = vpop.permute.xlu0 %3820 }
 0x223   : > { %v3894_v39 = vmul.f32 %v3821_v53, %v8456_v2  ;;  %v3895_v61 = vmul.f32 %v3826_v10, %v8457_v58 }
 0x224   : > { %5478 = vmatmul.mubr.msk.bf16.gmra.mrb[16].mxu0 %vm1154_vm2, %v3914_v20 }
 0x225   : > { %v3915_v34 = vpack.c.bf16 %v3894_v39, %v3893_v12  ;;  %v8461_v39 = vld [vmem:[#allocation50_spill] sm:$0xff] }
 0x226   : > { %v3836_v15 = vpop.permute.xlu1 %3835  ;;  %v3831_v25 = vpop.permute.xlu0 %3830 }
 0x227   : > { %v3896_v41 = vmul.f32 %v3831_v25, %v8458_v22  ;;  %5481 = vmatprep.mubr.msk.bf16.mxu0 %vm1154_vm2, %v3915_v34  ;;  %v3897_v54 = vmul.f32 %v3836_v15, %v8459_v36  ;;  %v8465_v36 = vld [vmem:[#allocation20_spill] sm:$0xff] }
 0x229   : > { %v3916_v35 = vpack.c.bf16 %v3896_v41, %v3895_v61  ;;  %v8462_v41 = vld [vmem:[#allocation14_spill] sm:$0xff] }
 0x22a   : > { %v3846_v4 = vpop.permute.xlu1 %3845  ;;  %v3841_v28 = vpop.permute.xlu0 %3840 }
 0x22b   : > { %v3898_v60 = vmul.f32 %v3841_v28, %v8460_v5  ;;  %v3899_v21 = vmul.f32 %v3846_v4, %v8461_v39 }
 0x22c   : > { %5482 = vmatmul.mubr.msk.bf16.gmra.mrb[20].mxu0 %vm1154_vm2, %v3916_v35 }
 0x22d   : > { %v3917_v53 = vpack.c.bf16 %v3898_v60, %v3897_v54  ;;  %v8464_v60 = vld [vmem:[#allocation19_spill] sm:$0xff] }
 0x22e   : > { %v3856_v20 = vpop.permute.xlu1 %3855  ;;  %v3851_v12 = vpop.permute.xlu0 %3850 }
 0x22f   : > { %v3900_v10 = vmul.f32 %v3851_v12, %v6246_v24  ;;  %5485 = vmatprep.mubr.msk.bf16.mxu0 %vm1154_vm2, %v3917_v53  ;;  %v3901_v23 = vmul.f32 %v3856_v20, %v8462_v41 }
 0x231   : > { %v3918_v25 = vpack.c.bf16 %v3900_v10, %v3899_v21 }
 0x232   : > { %v3866_v34 = vpop.permute.xlu1 %3865  ;;  %v3861_v61 = vpop.permute.xlu0 %3860 }
 0x233   : > { %v3902_v15 = vmul.f32 %v3861_v61, %v8463_v9  ;;  %v3903_v5 = vmul.f32 %v3866_v34, %v8464_v60 }
 0x234   : > { %5486 = vmatmul.mubr.msk.bf16.gmra.mrb[24].mxu0 %vm1154_vm2, %v3918_v25 }
 0x235   : > { %v3919_v28 = vpack.c.bf16 %v3902_v15, %v3901_v23  ;;  %v8466_v15 = vld [vmem:[#allocation2_spill] sm:$0xff] }
 0x236   : > { %v4168_v35 = vpop.permute.xlu1 %4167  ;;  %v3871_v54 = vpop.permute.xlu0 %3870  ;;  %v2277_v9 = vmul.f32 %v8466_v15, %v8423_v44 }
 0x237   : > { %v3904_v4 = vmul.f32 %v3871_v54, %v8465_v36  ;;  %5489 = vmatprep.mubr.msk.bf16.mxu0 %vm1154_vm2, %v3919_v28  ;;  %v4325_v10 = vmul.f32 %v4168_v35, %v7077_v30 }
 0x239   : > { %v3920_v12 = vpack.c.bf16 %v3904_v4, %v3903_v5 }
 0x23a   : > { %v4178_v53 = vpop.permute.xlu1 %4177  ;;  %v4173_v21 = vpop.permute.xlu0 %4172 }
 0x23b   : > { %v4326_v20 = vmul.f32 %v4173_v21, %v7073_v37  ;;  %v4327_v34 = vmul.f32 %v4178_v53, %v7121_v32 }
 0x23c   : > { %5490 = vmatmul.mubr.msk.bf16.gmra.mrb[28].mxu0 %vm1154_vm2, %v3920_v12 }
 0x23d   : > { %v4357_v61 = vpack.c.bf16 %v4326_v20, %v4325_v10 }
 0x23e   : > { %v2205_v25 = vpop.permute.xlu1 %2204  ;;  %v4183_v23 = vpop.permute.xlu0 %4182 }
 0x23f   : > { %v2278_v36 = vmul.f32 %v2205_v25, %v8424_v45  ;;  %v4328_v5 = vmul.f32 %v4183_v23, %v7117_v33  ;;  %5495 = vmatprep.mubr.msk.bf16.mxu0 %vm1154_vm2, %v4357_v61 }
 0x241   : > { %v2299_v28 = vpack.c.bf16 %v2278_v36, %v2277_v9  ;;  %v4358_v30 = vpack.c.bf16 %v4328_v5, %v4327_v34 }
 0x242   : > { %v4193_v35 = vpop.permute.xlu1 %4192  ;;  %v4188_v37 = vpop.permute.xlu0 %4187 }
 0x243   : > { %v4330_v54 = vmul.f32 %v4193_v35, %v7125_v13  ;;  %v4329_v60 = vmul.f32 %v4188_v37, %v7129_v27  ;;  %5345 = vmatprep.mubr.msk.bf16.mxu1 %vm1154_vm2, %v2299_v28 }
 0x244   : > { %5496 = vmatmul.mubr.msk.bf16.vlgmr.msra.gmra.mrb[0].mxu0 %vm1154_vm2, %v4358_v30 }
 0x245   : > { %v4359_v44 = vpack.c.bf16 %v4330_v54, %v4329_v60 }
 0x246   : > { %v2215_v32 = vpop.permute.xlu1 %2214  ;;  %v2210_v4 = vpop.permute.xlu0 %2209 }
 0x247   : > { %v2280_v45 = vmul.f32 %v2215_v32, %v8426_v7  ;;  %v2279_v33 = vmul.f32 %v2210_v4, %v8425_v59  ;;  %5499 = vmatprep.mubr.msk.bf16.mxu0 %vm1154_vm2, %v4359_v44 }
 0x249   : > { %v2300_v9 = vpack.c.bf16 %v2280_v45, %v2279_v33 }
 0x24a   : > { %v4203_v12 = vpop.permute.xlu1 %4202  ;;  %v4198_v53 = vpop.permute.xlu0 %4197 }
 0x24b   : > { %v4332_v13 = vmul.f32 %v4203_v12, %v7169_v48  ;;  %v4331_v27 = vmul.f32 %v4198_v53, %v7173_v38  ;;  %5346 = vmatmul.mubr.msk.bf16.gmra.mrb[20].mxu1 %vm1154_vm2, %v2300_v9 }
 0x24d   : > { %v4360_v21 = vpack.c.bf16 %v4332_v13, %v4331_v27 }
 0x24e   : > { %v2225_v10 = vpop.permute.xlu1 %2224  ;;  %v2220_v20 = vpop.permute.xlu0 %2219 }
 0x24f   : > { %v2282_v61 = vmul.f32 %v2225_v10, %v8428_v26  ;;  %v2281_v7 = vmul.f32 %v2220_v20, %v8427_v52  ;;  %5500 = vmatmul.mubr.msk.bf16.gmra.mrb[4].mxu0 %vm1154_vm2, %v4360_v21 }
 0x251   : > { %v2301_v59 = vpack.c.bf16 %v2282_v61, %v2281_v7  ;;  %v2559_v61 = vpack.c.bf16 %v8454_v50, %v8453_v55 }
 0x252   : > { %v4213_v25 = vpop.permute.xlu1 %4212  ;;  %v4208_v23 = vpop.permute.xlu0 %4207 }
 0x253   : > { %v4334_v15 = vmul.f32 %v4213_v25, %v7177_v40  ;;  %v4333_v48 = vmul.f32 %v4208_v23, %v7181_v19  ;;  %5349 = vmatprep.mubr.msk.bf16.mxu1 %vm1154_vm2, %v2301_v59 }
 0x255   : > { %v4361_v38 = vpack.c.bf16 %v4334_v15, %v4333_v48 }
 0x256   : > { %v2235_v34 = vpop.permute.xlu1 %2234  ;;  %v2230_v36 = vpop.permute.xlu0 %2229 }
 0x257   : > { %v2284_v5 = vmul.f32 %v2235_v34, %v8430_v6  ;;  %v2283_v26 = vmul.f32 %v2230_v36, %v8429_v51  ;;  %5503 = vmatprep.mubr.msk.bf16.mxu0 %vm1154_vm2, %v4361_v38  ;;  %v2560_v36 = vpack.c.bf16 %v8456_v2, %v8455_v46 }
 0x259   : > { %v2302_v52 = vpack.c.bf16 %v2284_v5, %v2283_v26  ;;  %v8469_v5 = vld [vmem:[#allocation88_spill] sm:$0xff] }
 0x25a   : > { %v4223_v28 = vpop.permute.xlu1 %4222  ;;  %v4218_v30 = vpop.permute.xlu0 %4217 }
 0x25b   : > { %v4336_v35 = vmul.f32 %v4223_v28, %v7219_v49  ;;  %v4335_v40 = vmul.f32 %v4218_v30, %v7223_v29  ;;  %5350 = vmatmul.mubr.msk.bf16.gmra.mrb[24].mxu1 %vm1154_vm2, %v2302_v52  ;;  %v2561_v52 = vpack.c.bf16 %v8458_v22, %v8457_v58 }
 0x25d   : > { %v4362_v19 = vpack.c.bf16 %v4336_v35, %v4335_v40 }
 0x25e   : > { %v2245_v37 = vpop.permute.xlu1 %2244  ;;  %v2240_v54 = vpop.permute.xlu0 %2239 }
 0x25f   : > { %v2286_v60 = vmul.f32 %v2245_v37, %v8432_v1  ;;  %v2285_v6 = vmul.f32 %v2240_v54, %v8431_v18  ;;  %5504 = vmatmul.mubr.msk.bf16.gmra.mrb[8].mxu0 %vm1154_vm2, %v4362_v19  ;;  %v2557_v18 = vpack.c.bf16 %v8450_v0, %v8449_v16 }
 0x261   : > { %v2303_v51 = vpack.c.bf16 %v2286_v60, %v2285_v6 }
 0x262   : > { %v4233_v44 = vpop.permute.xlu1 %4232  ;;  %v4228_v32 = vpop.permute.xlu0 %4227 }
 0x263   : > { %v4338_v4 = vmul.f32 %v4233_v44, %v7227_v62  ;;  %v4337_v49 = vmul.f32 %v4228_v32, %v7231_v56  ;;  %5353 = vmatprep.mubr.msk.bf16.mxu1 %vm1154_vm2, %v2303_v51  ;;  %v8471_v51 = vld [vmem:[#allocation47_spill] sm:$0xff]  ;;  %v8472_v44 = vld [vmem:[#allocation48_spill] sm:$0xff] }
 0x264   : > { %v2562_v32 = vpack.c.bf16 %v8472_v44, %v8471_v51 }
 0x265   : > { %v4363_v29 = vpack.c.bf16 %v4338_v4, %v4337_v49  ;;  %v8473_v4 = vld [vmem:[#allocation7_spill] sm:$0xff]  ;;  %v2563_v49 = vpack.c.bf16 %v6246_v24, %v8461_v39 }
 0x266   : > { %v2255_v45 = vpop.permute.xlu1 %2254  ;;  %v2250_v33 = vpop.permute.xlu0 %2249 }
 0x267   : > { %v2288_v9 = vmul.f32 %v2255_v45, %v8434_v47  ;;  %v2287_v1 = vmul.f32 %v2250_v33, %v8433_v8  ;;  %5507 = vmatprep.mubr.msk.bf16.mxu0 %vm1154_vm2, %v4363_v29  ;;  %v8474_v33 = vld [vmem:[#allocation17_spill] sm:$0xff] }
 0x269   : > { %v2304_v12 = vpack.c.bf16 %v2288_v9, %v2287_v1 }
 0x26a   : > { %v4243_v53 = vpop.permute.xlu1 %4242  ;;  %v4238_v13 = vpop.permute.xlu0 %4237 }
 0x26b   : > { %v4340_v62 = vmul.f32 %v4243_v53, %v7269_v63  ;;  %v4339_v56 = vmul.f32 %v4238_v13, %v7273_v42  ;;  %v7864_v27 = vpop.f32.mrb[0].mxu1  ;;  %5354 = vmatmul.mubr.msk.bf16.gmra.mrb[28].mxu1 %vm1154_vm2, %v2304_v12  ;;  %v2558_v63 = vpack.c.bf16 %v8452_v31, %v8451_v57  ;;  %v8475_v12 = vld [vmem:[#allocation8_spill] sm:$0xff] }
 0x26c   : > { %v7867_v21 = vpop.f32.mrb[1].mxu1  ;;  %5375 = vmatprep.mubr.msk.bf16.mxu1 %vm1154_vm2, %v2557_v18 }
 0x26d   : > { %v4364_v8 = vpack.c.bf16 %v4340_v62, %v4339_v56  ;;  %v7870_v47 = vpop.f32.mrb[2].mxu1 }
 0x26e   : > { %v7872_v10 = vpop.f32.mrb[3].mxu1  ;;  %v4253_v16 = vpop.permute.xlu1 %4252 }
 0x26f   : > { %v4342_v0 = vmul.f32 %v4253_v16, %v7277_v43  ;;  %v4248_v20 = vpop.permute.xlu0 %4247  ;;  %5508 = vmatmul.mubr.msk.bf16.gmra.mrb[12].mxu0 %vm1154_vm2, %v4364_v8  ;;  %v8467_v43 = vld [vmem:[#allocation3_spill] sm:$0xff]  ;;  %v8476_v8 = vld [vmem:[#allocation12_spill] sm:$0xff] }
 0x270   : > { %v4341_v42 = vmul.f32 %v4248_v20, %v7281_v14  ;;  %v8477_v20 = vld [vmem:[#allocation18_spill] sm:$0xff] }
 0x272   : > { %v4365_v7 = vpack.c.bf16 %v4342_v0, %v4341_v42  ;;  %v4263_v59 = vpop.permute.xlu1 %4262  ;;  %v8478_v42 = vld [vmem:[#allocation13_spill] sm:$0xff] }
 0x273   : > { %v4344_v25 = vmul.f32 %v4263_v59, %v7315_v3  ;;  %v4258_v23 = vpop.permute.xlu0 %4257  ;;  %v7882_v15 = vpop.f32.mrb[4].mxu1  ;;  %5376 = vmatmul.mubr.msk.bf16.vlgmr.msra.gmra.mrb[16].mxu1 %vm1154_vm2, %v2558_v63  ;;  %v8468_v3 = vld [vmem:[#allocation87_spill] sm:$0xff]  ;;  %v2564_v63 = vpack.c.bf16 %v8477_v20, %v8462_v41 }
 0x274   : > { %v4343_v48 = vmul.f32 %v4258_v23, %v8467_v43  ;;  %v7886_v38 = vpop.f32.mrb[5].mxu1  ;;  %5511 = vmatprep.mubr.msk.bf16.mxu0 %vm1154_vm2, %v4365_v7  ;;  %5379 = vmatprep.mubr.msk.bf16.mxu1 %vm1154_vm2, %v2559_v61 }
 0x275   : > { %v7890_v14 = vpop.f32.mrb[6].mxu1 }
 0x276   : > { %v4366_v57 = vpack.c.bf16 %v4344_v25, %v4343_v48  ;;  %v7892_v31 = vpop.f32.mrb[7].mxu1  ;;  %v4273_v55 = vpop.permute.xlu1 %4272  ;;  %v8479_v25 = vld [vmem:[#allocation15_spill] sm:$0xff]  ;;  %v8480_v48 = vld [vmem:[#allocation16_spill] sm:$0xff] }
 0x277   : > { %v4346_v50 = vmul.f32 %v4273_v55, %v8468_v3  ;;  %v4268_v34 = vpop.permute.xlu0 %4267 }
 0x278   : > { %v4345_v26 = vmul.f32 %v4268_v34, %v8469_v5  ;;  %5512 = vmatmul.mubr.msk.bf16.gmra.mrb[16].mxu0 %vm1154_vm2, %v4366_v57 }
 0x27a   : > { %v4367_v28 = vpack.c.bf16 %v4346_v50, %v4345_v26  ;;  %v4283_v30 = vpop.permute.xlu1 %4282 }
 0x27b   : > { %v4348_v35 = vmul.f32 %v4283_v30, %v7361_v17  ;;  %v4278_v40 = vpop.permute.xlu0 %4277  ;;  %v7902_v19 = vpop.f32.mrb[8].mxu1  ;;  %5380 = vmatmul.mubr.msk.bf16.gmra.mrb[20].mxu1 %vm1154_vm2, %v2560_v36  ;;  %v8470_v17 = vld [vmem:[#allocation6_spill] sm:$0xff] }
 0x27c   : > { %v4347_v37 = vmul.f32 %v4278_v40, %v7365_v11  ;;  %v7906_v54 = vpop.f32.mrb[9].mxu1  ;;  %5515 = vmatprep.mubr.msk.bf16.mxu0 %vm1154_vm2, %v4367_v28  ;;  %5383 = vmatprep.mubr.msk.bf16.mxu1 %vm1154_vm2, %v2561_v52 }
 0x27d   : > { %v7910_v46 = vpop.f32.mrb[10].mxu1 }
 0x27e   : > { %v4368_v2 = vpack.c.bf16 %v4348_v35, %v4347_v37  ;;  %v7912_v58 = vpop.f32.mrb[11].mxu1  ;;  %v4293_v22 = vpop.permute.xlu1 %4292 }
 0x27f   : > { %v4350_v60 = vmul.f32 %v4293_v22, %v8470_v17  ;;  %v4288_v6 = vpop.permute.xlu0 %4287 }
 0x280   : > { %v4349_v11 = vmul.f32 %v4288_v6, %v8473_v4  ;;  %5516 = vmatmul.mubr.msk.bf16.gmra.mrb[20].mxu0 %vm1154_vm2, %v4368_v2 }
 0x282   : > { %v4369_v29 = vpack.c.bf16 %v4350_v60, %v4349_v11  ;;  %v4303_v45 = vpop.permute.xlu1 %4302 }
 0x283   : > { %v4352_v9 = vmul.f32 %v4303_v45, %v8474_v33  ;;  %v4298_v1 = vpop.permute.xlu0 %4297  ;;  %v7922_v18 = vpop.f32.mrb[12].mxu1  ;;  %5384 = vmatmul.mubr.msk.bf16.gmra.mrb[24].mxu1 %vm1154_vm2, %v2562_v32 }
 0x284   : > { %v4351_v53 = vmul.f32 %v4298_v1, %v8475_v12  ;;  %v7926_v13 = vpop.f32.mrb[13].mxu1  ;;  %5519 = vmatprep.mubr.msk.bf16.mxu0 %vm1154_vm2, %v4369_v29  ;;  %5387 = vmatprep.mubr.msk.bf16.mxu1 %vm1154_vm2, %v2563_v49 }
 0x285   : > { %v7930_v62 = vpop.f32.mrb[14].mxu1 }
 0x286   : > { %v4370_v24 = vpack.c.bf16 %v4352_v9, %v4351_v53  ;;  %v7932_v39 = vpop.f32.mrb[15].mxu1  ;;  %v4313_v56 = vpop.permute.xlu1 %4312 }
 0x287   : > { %v4354_v16 = vmul.f32 %v4313_v56, %v8476_v8  ;;  %v4308_v0 = vpop.permute.xlu0 %4307 }
 0x288   : > { %v4353_v61 = vmul.f32 %v4308_v0, %v8478_v42  ;;  %5520 = vmatmul.mubr.msk.bf16.gmra.mrb[24].mxu0 %vm1154_vm2, %v4370_v24 }
 0x28a   : > { %v4371_v7 = vpack.c.bf16 %v4354_v16, %v4353_v61  ;;  %v4323_v59 = vpop.permute.xlu1 %4322 }
 0x28b   : > { %v4356_v23 = vmul.f32 %v4323_v59, %v8479_v25  ;;  %v4318_v43 = vpop.permute.xlu0 %4317  ;;  %5388 = vmatmul.mubr.msk.bf16.gmra.mrb[28].mxu1 %vm1154_vm2, %v2564_v63 }
 0x28c   : > { %v4355_v57 = vmul.f32 %v4318_v43, %v8480_v48  ;;  %5523 = vmatprep.mubr.msk.bf16.mxu0 %vm1154_vm2, %v4371_v7 }
 0x28e   : > { %v4372_v55 = vpack.c.bf16 %v4356_v23, %v4355_v57 }
 0x290   : > { %5524 = vmatmul.mubr.msk.bf16.gmra.mrb[28].mxu0 %vm1154_vm2, %v4372_v55 }
 0x317   : > { %v5497_v41 = vpop.f32.mrb[0].mxu0 }
 0x318   : > { %v5529_v3 = vadd.f32 %v5497_v41, %v7864_v27  ;;  %v4458_v50 = vpop.f32.mrb[1].mxu0 }
 0x319   : > { %v5530_v34 = vadd.f32 %v4458_v50, %v7867_v21  ;;  %v5498_v36 = vpop.f32.mrb[2].mxu0 }
 0x31a   : > { %4619 = vst.msk [vmem:[%s7949_s9 + $0x10] sm:$0xff] %vm1154_vm2, %v5529_v3  ;;  %v5531_v5 = vadd.f32 %v5498_v36, %v7870_v47  ;;  %v4461_v26 = vpop.f32.mrb[3].mxu0  ;;  %v4722_v30 = vmul.f32 %v5529_v3, %v5529_v3  ;;  %v4652_v37 = vsel %vm1154_vm2, %v5529_v3, 0.0 }
 0x31b   : > { %4617 = vst.msk [vmem:[%s7949_s9] sm:$0xff] %vm1154_vm2, %v5530_v34  ;;  %v4720_v52 = vmul.f32 %v5530_v34, %v5530_v34  ;;  %v5532_v28 = vadd.f32 %v4461_v26, %v7872_v10  ;;  %v4649_v35 = vsel %vm1154_vm2, %v5530_v34, 0.0 }
 0x31c   : > { %4620 = vst.msk [vmem:[%s7949_s9 + $0x18] sm:$0xff] %vm1154_vm2, %v5531_v5  ;;  %v4723_v2 = vmul.f32 %v5531_v5, %v5531_v5  ;;  %v4755_v60 = vsel %vm1154_vm2, %v4722_v30, 0.0  ;;  %v4654_v6 = vsel %vm1154_vm2, %v5531_v5, 0.0 }
 0x31d   : > { %4618 = vst.msk [vmem:[%s7949_s9 + $0x8] sm:$0xff] %vm1154_vm2, %v5532_v28  ;;  %v4650_v27 = vsel %vm1154_vm2, %v5532_v28, 0.0  ;;  %v4721_v21 = vmul.f32 %v5532_v28, %v5532_v28  ;;  %v4752_v47 = vsel %vm1154_vm2, %v4720_v52, 0.0 }
 0x31e   : > { %v4651_v40 = vadd.f32 %v4650_v27, %v4649_v35  ;;  %v4757_v4 = vsel %vm1154_vm2, %v4723_v2, 0.0 }
 0x31f   : > { %v4753_v22 = vsel %vm1154_vm2, %v4721_v21, 0.0 }
 0x320   : > { %v4653_v10 = vadd.f32 %v4652_v37, %v4651_v40  ;;  %v4754_v17 = vadd.f32 %v4753_v22, %v4752_v47 }
 0x322   : > { %v4756_v51 = vadd.f32 %v4755_v60, %v4754_v17  ;;  %v5501_v44 = vpop.f32.mrb[4].mxu0  ;;  %v4655_v32 = vadd.f32 %v4654_v6, %v4653_v10 }
 0x323   : > { %v5533_v11 = vadd.f32 %v5501_v44, %v7882_v15  ;;  %v4474_v49 = vpop.f32.mrb[5].mxu0 }
 0x324   : > { %v5534_v29 = vadd.f32 %v4474_v49, %v7886_v38  ;;  %v4758_v45 = vadd.f32 %v4757_v4, %v4756_v51  ;;  %v5502_v33 = vpop.f32.mrb[6].mxu0 }
 0x325   : > { %4623 = vst.msk [vmem:[%s7949_s9 + $0x30] sm:$0xff] %vm1154_vm2, %v5533_v11  ;;  %v5535_v9 = vadd.f32 %v5502_v33, %v7890_v14  ;;  %v4477_v1 = vpop.f32.mrb[7].mxu0  ;;  %v4726_v15 = vmul.f32 %v5533_v11, %v5533_v11  ;;  %v4660_v20 = vsel %vm1154_vm2, %v5533_v11, 0.0 }
 0x326   : > { %4621 = vst.msk [vmem:[%s7949_s9 + $0x20] sm:$0xff] %vm1154_vm2, %v5534_v29  ;;  %v4656_v12 = vsel %vm1154_vm2, %v5534_v29, 0.0  ;;  %v4724_v53 = vmul.f32 %v5534_v29, %v5534_v29  ;;  %v5536_v24 = vadd.f32 %v4477_v1, %v7892_v31 }
 0x327   : > { %v4657_v56 = vadd.f32 %v4656_v12, %v4655_v32  ;;  %4624 = vst.msk [vmem:[%s7949_s9 + $0x38] sm:$0xff] %vm1154_vm2, %v5535_v9  ;;  %v4727_v63 = vmul.f32 %v5535_v9, %v5535_v9  ;;  %v4763_v7 = vsel %vm1154_vm2, %v4726_v15, 0.0  ;;  %v4662_v59 = vsel %vm1154_vm2, %v5535_v9, 0.0 }
 0x328   : > { %v4759_v38 = vsel %vm1154_vm2, %v4724_v53, 0.0  ;;  %4622 = vst.msk [vmem:[%s7949_s9 + $0x28] sm:$0xff] %vm1154_vm2, %v5536_v24  ;;  %v4658_v8 = vsel %vm1154_vm2, %v5536_v24, 0.0  ;;  %v4725_v16 = vmul.f32 %v5536_v24, %v5536_v24 }
 0x329   : > { %v4760_v14 = vadd.f32 %v4759_v38, %v4758_v45  ;;  %v4659_v0 = vadd.f32 %v4658_v8, %v4657_v56  ;;  %v4765_v43 = vsel %vm1154_vm2, %v4727_v63, 0.0 }
 0x32a   : > { %v4761_v42 = vsel %vm1154_vm2, %v4725_v16, 0.0 }
 0x32b   : > { %v4661_v31 = vadd.f32 %v4660_v20, %v4659_v0  ;;  %v4762_v61 = vadd.f32 %v4761_v42, %v4760_v14 }
 0x32d   : > { %v4764_v25 = vadd.f32 %v4763_v7, %v4762_v61  ;;  %v4663_v23 = vadd.f32 %v4662_v59, %v4661_v31 }
 0x32f   : > { %v4766_v48 = vadd.f32 %v4765_v43, %v4764_v25 }
 0x332   : > { %v5505_v57 = vpop.f32.mrb[8].mxu0 }
 0x333   : > { %v5537_v55 = vadd.f32 %v5505_v57, %v7902_v19  ;;  %v4490_v41 = vpop.f32.mrb[9].mxu0 }
 0x334   : > { %v5538_v3 = vadd.f32 %v4490_v41, %v7906_v54  ;;  %v5506_v50 = vpop.f32.mrb[10].mxu0 }
 0x335   : > { %4627 = vst.msk [vmem:[%s7949_s9 + $0x50] sm:$0xff] %vm1154_vm2, %v5537_v55  ;;  %v5539_v34 = vadd.f32 %v5506_v50, %v7910_v46  ;;  %v4493_v36 = vpop.f32.mrb[11].mxu0  ;;  %v4730_v19 = vmul.f32 %v5537_v55, %v5537_v55  ;;  %v4668_v21 = vsel %vm1154_vm2, %v5537_v55, 0.0 }
 0x336   : > { %4625 = vst.msk [vmem:[%s7949_s9 + $0x40] sm:$0xff] %vm1154_vm2, %v5538_v3  ;;  %v4664_v5 = vsel %vm1154_vm2, %v5538_v3, 0.0  ;;  %v4728_v26 = vmul.f32 %v5538_v3, %v5538_v3  ;;  %v5540_v52 = vadd.f32 %v4493_v36, %v7912_v58 }
 0x337   : > { %v4665_v28 = vadd.f32 %v4664_v5, %v4663_v23  ;;  %4628 = vst.msk [vmem:[%s7949_s9 + $0x58] sm:$0xff] %vm1154_vm2, %v5539_v34  ;;  %v4731_v40 = vmul.f32 %v5539_v34, %v5539_v34  ;;  %v4771_v2 = vsel %vm1154_vm2, %v4730_v19, 0.0  ;;  %v4670_v22 = vsel %vm1154_vm2, %v5539_v34, 0.0 }
 0x338   : > { %v4767_v30 = vsel %vm1154_vm2, %v4728_v26, 0.0  ;;  %4626 = vst.msk [vmem:[%s7949_s9 + $0x48] sm:$0xff] %vm1154_vm2, %v5540_v52  ;;  %v4666_v54 = vsel %vm1154_vm2, %v5540_v52, 0.0  ;;  %v4729_v35 = vmul.f32 %v5540_v52, %v5540_v52 }
 0x339   : > { %v4768_v46 = vadd.f32 %v4767_v30, %v4766_v48  ;;  %v4667_v27 = vadd.f32 %v4666_v54, %v4665_v28  ;;  %v4773_v60 = vsel %vm1154_vm2, %v4731_v40, 0.0 }
 0x33a   : > { %v4769_v37 = vsel %vm1154_vm2, %v4729_v35, 0.0 }
 0x33b   : > { %v4669_v58 = vadd.f32 %v4668_v21, %v4667_v27  ;;  %v4770_v47 = vadd.f32 %v4769_v37, %v4768_v46 }
 0x33d   : > { %v4772_v10 = vadd.f32 %v4771_v2, %v4770_v47  ;;  %v4671_v17 = vadd.f32 %v4670_v22, %v4669_v58 }
 0x33f   : > { %v4774_v6 = vadd.f32 %v4773_v60, %v4772_v10 }
 0x342   : > { %v5509_v51 = vpop.f32.mrb[12].mxu0 }
 0x343   : > { %v5541_v44 = vadd.f32 %v5509_v51, %v7922_v18  ;;  %v4506_v32 = vpop.f32.mrb[13].mxu0 }
 0x344   : > { %v5542_v4 = vadd.f32 %v4506_v32, %v7926_v13  ;;  %v5510_v11 = vpop.f32.mrb[14].mxu0 }
 0x345   : > { %4631 = vst.msk [vmem:[%s7949_s9 + $0x70] sm:$0xff] %vm1154_vm2, %v5541_v44  ;;  %v5543_v49 = vadd.f32 %v5510_v11, %v7930_v62  ;;  %v4509_v29 = vpop.f32.mrb[15].mxu0  ;;  %v4734_v53 = vmul.f32 %v5541_v44, %v5541_v44 }
 0x346   : > { %4629 = vst.msk [vmem:[%s7949_s9 + $0x60] sm:$0xff] %vm1154_vm2, %v5542_v4  ;;  %v4672_v45 = vsel %vm1154_vm2, %v5542_v4, 0.0  ;;  %v4732_v33 = vmul.f32 %v5542_v4, %v5542_v4  ;;  %v5544_v9 = vadd.f32 %v4509_v29, %v7932_v39  ;;  %v5377_v1 = vpop.f32.mrb[16].mxu1  ;;  %v4676_v39 = vsel %vm1154_vm2, %v5541_v44, 0.0 }
 0x347   : > { %v4673_v12 = vadd.f32 %v4672_v45, %v4671_v17  ;;  %4632 = vst.msk [vmem:[%s7949_s9 + $0x78] sm:$0xff] %vm1154_vm2, %v5543_v49  ;;  %v2714_v18 = vpop.f32.mrb[17].mxu1  ;;  %v4735_v16 = vmul.f32 %v5543_v49, %v5543_v49  ;;  %v4779_v42 = vsel %vm1154_vm2, %v4734_v53, 0.0  ;;  %v4678_v31 = vsel %vm1154_vm2, %v5543_v49, 0.0 }
 0x348   : > { %v4775_v13 = vsel %vm1154_vm2, %v4732_v33, 0.0  ;;  %4630 = vst.msk [vmem:[%s7949_s9 + $0x68] sm:$0xff] %vm1154_vm2, %v5544_v9  ;;  %v4674_v62 = vsel %vm1154_vm2, %v5544_v9, 0.0  ;;  %v4733_v24 = vmul.f32 %v5544_v9, %v5544_v9  ;;  %v5378_v56 = vpop.f32.mrb[18].mxu1 }
 0x349   : > { %v4776_v15 = vadd.f32 %v4775_v13, %v4774_v6  ;;  %v4675_v38 = vadd.f32 %v4674_v62, %v4673_v12  ;;  %v2717_v8 = vpop.f32.mrb[19].mxu1  ;;  %v4781_v48 = vsel %vm1154_vm2, %v4735_v16, 0.0 }
 0x34a   : > { %v4777_v14 = vsel %vm1154_vm2, %v4733_v24, 0.0 }
 0x34b   : > { %v4677_v0 = vadd.f32 %v4676_v39, %v4675_v38  ;;  %v4778_v20 = vadd.f32 %v4777_v14, %v4776_v15  ;;  %v5513_v63 = vpop.f32.mrb[16].mxu0 }
 0x34c   : > { %v5545_v61 = vadd.f32 %v5513_v63, %v5377_v1  ;;  %v4522_v7 = vpop.f32.mrb[17].mxu0 }
 0x34d   : > { %v4780_v59 = vadd.f32 %v4779_v42, %v4778_v20  ;;  %v5546_v25 = vadd.f32 %v4522_v7, %v2714_v18  ;;  %v4679_v23 = vadd.f32 %v4678_v31, %v4677_v0  ;;  %v5514_v43 = vpop.f32.mrb[18].mxu0 }
 0x34e   : > { %4635 = vst.msk [vmem:[%s7949_s9 + $0x90] sm:$0xff] %vm1154_vm2, %v5545_v61  ;;  %v5547_v57 = vadd.f32 %v5514_v43, %v5378_v56  ;;  %v4525_v55 = vpop.f32.mrb[19].mxu0  ;;  %v5381_v41 = vpop.f32.mrb[20].mxu1  ;;  %v4738_v28 = vmul.f32 %v5545_v61, %v5545_v61  ;;  %v4684_v40 = vsel %vm1154_vm2, %v5545_v61, 0.0 }
 0x34f   : > { %4633 = vst.msk [vmem:[%s7949_s9 + $0x80] sm:$0xff] %vm1154_vm2, %v5546_v25  ;;  %v4680_v3 = vsel %vm1154_vm2, %v5546_v25, 0.0  ;;  %v4736_v50 = vmul.f32 %v5546_v25, %v5546_v25  ;;  %v4782_v34 = vadd.f32 %v4781_v48, %v4780_v59  ;;  %v5548_v36 = vadd.f32 %v4525_v55, %v2717_v8  ;;  %v2730_v5 = vpop.f32.mrb[21].mxu1 }
 0x350   : > { %v4681_v26 = vadd.f32 %v4680_v3, %v4679_v23  ;;  %4636 = vst.msk [vmem:[%s7949_s9 + $0x98] sm:$0xff] %vm1154_vm2, %v5547_v57  ;;  %v5382_v52 = vpop.f32.mrb[22].mxu1  ;;  %v4739_v27 = vmul.f32 %v5547_v57, %v5547_v57  ;;  %v4787_v17 = vsel %vm1154_vm2, %v4738_v28, 0.0  ;;  %v4686_v60 = vsel %vm1154_vm2, %v5547_v57, 0.0 }
 0x351   : > { %v4783_v19 = vsel %vm1154_vm2, %v4736_v50, 0.0  ;;  %4634 = vst.msk [vmem:[%s7949_s9 + $0x88] sm:$0xff] %vm1154_vm2, %v5548_v36  ;;  %v4682_v30 = vsel %vm1154_vm2, %v5548_v36, 0.0  ;;  %v4737_v54 = vmul.f32 %v5548_v36, %v5548_v36  ;;  %v2733_v35 = vpop.f32.mrb[23].mxu1 }
 0x352   : > { %v4784_v46 = vadd.f32 %v4783_v19, %v4782_v34  ;;  %v4683_v21 = vadd.f32 %v4682_v30, %v4681_v26  ;;  %v4789_v44 = vsel %vm1154_vm2, %v4739_v27, 0.0 }
 0x353   : > { %v4785_v37 = vsel %vm1154_vm2, %v4737_v54, 0.0  ;;  %v5517_v58 = vpop.f32.mrb[20].mxu0 }
 0x354   : > { %v4685_v47 = vadd.f32 %v4684_v40, %v4683_v21  ;;  %v4786_v2 = vadd.f32 %v4785_v37, %v4784_v46  ;;  %v5549_v22 = vadd.f32 %v5517_v58, %v5381_v41  ;;  %v4538_v10 = vpop.f32.mrb[21].mxu0 }
 0x355   : > { %v5550_v6 = vadd.f32 %v4538_v10, %v2730_v5  ;;  %v5518_v51 = vpop.f32.mrb[22].mxu0 }
 0x356   : > { %v4788_v32 = vadd.f32 %v4787_v17, %v4786_v2  ;;  %4639 = vst.msk [vmem:[%s7949_s9 + $0xb0] sm:$0xff] %vm1154_vm2, %v5549_v22  ;;  %v4687_v4 = vadd.f32 %v4686_v60, %v4685_v47  ;;  %v4541_v11 = vpop.f32.mrb[23].mxu0  ;;  %v5385_v49 = vpop.f32.mrb[24].mxu1  ;;  %v5551_v33 = vadd.f32 %v5518_v51, %v5382_v52  ;;  %v4742_v56 = vmul.f32 %v5549_v22, %v5549_v22 }
 0x357   : > { %4637 = vst.msk [vmem:[%s7949_s9 + $0xa0] sm:$0xff] %vm1154_vm2, %v5550_v6  ;;  %v4688_v29 = vsel %vm1154_vm2, %v5550_v6, 0.0  ;;  %v4740_v45 = vmul.f32 %v5550_v6, %v5550_v6  ;;  %v5552_v9 = vadd.f32 %v4541_v11, %v2733_v35  ;;  %v2746_v1 = vpop.f32.mrb[25].mxu1  ;;  %v4692_v39 = vsel %vm1154_vm2, %v5549_v22, 0.0 }
 0x358   : > { %v4689_v12 = vadd.f32 %v4688_v29, %v4687_v4  ;;  %v4790_v18 = vadd.f32 %v4789_v44, %v4788_v32  ;;  %v5386_v53 = vpop.f32.mrb[26].mxu1  ;;  %4640 = vst.msk [vmem:[%s7949_s9 + $0xb8] sm:$0xff] %vm1154_vm2, %v5551_v33  ;;  %v4743_v14 = vmul.f32 %v5551_v33, %v5551_v33  ;;  %v4694_v31 = vsel %vm1154_vm2, %v5551_v33, 0.0 }
 0x359   : > { %v4791_v13 = vsel %vm1154_vm2, %v4740_v45, 0.0  ;;  %4638 = vst.msk [vmem:[%s7949_s9 + $0xa8] sm:$0xff] %vm1154_vm2, %v5552_v9  ;;  %v4690_v62 = vsel %vm1154_vm2, %v5552_v9, 0.0  ;;  %v2749_v24 = vpop.f32.mrb[27].mxu1  ;;  %v4741_v8 = vmul.f32 %v5552_v9, %v5552_v9  ;;  %v4795_v25 = vsel %vm1154_vm2, %v4742_v56, 0.0 }
 0x35a   : > { %v4792_v15 = vadd.f32 %v4791_v13, %v4790_v18  ;;  %v4691_v38 = vadd.f32 %v4690_v62, %v4689_v12  ;;  %v4797_v36 = vsel %vm1154_vm2, %v4743_v14, 0.0 }
 0x35b   : > { %v5521_v16 = vpop.f32.mrb[24].mxu0  ;;  %v4793_v20 = vsel %vm1154_vm2, %v4741_v8, 0.0 }
 0x35c   : > { %v4693_v0 = vadd.f32 %v4692_v39, %v4691_v38  ;;  %v5553_v63 = vadd.f32 %v5521_v16, %v5385_v49  ;;  %v4554_v42 = vpop.f32.mrb[25].mxu0  ;;  %v4794_v61 = vadd.f32 %v4793_v20, %v4792_v15 }
 0x35d   : > { %v5554_v7 = vadd.f32 %v4554_v42, %v2746_v1  ;;  %v5522_v59 = vpop.f32.mrb[26].mxu0 }
 0x35e   : > { %4643 = vst.msk [vmem:[%s7949_s9 + $0xd0] sm:$0xff] %vm1154_vm2, %v5553_v63  ;;  %v4695_v23 = vadd.f32 %v4694_v31, %v4693_v0  ;;  %v5555_v43 = vadd.f32 %v5522_v59, %v5386_v53  ;;  %v4557_v48 = vpop.f32.mrb[27].mxu0  ;;  %v5389_v57 = vpop.f32.mrb[28].mxu1  ;;  %v4796_v55 = vadd.f32 %v4795_v25, %v4794_v61  ;;  %v4746_v35 = vmul.f32 %v5553_v63, %v5553_v63 }
 0x35f   : > { %4641 = vst.msk [vmem:[%s7949_s9 + $0xc0] sm:$0xff] %vm1154_vm2, %v5554_v7  ;;  %v4696_v41 = vsel %vm1154_vm2, %v5554_v7, 0.0  ;;  %v4744_v3 = vmul.f32 %v5554_v7, %v5554_v7  ;;  %v5556_v50 = vadd.f32 %v4557_v48, %v2749_v24  ;;  %v2762_v34 = vpop.f32.mrb[29].mxu1  ;;  %v4700_v27 = vsel %vm1154_vm2, %v5553_v63, 0.0 }
 0x360   : > { %v4697_v5 = vadd.f32 %v4696_v41, %v4695_v23  ;;  %4644 = vst.msk [vmem:[%s7949_s9 + $0xd8] sm:$0xff] %vm1154_vm2, %v5555_v43  ;;  %v5390_v26 = vpop.f32.mrb[30].mxu1  ;;  %v4798_v52 = vadd.f32 %v4797_v36, %v4796_v55  ;;  %v4747_v58 = vmul.f32 %v5555_v43, %v5555_v43  ;;  %v4702_v10 = vsel %vm1154_vm2, %v5555_v43, 0.0 }
 0x361   : > { %v4799_v28 = vsel %vm1154_vm2, %v4744_v3, 0.0  ;;  %4642 = vst.msk [vmem:[%s7949_s9 + $0xc8] sm:$0xff] %vm1154_vm2, %v5556_v50  ;;  %v4698_v19 = vsel %vm1154_vm2, %v5556_v50, 0.0  ;;  %v4745_v30 = vmul.f32 %v5556_v50, %v5556_v50  ;;  %v2765_v54 = vpop.f32.mrb[31].mxu1  ;;  %v4803_v51 = vsel %vm1154_vm2, %v4746_v35, 0.0 }
 0x362   : > { %v4699_v46 = vadd.f32 %v4698_v19, %v4697_v5  ;;  %v4800_v21 = vadd.f32 %v4799_v28, %v4798_v52  ;;  %v4805_v33 = vsel %vm1154_vm2, %v4747_v58, 0.0 }
 0x363   : > { %v4801_v40 = vsel %vm1154_vm2, %v4745_v30, 0.0  ;;  %v5525_v37 = vpop.f32.mrb[28].mxu0 }
 0x364   : > { %v4701_v47 = vadd.f32 %v4700_v27, %v4699_v46  ;;  %v5557_v2 = vadd.f32 %v5525_v37, %v5389_v57  ;;  %v4570_v22 = vpop.f32.mrb[29].mxu0  ;;  %v4802_v17 = vadd.f32 %v4801_v40, %v4800_v21 }
 0x365   : > { %v5558_v60 = vadd.f32 %v4570_v22, %v2762_v34  ;;  %v5526_v6 = vpop.f32.mrb[30].mxu0 }
 0x366   : > { %4647 = vst.msk [vmem:[%s7949_s9 + $0xf0] sm:$0xff] %vm1154_vm2, %v5557_v2  ;;  %v4703_v44 = vadd.f32 %v4702_v10, %v4701_v47  ;;  %v5559_v32 = vadd.f32 %v5526_v6, %v5390_v26  ;;  %v4573_v4 = vpop.f32.mrb[31].mxu0  ;;  %v4804_v11 = vadd.f32 %v4803_v51, %v4802_v17  ;;  %v4750_v13 = vmul.f32 %v5557_v2, %v5557_v2 }
 0x367   : > { %4645 = vst.msk [vmem:[%s7949_s9 + $0xe0] sm:$0xff] %vm1154_vm2, %v5558_v60  ;;  %v4704_v49 = vsel %vm1154_vm2, %v5558_v60, 0.0  ;;  %v4748_v29 = vmul.f32 %v5558_v60, %v5558_v60  ;;  %v5560_v45 = vadd.f32 %v4573_v4, %v2765_v54  ;;  %v4708_v24 = vsel %vm1154_vm2, %v5557_v2, 0.0 }
 0x368   : > { %v4705_v9 = vadd.f32 %v4704_v49, %v4703_v44  ;;  %4648 = vst.msk [vmem:[%s7949_s9 + $0xf8] sm:$0xff] %vm1154_vm2, %v5559_v32  ;;  %v4806_v1 = vadd.f32 %v4805_v33, %v4804_v11  ;;  %v4751_v38 = vmul.f32 %v5559_v32, %v5559_v32  ;;  %v4710_v39 = vsel %vm1154_vm2, %v5559_v32, 0.0 }
 0x369   : > { %v4807_v12 = vsel %vm1154_vm2, %v4748_v29, 0.0  ;;  %4646 = vst.msk [vmem:[%s7949_s9 + $0xe8] sm:$0xff] %vm1154_vm2, %v5560_v45  ;;  %v4706_v18 = vsel %vm1154_vm2, %v5560_v45, 0.0  ;;  %v4749_v53 = vmul.f32 %v5560_v45, %v5560_v45  ;;  %v4811_v14 = vsel %vm1154_vm2, %v4750_v13, 0.0 }
 0x36a   : > { %v4707_v62 = vadd.f32 %v4706_v18, %v4705_v9  ;;  %v4808_v56 = vadd.f32 %v4807_v12, %v4806_v1  ;;  %v4813_v63 = vsel %vm1154_vm2, %v4751_v38, 0.0 }
 0x36b   : > { %v4809_v15 = vsel %vm1154_vm2, %v4749_v53, 0.0 }
 0x36c   : > { %v4709_v8 = vadd.f32 %v4708_v24, %v4707_v62  ;;  %v4810_v16 = vadd.f32 %v4809_v15, %v4808_v56 }
 0x36e   : > { %v4711_v0 = vadd.f32 %v4710_v39, %v4709_v8  ;;  %v4812_v20 = vadd.f32 %v4811_v14, %v4810_v16 }
 0x370   : > { %v4712_v42 = vrot.slane %v4711_v0, 4  ;;  %v4814_v31 = vadd.f32 %v4813_v63, %v4812_v20 }
 0x372   : > { %v4713_v61 = vadd.f32 %v4712_v42, %v4711_v0  ;;  %v4815_v7 = vrot.slane %v4814_v31, 4 }
 0x374   : > { %v4714_v59 = vrot.slane %v4713_v61, 2  ;;  %v4816_v25 = vadd.f32 %v4815_v7, %v4814_v31 }
 0x376   : > { %v4715_v23 = vadd.f32 %v4714_v59, %v4713_v61  ;;  %v4817_v43 = vrot.slane %v4816_v25, 2 }
 0x378   : > { %v4716_v48 = vrot.slane %v4715_v23, 1  ;;  %v4818_v57 = vadd.f32 %v4817_v43, %v4816_v25 }
 0x37a   : > { %v4717_v55 = vadd.f32 %v4716_v48, %v4715_v23  ;;  %v4819_v41 = vrot.slane %v4818_v57, 1 }
 0x37c   : > { %4719 = vst.msk [vmem:[%s262_s12] sm:$0x1] %vm4718_vm4, %v4717_v55  ;;  %v4820_v3 = vadd.f32 %v4819_v41, %v4818_v57 }
 0x37e   : > { %4821 = vst.msk [vmem:[%s262_s12 + $0x1] sm:$0x1] %vm4718_vm4, %v4820_v3 }
 0x37f PF: > { %s17_s21 = sadd.s32 1, %s5812_s21  }
 0x380   : > { %p14_p4 = scmp.ge.s32.totalorder %s17_s21, 4  }
 0x382   :  { %16 = sbr.rel (!%p14_p4) target bundleno = 1 (0x1), region = 82 }

</bundles_post_ra>
